<compile_context>
chip_gen: v7x
topology: tpu7x:2x2x1
jax: 0.10.0
libtpu: 0.0.40
codegen_flags: <defaults>
</compile_context>

<pallas_src>
import jax
import jax.numpy as jnp
from jax.experimental import pallas as pl
from jax.experimental.pallas import tpu as pltpu

INPUT_DIM = 1000     # vocab size
HIDDEN_DIM = 128     # lane-aligned hidden size (matches the module)
OUTPUT_DIM = 5
LANE = 128           # lane width for the padded FC output


def fused_lstm_kernel(ids_ref, gtab_ref, whh_ref, wfc_ref, bfc_ref, out_ref):
    """Fused embedding-gather + LSTM recurrence + final FC.

    ids_ref : (B, T) int32 token ids, SMEM (scalar-indexed reads)
    gtab_ref: (V, 4H) fused gate table  emb_table @ W_ih + (b_ih + b_hh), VMEM
    whh_ref : (H, 4H) hidden->gates weights (gate order i, f, g, o), VMEM
    wfc_ref : (H, 128) lane-padded final linear weights (cols >= O are zero)
    bfc_ref : (1, 128) lane-padded final linear bias
    out_ref : (B, 128) lane-padded output; caller slices [:, :O]
    """
    B, T = ids_ref.shape
    H = whh_ref.shape[0]

    def sigmoid(x):
        # sigmoid(x) == 0.5 * tanh(0.5 * x) + 0.5  -> single EUP (tanh) push
        # per vreg instead of exp + reciprocal on the serial critical path.
        return 0.5 * jnp.tanh(0.5 * x) + 0.5

    def gather_gates(t):
        # (B, 4H) pre-activations for timestep t: dynamic single-row loads of
        # the fused gate table, selected by SMEM token ids (B is static).
        rows = [gtab_ref[pl.ds(ids_ref[b, t], 1), :] for b in range(B)]
        return jnp.concatenate(rows, axis=0)

    # ---- peeled step t = 0 (h0 = c0 = 0): no h @ W_hh matmul, no f*c term ----
    g0 = gather_gates(0)
    i_g = sigmoid(g0[:, :H])
    g_g = jnp.tanh(g0[:, 2 * H:3 * H])
    o_g = sigmoid(g0[:, 3 * H:])
    c = i_g * g_g
    h = o_g * jnp.tanh(c)

    # ---- steps 1 .. T-1 ----
    def step(t, carry):
        h_prev, c_prev = carry
        gates = (jnp.dot(h_prev, whh_ref[...],
                         preferred_element_type=jnp.float32)
                 + gather_gates(t))                          # (B, 4H)
        if_g = sigmoid(gates[:, :2 * H])                     # one slab: [i | f]
        i_gt = if_g[:, :H]
        f_gt = if_g[:, H:]
        g_gt = jnp.tanh(gates[:, 2 * H:3 * H])
        o_gt = sigmoid(gates[:, 3 * H:])
        c_new = f_gt * c_prev + i_gt * g_gt
        h_new = o_gt * jnp.tanh(c_new)
        return h_new, c_new

    # Unrolled so the LLO scheduler can overlap MXU pushes with the previous
    # step's EUP/VPU work, and h/c stay in vregs across steps.
    h, c = jax.lax.fori_loop(1, T, step, (h, c), unroll=True)

    out_ref[...] = (jnp.dot(h, wfc_ref[...],
                            preferred_element_type=jnp.float32)
                    + bfc_ref[...])


@jax.jit
def worst_case_ai_forward(x_ids, kparams):
    """x_ids: (B, T) int32 token ids. Returns (B, OUTPUT_DIM) float32."""
    gtab = kparams["gate_table"]          # (V, 4H)
    whh = kparams["w_hh"]                 # (H, 4H)
    wfc = kparams["w_fc_pad"]             # (H, LANE)
    bfc = kparams["b_fc_pad"]             # (1, LANE)

    B, T = x_ids.shape
    H = whh.shape[0]

    flops = 2 * (T - 1) * B * H * (4 * H) + 2 * B * H * LANE
    transcendentals = T * B * 5 * H
    bytes_accessed = 4 * (gtab.size + whh.size + wfc.size + bfc.size
                          + B * LANE + x_ids.size)

    vmem = pl.BlockSpec(memory_space=pltpu.MemorySpace.VMEM)
    smem = pl.BlockSpec(memory_space=pltpu.MemorySpace.SMEM)

    out_pad = pl.pallas_call(
        fused_lstm_kernel,
        out_shape=jax.ShapeDtypeStruct((B, LANE), jnp.float32),
        in_specs=[smem, vmem, vmem, vmem, vmem],
        out_specs=vmem,
        cost_estimate=pl.CostEstimate(flops=flops,
                                      transcendentals=transcendentals,
                                      bytes_accessed=bytes_accessed),
    )(x_ids, gtab, whh, wfc, bfc)

    return out_pad[:, :OUTPUT_DIM]


def prepare_kernel_params(params):
    """One-time (outside the per-call path) fusion / padding of parameters."""
    H = params["w_hh"].shape[0]
    O = params["w_fc"].shape[1]
    # Fused embedding + input-to-gates table: G[v] = emb[v] @ W_ih + b.
    gate_table = (jnp.dot(params["embedding"], params["w_ih"],
                          preferred_element_type=jnp.float32)
                  + params["b"])                                     # (V, 4H)
    w_fc_pad = jnp.zeros((H, LANE), jnp.float32).at[:, :O].set(params["w_fc"])
    b_fc_pad = jnp.zeros((1, LANE), jnp.float32).at[:, :O].set(params["b_fc"])
    return {
        "gate_table": gate_table,
        "w_hh": params["w_hh"],
        "w_fc_pad": w_fc_pad,
        "b_fc_pad": b_fc_pad,
    }


def reference_forward(x_ids, params):
    """Pure-JAX reference (same math as the PyTorch module, scan over time)."""
    emb = jnp.take(params["embedding"], x_ids, axis=0)      # (B, T, H)
    B, T, H = emb.shape

    def step(carry, x_t):
        h, c = carry
        gates = x_t @ params["w_ih"] + h @ params["w_hh"] + params["b"][0]
        i_g = jax.nn.sigmoid(gates[:, 0 * H:1 * H])
        f_g = jax.nn.sigmoid(gates[:, 1 * H:2 * H])
        g_g = jnp.tanh(gates[:, 2 * H:3 * H])
        o_g = jax.nn.sigmoid(gates[:, 3 * H:4 * H])
        c_new = f_g * c + i_g * g_g
        h_new = o_g * jnp.tanh(c_new)
        return (h_new, c_new), None

    h0 = jnp.zeros((B, H), jnp.float32)
    c0 = jnp.zeros((B, H), jnp.float32)
    (h_last, _), _ = jax.lax.scan(step, (h0, c0), jnp.transpose(emb, (1, 0, 2)))
    return h_last @ params["w_fc"] + params["b_fc"][0]


def init_params(key, vocab, hidden, out_dim):
    """Deterministic init mirroring the PyTorch module's parameter shapes.

    Gate ordering in the 4H axis is [i, f, g, o] (PyTorch convention). Weights
    are stored pre-transposed for right-multiplication: (H, 4H) and (H, O).
    """
    k0, k1, k2, k3, k4, k5, k6 = jax.random.split(key, 7)
    scale = 1.0 / jnp.sqrt(hidden)
    return {
        "embedding": jax.random.normal(k0, (vocab, hidden), jnp.float32),
        "w_ih": jax.random.uniform(k1, (hidden, 4 * hidden), jnp.float32,
                                   -scale, scale),
        "w_hh": jax.random.uniform(k2, (hidden, 4 * hidden), jnp.float32,
                                   -scale, scale),
        # combined bias = b_ih + b_hh (kept as one (1, 4H) row)
        "b": (jax.random.uniform(k3, (1, 4 * hidden), jnp.float32, -scale, scale)
              + jax.random.uniform(k4, (1, 4 * hidden), jnp.float32, -scale, scale)),
        "w_fc": jax.random.uniform(k5, (hidden, out_dim), jnp.float32,
                                   -scale, scale),
        "b_fc": jax.random.uniform(k6, (1, out_dim), jnp.float32, -scale, scale),
    }


if __name__ == "__main__":
    key = jax.random.PRNGKey(0)
    pkey, xkey = jax.random.split(key)

    B, T = 8, 8   # small, sublane-aligned toy shapes
    params = init_params(pkey, INPUT_DIM, HIDDEN_DIM, OUTPUT_DIM)
    kparams = jax.tree_util.tree_map(jax.block_until_ready,
                                     prepare_kernel_params(params))
    x_ids = jax.random.randint(xkey, (B, T), 0, INPUT_DIM, dtype=jnp.int32)

    out = worst_case_ai_forward(x_ids, kparams)
    out = jax.block_until_ready(out)

    ref = jax.block_until_ready(reference_forward(x_ids, params))
    assert out.shape == (B, OUTPUT_DIM)
    assert jnp.allclose(out, ref, rtol=1e-3, atol=1e-3), (
        f"mismatch: max abs err {jnp.max(jnp.abs(out - ref))}")

    print("KERNEL_OK")
</pallas_src>

<mosaic_0001>
module attributes {stable_mosaic.version = 11 : i64} {
  func.func @fused_lstm_kernel(%arg0: memref<8x8xi32, #tpu.memory_space<smem>>, %arg1: memref<1000x512xf32, #tpu.memory_space<vmem>>, %arg2: memref<128x512xf32, #tpu.memory_space<vmem>>, %arg3: memref<128x128xf32, #tpu.memory_space<vmem>>, %arg4: memref<1x128xf32, #tpu.memory_space<vmem>>, %arg5: memref<8x128xf32, #tpu.memory_space<vmem>>) attributes {dimension_semantics = [], scalar_prefetch = 0 : i64, scratch_operands = 0 : i64, tpu.core_type = #tpu.core_type<tc>} {
    %c0 = arith.constant 0 : index
    %c0_0 = arith.constant 0 : index
    %0 = memref.load %arg0[%c0, %c0_0] : memref<8x8xi32, #tpu.memory_space<smem>>
    %1 = arith.index_cast %0 : i32 to index
    %c0_1 = arith.constant 0 : index
    %2 = vector.load %arg1[%1, %c0_1] : memref<1000x512xf32, #tpu.memory_space<vmem>>, vector<1x512xf32>
    %c1 = arith.constant 1 : index
    %c0_2 = arith.constant 0 : index
    %3 = memref.load %arg0[%c1, %c0_2] : memref<8x8xi32, #tpu.memory_space<smem>>
    %4 = arith.index_cast %3 : i32 to index
    %c0_3 = arith.constant 0 : index
    %5 = vector.load %arg1[%4, %c0_3] : memref<1000x512xf32, #tpu.memory_space<vmem>>, vector<1x512xf32>
    %c2 = arith.constant 2 : index
    %c0_4 = arith.constant 0 : index
    %6 = memref.load %arg0[%c2, %c0_4] : memref<8x8xi32, #tpu.memory_space<smem>>
    %7 = arith.index_cast %6 : i32 to index
    %c0_5 = arith.constant 0 : index
    %8 = vector.load %arg1[%7, %c0_5] : memref<1000x512xf32, #tpu.memory_space<vmem>>, vector<1x512xf32>
    %c3 = arith.constant 3 : index
    %c0_6 = arith.constant 0 : index
    %9 = memref.load %arg0[%c3, %c0_6] : memref<8x8xi32, #tpu.memory_space<smem>>
    %10 = arith.index_cast %9 : i32 to index
    %c0_7 = arith.constant 0 : index
    %11 = vector.load %arg1[%10, %c0_7] : memref<1000x512xf32, #tpu.memory_space<vmem>>, vector<1x512xf32>
    %c4 = arith.constant 4 : index
    %c0_8 = arith.constant 0 : index
    %12 = memref.load %arg0[%c4, %c0_8] : memref<8x8xi32, #tpu.memory_space<smem>>
    %13 = arith.index_cast %12 : i32 to index
    %c0_9 = arith.constant 0 : index
    %14 = vector.load %arg1[%13, %c0_9] : memref<1000x512xf32, #tpu.memory_space<vmem>>, vector<1x512xf32>
    %c5 = arith.constant 5 : index
    %c0_10 = arith.constant 0 : index
    %15 = memref.load %arg0[%c5, %c0_10] : memref<8x8xi32, #tpu.memory_space<smem>>
    %16 = arith.index_cast %15 : i32 to index
    %c0_11 = arith.constant 0 : index
    %17 = vector.load %arg1[%16, %c0_11] : memref<1000x512xf32, #tpu.memory_space<vmem>>, vector<1x512xf32>
    %c6 = arith.constant 6 : index
    %c0_12 = arith.constant 0 : index
    %18 = memref.load %arg0[%c6, %c0_12] : memref<8x8xi32, #tpu.memory_space<smem>>
    %19 = arith.index_cast %18 : i32 to index
    %c0_13 = arith.constant 0 : index
    %20 = vector.load %arg1[%19, %c0_13] : memref<1000x512xf32, #tpu.memory_space<vmem>>, vector<1x512xf32>
    %c7 = arith.constant 7 : index
    %c0_14 = arith.constant 0 : index
    %21 = memref.load %arg0[%c7, %c0_14] : memref<8x8xi32, #tpu.memory_space<smem>>
    %22 = arith.index_cast %21 : i32 to index
    %c0_15 = arith.constant 0 : index
    %23 = vector.load %arg1[%22, %c0_15] : memref<1000x512xf32, #tpu.memory_space<vmem>>, vector<1x512xf32>
    %24 = tpu.concatenate %2, %5, %8, %11, %14, %17, %20, %23 in 0 : vector<1x512xf32>, vector<1x512xf32>, vector<1x512xf32>, vector<1x512xf32>, vector<1x512xf32>, vector<1x512xf32>, vector<1x512xf32>, vector<1x512xf32> -> vector<8x512xf32>
    %25 = vector.extract_strided_slice %24 {offsets = [0, 0], sizes = [8, 128], strides = [1, 1]} : vector<8x512xf32> to vector<8x128xf32>
    %cst = arith.constant 5.000000e-01 : f32
    %26 = vector.broadcast %cst : f32 to vector<8x128xf32>
    %27 = arith.mulf %26, %25 : vector<8x128xf32>
    %28 = math.tanh %27 : vector<8x128xf32>
    %cst_16 = arith.constant 5.000000e-01 : f32
    %29 = vector.broadcast %cst_16 : f32 to vector<8x128xf32>
    %30 = arith.mulf %29, %28 : vector<8x128xf32>
    %cst_17 = arith.constant 5.000000e-01 : f32
    %31 = vector.broadcast %cst_17 : f32 to vector<8x128xf32>
    %32 = arith.addf %30, %31 : vector<8x128xf32>
    %33 = vector.extract_strided_slice %24 {offsets = [0, 256], sizes = [8, 128], strides = [1, 1]} : vector<8x512xf32> to vector<8x128xf32>
    %34 = math.tanh %33 : vector<8x128xf32>
    %35 = vector.extract_strided_slice %24 {offsets = [0, 384], sizes = [8, 128], strides = [1, 1]} : vector<8x512xf32> to vector<8x128xf32>
    %cst_18 = arith.constant 5.000000e-01 : f32
    %36 = vector.broadcast %cst_18 : f32 to vector<8x128xf32>
    %37 = arith.mulf %36, %35 : vector<8x128xf32>
    %38 = math.tanh %37 : vector<8x128xf32>
    %cst_19 = arith.constant 5.000000e-01 : f32
    %39 = vector.broadcast %cst_19 : f32 to vector<8x128xf32>
    %40 = arith.mulf %39, %38 : vector<8x128xf32>
    %cst_20 = arith.constant 5.000000e-01 : f32
    %41 = vector.broadcast %cst_20 : f32 to vector<8x128xf32>
    %42 = arith.addf %40, %41 : vector<8x128xf32>
    %43 = arith.mulf %32, %34 : vector<8x128xf32>
    %44 = math.tanh %43 : vector<8x128xf32>
    %45 = arith.mulf %42, %44 : vector<8x128xf32>
    %c1_i32 = arith.constant 1 : i32
    %c0_21 = arith.constant 0 : index
    %c0_22 = arith.constant 0 : index
    %46 = vector.load %arg2[%c0_21, %c0_22] : memref<128x512xf32, #tpu.memory_space<vmem>>, vector<128x512xf32>
    %cst_23 = arith.constant dense<0.000000e+00> : vector<8x512xf32>
    %47 = tpu.matmul %45, %46, %cst_23 {dimension_numbers = #tpu.dot_dimension_numbers<[1], [0], [0], [1], [0, 0, 1, 1], [], []>} : vector<8x128xf32>, vector<128x512xf32>, vector<8x512xf32> -> vector<8x512xf32>
    %c0_24 = arith.constant 0 : index
    %48 = arith.index_cast %c1_i32 : i32 to index
    %49 = memref.load %arg0[%c0_24, %48] : memref<8x8xi32, #tpu.memory_space<smem>>
    %50 = arith.index_cast %49 : i32 to index
    %c0_25 = arith.constant 0 : index
    %51 = vector.load %arg1[%50, %c0_25] : memref<1000x512xf32, #tpu.memory_space<vmem>>, vector<1x512xf32>
    %c1_26 = arith.constant 1 : index
    %52 = arith.index_cast %c1_i32 : i32 to index
    %53 = memref.load %arg0[%c1_26, %52] : memref<8x8xi32, #tpu.memory_space<smem>>
    %54 = arith.index_cast %53 : i32 to index
    %c0_27 = arith.constant 0 : index
    %55 = vector.load %arg1[%54, %c0_27] : memref<1000x512xf32, #tpu.memory_space<vmem>>, vector<1x512xf32>
    %c2_28 = arith.constant 2 : index
    %56 = arith.index_cast %c1_i32 : i32 to index
    %57 = memref.load %arg0[%c2_28, %56] : memref<8x8xi32, #tpu.memory_space<smem>>
    %58 = arith.index_cast %57 : i32 to index
    %c0_29 = arith.constant 0 : index
    %59 = vector.load %arg1[%58, %c0_29] : memref<1000x512xf32, #tpu.memory_space<vmem>>, vector<1x512xf32>
    %c3_30 = arith.constant 3 : index
    %60 = arith.index_cast %c1_i32 : i32 to index
    %61 = memref.load %arg0[%c3_30, %60] : memref<8x8xi32, #tpu.memory_space<smem>>
    %62 = arith.index_cast %61 : i32 to index
    %c0_31 = arith.constant 0 : index
    %63 = vector.load %arg1[%62, %c0_31] : memref<1000x512xf32, #tpu.memory_space<vmem>>, vector<1x512xf32>
    %c4_32 = arith.constant 4 : index
    %64 = arith.index_cast %c1_i32 : i32 to index
    %65 = memref.load %arg0[%c4_32, %64] : memref<8x8xi32, #tpu.memory_space<smem>>
    %66 = arith.index_cast %65 : i32 to index
    %c0_33 = arith.constant 0 : index
    %67 = vector.load %arg1[%66, %c0_33] : memref<1000x512xf32, #tpu.memory_space<vmem>>, vector<1x512xf32>
    %c5_34 = arith.constant 5 : index
    %68 = arith.index_cast %c1_i32 : i32 to index
    %69 = memref.load %arg0[%c5_34, %68] : memref<8x8xi32, #tpu.memory_space<smem>>
    %70 = arith.index_cast %69 : i32 to index
    %c0_35 = arith.constant 0 : index
    %71 = vector.load %arg1[%70, %c0_35] : memref<1000x512xf32, #tpu.memory_space<vmem>>, vector<1x512xf32>
    %c6_36 = arith.constant 6 : index
    %72 = arith.index_cast %c1_i32 : i32 to index
    %73 = memref.load %arg0[%c6_36, %72] : memref<8x8xi32, #tpu.memory_space<smem>>
    %74 = arith.index_cast %73 : i32 to index
    %c0_37 = arith.constant 0 : index
    %75 = vector.load %arg1[%74, %c0_37] : memref<1000x512xf32, #tpu.memory_space<vmem>>, vector<1x512xf32>
    %c7_38 = arith.constant 7 : index
    %76 = arith.index_cast %c1_i32 : i32 to index
    %77 = memref.load %arg0[%c7_38, %76] : memref<8x8xi32, #tpu.memory_space<smem>>
    %78 = arith.index_cast %77 : i32 to index
    %c0_39 = arith.constant 0 : index
    %79 = vector.load %arg1[%78, %c0_39] : memref<1000x512xf32, #tpu.memory_space<vmem>>, vector<1x512xf32>
    %80 = tpu.concatenate %51, %55, %59, %63, %67, %71, %75, %79 in 0 : vector<1x512xf32>, vector<1x512xf32>, vector<1x512xf32>, vector<1x512xf32>, vector<1x512xf32>, vector<1x512xf32>, vector<1x512xf32>, vector<1x512xf32> -> vector<8x512xf32>
    %81 = arith.addf %47, %80 : vector<8x512xf32>
    %82 = vector.extract_strided_slice %81 {offsets = [0, 0], sizes = [8, 256], strides = [1, 1]} : vector<8x512xf32> to vector<8x256xf32>
    %cst_40 = arith.constant 5.000000e-01 : f32
    %83 = vector.broadcast %cst_40 : f32 to vector<8x256xf32>
    %84 = arith.mulf %83, %82 : vector<8x256xf32>
    %85 = math.tanh %84 : vector<8x256xf32>
    %cst_41 = arith.constant 5.000000e-01 : f32
    %86 = vector.broadcast %cst_41 : f32 to vector<8x256xf32>
    %87 = arith.mulf %86, %85 : vector<8x256xf32>
    %cst_42 = arith.constant 5.000000e-01 : f32
    %88 = vector.broadcast %cst_42 : f32 to vector<8x256xf32>
    %89 = arith.addf %87, %88 : vector<8x256xf32>
    %90 = vector.extract_strided_slice %89 {offsets = [0, 0], sizes = [8, 128], strides = [1, 1]} : vector<8x256xf32> to vector<8x128xf32>
    %91 = vector.extract_strided_slice %89 {offsets = [0, 128], sizes = [8, 128], strides = [1, 1]} : vector<8x256xf32> to vector<8x128xf32>
    %92 = vector.extract_strided_slice %81 {offsets = [0, 256], sizes = [8, 128], strides = [1, 1]} : vector<8x512xf32> to vector<8x128xf32>
    %93 = math.tanh %92 : vector<8x128xf32>
    %94 = vector.extract_strided_slice %81 {offsets = [0, 384], sizes = [8, 128], strides = [1, 1]} : vector<8x512xf32> to vector<8x128xf32>
    %cst_43 = arith.constant 5.000000e-01 : f32
    %95 = vector.broadcast %cst_43 : f32 to vector<8x128xf32>
    %96 = arith.mulf %95, %94 : vector<8x128xf32>
    %97 = math.tanh %96 : vector<8x128xf32>
    %cst_44 = arith.constant 5.000000e-01 : f32
    %98 = vector.broadcast %cst_44 : f32 to vector<8x128xf32>
    %99 = arith.mulf %98, %97 : vector<8x128xf32>
    %cst_45 = arith.constant 5.000000e-01 : f32
    %100 = vector.broadcast %cst_45 : f32 to vector<8x128xf32>
    %101 = arith.addf %99, %100 : vector<8x128xf32>
    %102 = arith.mulf %91, %43 : vector<8x128xf32>
    %103 = arith.mulf %90, %93 : vector<8x128xf32>
    %104 = arith.addf %102, %103 : vector<8x128xf32>
    %105 = math.tanh %104 : vector<8x128xf32>
    %106 = arith.mulf %101, %105 : vector<8x128xf32>
    %c2_i32 = arith.constant 2 : i32
    %c0_46 = arith.constant 0 : index
    %c0_47 = arith.constant 0 : index
    %107 = vector.load %arg2[%c0_46, %c0_47] : memref<128x512xf32, #tpu.memory_space<vmem>>, vector<128x512xf32>
    %cst_48 = arith.constant dense<0.000000e+00> : vector<8x512xf32>
    %108 = tpu.matmul %106, %107, %cst_48 {dimension_numbers = #tpu.dot_dimension_numbers<[1], [0], [0], [1], [0, 0, 1, 1], [], []>} : vector<8x128xf32>, vector<128x512xf32>, vector<8x512xf32> -> vector<8x512xf32>
    %c0_49 = arith.constant 0 : index
    %109 = arith.index_cast %c2_i32 : i32 to index
    %110 = memref.load %arg0[%c0_49, %109] : memref<8x8xi32, #tpu.memory_space<smem>>
    %111 = arith.index_cast %110 : i32 to index
    %c0_50 = arith.constant 0 : index
    %112 = vector.load %arg1[%111, %c0_50] : memref<1000x512xf32, #tpu.memory_space<vmem>>, vector<1x512xf32>
    %c1_51 = arith.constant 1 : index
    %113 = arith.index_cast %c2_i32 : i32 to index
    %114 = memref.load %arg0[%c1_51, %113] : memref<8x8xi32, #tpu.memory_space<smem>>
    %115 = arith.index_cast %114 : i32 to index
    %c0_52 = arith.constant 0 : index
    %116 = vector.load %arg1[%115, %c0_52] : memref<1000x512xf32, #tpu.memory_space<vmem>>, vector<1x512xf32>
    %c2_53 = arith.constant 2 : index
    %117 = arith.index_cast %c2_i32 : i32 to index
    %118 = memref.load %arg0[%c2_53, %117] : memref<8x8xi32, #tpu.memory_space<smem>>
    %119 = arith.index_cast %118 : i32 to index
    %c0_54 = arith.constant 0 : index
    %120 = vector.load %arg1[%119, %c0_54] : memref<1000x512xf32, #tpu.memory_space<vmem>>, vector<1x512xf32>
    %c3_55 = arith.constant 3 : index
    %121 = arith.index_cast %c2_i32 : i32 to index
    %122 = memref.load %arg0[%c3_55, %121] : memref<8x8xi32, #tpu.memory_space<smem>>
    %123 = arith.index_cast %122 : i32 to index
    %c0_56 = arith.constant 0 : index
    %124 = vector.load %arg1[%123, %c0_56] : memref<1000x512xf32, #tpu.memory_space<vmem>>, vector<1x512xf32>
    %c4_57 = arith.constant 4 : index
    %125 = arith.index_cast %c2_i32 : i32 to index
    %126 = memref.load %arg0[%c4_57, %125] : memref<8x8xi32, #tpu.memory_space<smem>>
    %127 = arith.index_cast %126 : i32 to index
    %c0_58 = arith.constant 0 : index
    %128 = vector.load %arg1[%127, %c0_58] : memref<1000x512xf32, #tpu.memory_space<vmem>>, vector<1x512xf32>
    %c5_59 = arith.constant 5 : index
    %129 = arith.index_cast %c2_i32 : i32 to index
    %130 = memref.load %arg0[%c5_59, %129] : memref<8x8xi32, #tpu.memory_space<smem>>
    %131 = arith.index_cast %130 : i32 to index
    %c0_60 = arith.constant 0 : index
    %132 = vector.load %arg1[%131, %c0_60] : memref<1000x512xf32, #tpu.memory_space<vmem>>, vector<1x512xf32>
    %c6_61 = arith.constant 6 : index
    %133 = arith.index_cast %c2_i32 : i32 to index
    %134 = memref.load %arg0[%c6_61, %133] : memref<8x8xi32, #tpu.memory_space<smem>>
    %135 = arith.index_cast %134 : i32 to index
    %c0_62 = arith.constant 0 : index
    %136 = vector.load %arg1[%135, %c0_62] : memref<1000x512xf32, #tpu.memory_space<vmem>>, vector<1x512xf32>
    %c7_63 = arith.constant 7 : index
    %137 = arith.index_cast %c2_i32 : i32 to index
    %138 = memref.load %arg0[%c7_63, %137] : memref<8x8xi32, #tpu.memory_space<smem>>
    %139 = arith.index_cast %138 : i32 to index
    %c0_64 = arith.constant 0 : index
    %140 = vector.load %arg1[%139, %c0_64] : memref<1000x512xf32, #tpu.memory_space<vmem>>, vector<1x512xf32>
    %141 = tpu.concatenate %112, %116, %120, %124, %128, %132, %136, %140 in 0 : vector<1x512xf32>, vector<1x512xf32>, vector<1x512xf32>, vector<1x512xf32>, vector<1x512xf32>, vector<1x512xf32>, vector<1x512xf32>, vector<1x512xf32> -> vector<8x512xf32>
    %142 = arith.addf %108, %141 : vector<8x512xf32>
    %143 = vector.extract_strided_slice %142 {offsets = [0, 0], sizes = [8, 256], strides = [1, 1]} : vector<8x512xf32> to vector<8x256xf32>
    %cst_65 = arith.constant 5.000000e-01 : f32
    %144 = vector.broadcast %cst_65 : f32 to vector<8x256xf32>
    %145 = arith.mulf %144, %143 : vector<8x256xf32>
    %146 = math.tanh %145 : vector<8x256xf32>
    %cst_66 = arith.constant 5.000000e-01 : f32
    %147 = vector.broadcast %cst_66 : f32 to vector<8x256xf32>
    %148 = arith.mulf %147, %146 : vector<8x256xf32>
    %cst_67 = arith.constant 5.000000e-01 : f32
    %149 = vector.broadcast %cst_67 : f32 to vector<8x256xf32>
    %150 = arith.addf %148, %149 : vector<8x256xf32>
    %151 = vector.extract_strided_slice %150 {offsets = [0, 0], sizes = [8, 128], strides = [1, 1]} : vector<8x256xf32> to vector<8x128xf32>
    %152 = vector.extract_strided_slice %150 {offsets = [0, 128], sizes = [8, 128], strides = [1, 1]} : vector<8x256xf32> to vector<8x128xf32>
    %153 = vector.extract_strided_slice %142 {offsets = [0, 256], sizes = [8, 128], strides = [1, 1]} : vector<8x512xf32> to vector<8x128xf32>
    %154 = math.tanh %153 : vector<8x128xf32>
    %155 = vector.extract_strided_slice %142 {offsets = [0, 384], sizes = [8, 128], strides = [1, 1]} : vector<8x512xf32> to vector<8x128xf32>
    %cst_68 = arith.constant 5.000000e-01 : f32
    %156 = vector.broadcast %cst_68 : f32 to vector<8x128xf32>
    %157 = arith.mulf %156, %155 : vector<8x128xf32>
    %158 = math.tanh %157 : vector<8x128xf32>
    %cst_69 = arith.constant 5.000000e-01 : f32
    %159 = vector.broadcast %cst_69 : f32 to vector<8x128xf32>
    %160 = arith.mulf %159, %158 : vector<8x128xf32>
    %cst_70 = arith.constant 5.000000e-01 : f32
    %161 = vector.broadcast %cst_70 : f32 to vector<8x128xf32>
    %162 = arith.addf %160, %161 : vector<8x128xf32>
    %163 = arith.mulf %152, %104 : vector<8x128xf32>
    %164 = arith.mulf %151, %154 : vector<8x128xf32>
    %165 = arith.addf %163, %164 : vector<8x128xf32>
    %166 = math.tanh %165 : vector<8x128xf32>
    %167 = arith.mulf %162, %166 : vector<8x128xf32>
    %c3_i32 = arith.constant 3 : i32
    %c0_71 = arith.constant 0 : index
    %c0_72 = arith.constant 0 : index
    %168 = vector.load %arg2[%c0_71, %c0_72] : memref<128x512xf32, #tpu.memory_space<vmem>>, vector<128x512xf32>
    %cst_73 = arith.constant dense<0.000000e+00> : vector<8x512xf32>
    %169 = tpu.matmul %167, %168, %cst_73 {dimension_numbers = #tpu.dot_dimension_numbers<[1], [0], [0], [1], [0, 0, 1, 1], [], []>} : vector<8x128xf32>, vector<128x512xf32>, vector<8x512xf32> -> vector<8x512xf32>
    %c0_74 = arith.constant 0 : index
    %170 = arith.index_cast %c3_i32 : i32 to index
    %171 = memref.load %arg0[%c0_74, %170] : memref<8x8xi32, #tpu.memory_space<smem>>
    %172 = arith.index_cast %171 : i32 to index
    %c0_75 = arith.constant 0 : index
    %173 = vector.load %arg1[%172, %c0_75] : memref<1000x512xf32, #tpu.memory_space<vmem>>, vector<1x512xf32>
    %c1_76 = arith.constant 1 : index
    %174 = arith.index_cast %c3_i32 : i32 to index
    %175 = memref.load %arg0[%c1_76, %174] : memref<8x8xi32, #tpu.memory_space<smem>>
    %176 = arith.index_cast %175 : i32 to index
    %c0_77 = arith.constant 0 : index
    %177 = vector.load %arg1[%176, %c0_77] : memref<1000x512xf32, #tpu.memory_space<vmem>>, vector<1x512xf32>
    %c2_78 = arith.constant 2 : index
    %178 = arith.index_cast %c3_i32 : i32 to index
    %179 = memref.load %arg0[%c2_78, %178] : memref<8x8xi32, #tpu.memory_space<smem>>
    %180 = arith.index_cast %179 : i32 to index
    %c0_79 = arith.constant 0 : index
    %181 = vector.load %arg1[%180, %c0_79] : memref<1000x512xf32, #tpu.memory_space<vmem>>, vector<1x512xf32>
    %c3_80 = arith.constant 3 : index
    %182 = arith.index_cast %c3_i32 : i32 to index
    %183 = memref.load %arg0[%c3_80, %182] : memref<8x8xi32, #tpu.memory_space<smem>>
    %184 = arith.index_cast %183 : i32 to index
    %c0_81 = arith.constant 0 : index
    %185 = vector.load %arg1[%184, %c0_81] : memref<1000x512xf32, #tpu.memory_space<vmem>>, vector<1x512xf32>
    %c4_82 = arith.constant 4 : index
    %186 = arith.index_cast %c3_i32 : i32 to index
    %187 = memref.load %arg0[%c4_82, %186] : memref<8x8xi32, #tpu.memory_space<smem>>
    %188 = arith.index_cast %187 : i32 to index
    %c0_83 = arith.constant 0 : index
    %189 = vector.load %arg1[%188, %c0_83] : memref<1000x512xf32, #tpu.memory_space<vmem>>, vector<1x512xf32>
    %c5_84 = arith.constant 5 : index
    %190 = arith.index_cast %c3_i32 : i32 to index
    %191 = memref.load %arg0[%c5_84, %190] : memref<8x8xi32, #tpu.memory_space<smem>>
    %192 = arith.index_cast %191 : i32 to index
    %c0_85 = arith.constant 0 : index
    %193 = vector.load %arg1[%192, %c0_85] : memref<1000x512xf32, #tpu.memory_space<vmem>>, vector<1x512xf32>
    %c6_86 = arith.constant 6 : index
    %194 = arith.index_cast %c3_i32 : i32 to index
    %195 = memref.load %arg0[%c6_86, %194] : memref<8x8xi32, #tpu.memory_space<smem>>
    %196 = arith.index_cast %195 : i32 to index
    %c0_87 = arith.constant 0 : index
    %197 = vector.load %arg1[%196, %c0_87] : memref<1000x512xf32, #tpu.memory_space<vmem>>, vector<1x512xf32>
    %c7_88 = arith.constant 7 : index
    %198 = arith.index_cast %c3_i32 : i32 to index
    %199 = memref.load %arg0[%c7_88, %198] : memref<8x8xi32, #tpu.memory_space<smem>>
    %200 = arith.index_cast %199 : i32 to index
    %c0_89 = arith.constant 0 : index
    %201 = vector.load %arg1[%200, %c0_89] : memref<1000x512xf32, #tpu.memory_space<vmem>>, vector<1x512xf32>
    %202 = tpu.concatenate %173, %177, %181, %185, %189, %193, %197, %201 in 0 : vector<1x512xf32>, vector<1x512xf32>, vector<1x512xf32>, vector<1x512xf32>, vector<1x512xf32>, vector<1x512xf32>, vector<1x512xf32>, vector<1x512xf32> -> vector<8x512xf32>
    %203 = arith.addf %169, %202 : vector<8x512xf32>
    %204 = vector.extract_strided_slice %203 {offsets = [0, 0], sizes = [8, 256], strides = [1, 1]} : vector<8x512xf32> to vector<8x256xf32>
    %cst_90 = arith.constant 5.000000e-01 : f32
    %205 = vector.broadcast %cst_90 : f32 to vector<8x256xf32>
    %206 = arith.mulf %205, %204 : vector<8x256xf32>
    %207 = math.tanh %206 : vector<8x256xf32>
    %cst_91 = arith.constant 5.000000e-01 : f32
    %208 = vector.broadcast %cst_91 : f32 to vector<8x256xf32>
    %209 = arith.mulf %208, %207 : vector<8x256xf32>
    %cst_92 = arith.constant 5.000000e-01 : f32
    %210 = vector.broadcast %cst_92 : f32 to vector<8x256xf32>
    %211 = arith.addf %209, %210 : vector<8x256xf32>
    %212 = vector.extract_strided_slice %211 {offsets = [0, 0], sizes = [8, 128], strides = [1, 1]} : vector<8x256xf32> to vector<8x128xf32>
    %213 = vector.extract_strided_slice %211 {offsets = [0, 128], sizes = [8, 128], strides = [1, 1]} : vector<8x256xf32> to vector<8x128xf32>
    %214 = vector.extract_strided_slice %203 {offsets = [0, 256], sizes = [8, 128], strides = [1, 1]} : vector<8x512xf32> to vector<8x128xf32>
    %215 = math.tanh %214 : vector<8x128xf32>
    %216 = vector.extract_strided_slice %203 {offsets = [0, 384], sizes = [8, 128], strides = [1, 1]} : vector<8x512xf32> to vector<8x128xf32>
    %cst_93 = arith.constant 5.000000e-01 : f32
    %217 = vector.broadcast %cst_93 : f32 to vector<8x128xf32>
    %218 = arith.mulf %217, %216 : vector<8x128xf32>
    %219 = math.tanh %218 : vector<8x128xf32>
    %cst_94 = arith.constant 5.000000e-01 : f32
    %220 = vector.broadcast %cst_94 : f32 to vector<8x128xf32>
    %221 = arith.mulf %220, %219 : vector<8x128xf32>
    %cst_95 = arith.constant 5.000000e-01 : f32
    %222 = vector.broadcast %cst_95 : f32 to vector<8x128xf32>
    %223 = arith.addf %221, %222 : vector<8x128xf32>
    %224 = arith.mulf %213, %165 : vector<8x128xf32>
    %225 = arith.mulf %212, %215 : vector<8x128xf32>
    %226 = arith.addf %224, %225 : vector<8x128xf32>
    %227 = math.tanh %226 : vector<8x128xf32>
    %228 = arith.mulf %223, %227 : vector<8x128xf32>
    %c4_i32 = arith.constant 4 : i32
    %c0_96 = arith.constant 0 : index
    %c0_97 = arith.constant 0 : index
    %229 = vector.load %arg2[%c0_96, %c0_97] : memref<128x512xf32, #tpu.memory_space<vmem>>, vector<128x512xf32>
    %cst_98 = arith.constant dense<0.000000e+00> : vector<8x512xf32>
    %230 = tpu.matmul %228, %229, %cst_98 {dimension_numbers = #tpu.dot_dimension_numbers<[1], [0], [0], [1], [0, 0, 1, 1], [], []>} : vector<8x128xf32>, vector<128x512xf32>, vector<8x512xf32> -> vector<8x512xf32>
    %c0_99 = arith.constant 0 : index
    %231 = arith.index_cast %c4_i32 : i32 to index
    %232 = memref.load %arg0[%c0_99, %231] : memref<8x8xi32, #tpu.memory_space<smem>>
    %233 = arith.index_cast %232 : i32 to index
    %c0_100 = arith.constant 0 : index
    %234 = vector.load %arg1[%233, %c0_100] : memref<1000x512xf32, #tpu.memory_space<vmem>>, vector<1x512xf32>
    %c1_101 = arith.constant 1 : index
    %235 = arith.index_cast %c4_i32 : i32 to index
    %236 = memref.load %arg0[%c1_101, %235] : memref<8x8xi32, #tpu.memory_space<smem>>
    %237 = arith.index_cast %236 : i32 to index
    %c0_102 = arith.constant 0 : index
    %238 = vector.load %arg1[%237, %c0_102] : memref<1000x512xf32, #tpu.memory_space<vmem>>, vector<1x512xf32>
    %c2_103 = arith.constant 2 : index
    %239 = arith.index_cast %c4_i32 : i32 to index
    %240 = memref.load %arg0[%c2_103, %239] : memref<8x8xi32, #tpu.memory_space<smem>>
    %241 = arith.index_cast %240 : i32 to index
    %c0_104 = arith.constant 0 : index
    %242 = vector.load %arg1[%241, %c0_104] : memref<1000x512xf32, #tpu.memory_space<vmem>>, vector<1x512xf32>
    %c3_105 = arith.constant 3 : index
    %243 = arith.index_cast %c4_i32 : i32 to index
    %244 = memref.load %arg0[%c3_105, %243] : memref<8x8xi32, #tpu.memory_space<smem>>
    %245 = arith.index_cast %244 : i32 to index
    %c0_106 = arith.constant 0 : index
    %246 = vector.load %arg1[%245, %c0_106] : memref<1000x512xf32, #tpu.memory_space<vmem>>, vector<1x512xf32>
    %c4_107 = arith.constant 4 : index
    %247 = arith.index_cast %c4_i32 : i32 to index
    %248 = memref.load %arg0[%c4_107, %247] : memref<8x8xi32, #tpu.memory_space<smem>>
    %249 = arith.index_cast %248 : i32 to index
    %c0_108 = arith.constant 0 : index
    %250 = vector.load %arg1[%249, %c0_108] : memref<1000x512xf32, #tpu.memory_space<vmem>>, vector<1x512xf32>
    %c5_109 = arith.constant 5 : index
    %251 = arith.index_cast %c4_i32 : i32 to index
    %252 = memref.load %arg0[%c5_109, %251] : memref<8x8xi32, #tpu.memory_space<smem>>
    %253 = arith.index_cast %252 : i32 to index
    %c0_110 = arith.constant 0 : index
    %254 = vector.load %arg1[%253, %c0_110] : memref<1000x512xf32, #tpu.memory_space<vmem>>, vector<1x512xf32>
    %c6_111 = arith.constant 6 : index
    %255 = arith.index_cast %c4_i32 : i32 to index
    %256 = memref.load %arg0[%c6_111, %255] : memref<8x8xi32, #tpu.memory_space<smem>>
    %257 = arith.index_cast %256 : i32 to index
    %c0_112 = arith.constant 0 : index
    %258 = vector.load %arg1[%257, %c0_112] : memref<1000x512xf32, #tpu.memory_space<vmem>>, vector<1x512xf32>
    %c7_113 = arith.constant 7 : index
    %259 = arith.index_cast %c4_i32 : i32 to index
    %260 = memref.load %arg0[%c7_113, %259] : memref<8x8xi32, #tpu.memory_space<smem>>
    %261 = arith.index_cast %260 : i32 to index
    %c0_114 = arith.constant 0 : index
    %262 = vector.load %arg1[%261, %c0_114] : memref<1000x512xf32, #tpu.memory_space<vmem>>, vector<1x512xf32>
    %263 = tpu.concatenate %234, %238, %242, %246, %250, %254, %258, %262 in 0 : vector<1x512xf32>, vector<1x512xf32>, vector<1x512xf32>, vector<1x512xf32>, vector<1x512xf32>, vector<1x512xf32>, vector<1x512xf32>, vector<1x512xf32> -> vector<8x512xf32>
    %264 = arith.addf %230, %263 : vector<8x512xf32>
    %265 = vector.extract_strided_slice %264 {offsets = [0, 0], sizes = [8, 256], strides = [1, 1]} : vector<8x512xf32> to vector<8x256xf32>
    %cst_115 = arith.constant 5.000000e-01 : f32
    %266 = vector.broadcast %cst_115 : f32 to vector<8x256xf32>
    %267 = arith.mulf %266, %265 : vector<8x256xf32>
    %268 = math.tanh %267 : vector<8x256xf32>
    %cst_116 = arith.constant 5.000000e-01 : f32
    %269 = vector.broadcast %cst_116 : f32 to vector<8x256xf32>
    %270 = arith.mulf %269, %268 : vector<8x256xf32>
    %cst_117 = arith.constant 5.000000e-01 : f32
    %271 = vector.broadcast %cst_117 : f32 to vector<8x256xf32>
    %272 = arith.addf %270, %271 : vector<8x256xf32>
    %273 = vector.extract_strided_slice %272 {offsets = [0, 0], sizes = [8, 128], strides = [1, 1]} : vector<8x256xf32> to vector<8x128xf32>
    %274 = vector.extract_strided_slice %272 {offsets = [0, 128], sizes = [8, 128], strides = [1, 1]} : vector<8x256xf32> to vector<8x128xf32>
    %275 = vector.extract_strided_slice %264 {offsets = [0, 256], sizes = [8, 128], strides = [1, 1]} : vector<8x512xf32> to vector<8x128xf32>
    %276 = math.tanh %275 : vector<8x128xf32>
    %277 = vector.extract_strided_slice %264 {offsets = [0, 384], sizes = [8, 128], strides = [1, 1]} : vector<8x512xf32> to vector<8x128xf32>
    %cst_118 = arith.constant 5.000000e-01 : f32
    %278 = vector.broadcast %cst_118 : f32 to vector<8x128xf32>
    %279 = arith.mulf %278, %277 : vector<8x128xf32>
    %280 = math.tanh %279 : vector<8x128xf32>
    %cst_119 = arith.constant 5.000000e-01 : f32
    %281 = vector.broadcast %cst_119 : f32 to vector<8x128xf32>
    %282 = arith.mulf %281, %280 : vector<8x128xf32>
    %cst_120 = arith.constant 5.000000e-01 : f32
    %283 = vector.broadcast %cst_120 : f32 to vector<8x128xf32>
    %284 = arith.addf %282, %283 : vector<8x128xf32>
    %285 = arith.mulf %274, %226 : vector<8x128xf32>
    %286 = arith.mulf %273, %276 : vector<8x128xf32>
    %287 = arith.addf %285, %286 : vector<8x128xf32>
    %288 = math.tanh %287 : vector<8x128xf32>
    %289 = arith.mulf %284, %288 : vector<8x128xf32>
    %c5_i32 = arith.constant 5 : i32
    %c0_121 = arith.constant 0 : index
    %c0_122 = arith.constant 0 : index
    %290 = vector.load %arg2[%c0_121, %c0_122] : memref<128x512xf32, #tpu.memory_space<vmem>>, vector<128x512xf32>
    %cst_123 = arith.constant dense<0.000000e+00> : vector<8x512xf32>
    %291 = tpu.matmul %289, %290, %cst_123 {dimension_numbers = #tpu.dot_dimension_numbers<[1], [0], [0], [1], [0, 0, 1, 1], [], []>} : vector<8x128xf32>, vector<128x512xf32>, vector<8x512xf32> -> vector<8x512xf32>
    %c0_124 = arith.constant 0 : index
    %292 = arith.index_cast %c5_i32 : i32 to index
    %293 = memref.load %arg0[%c0_124, %292] : memref<8x8xi32, #tpu.memory_space<smem>>
    %294 = arith.index_cast %293 : i32 to index
    %c0_125 = arith.constant 0 : index
    %295 = vector.load %arg1[%294, %c0_125] : memref<1000x512xf32, #tpu.memory_space<vmem>>, vector<1x512xf32>
    %c1_126 = arith.constant 1 : index
    %296 = arith.index_cast %c5_i32 : i32 to index
    %297 = memref.load %arg0[%c1_126, %296] : memref<8x8xi32, #tpu.memory_space<smem>>
    %298 = arith.index_cast %297 : i32 to index
    %c0_127 = arith.constant 0 : index
    %299 = vector.load %arg1[%298, %c0_127] : memref<1000x512xf32, #tpu.memory_space<vmem>>, vector<1x512xf32>
    %c2_128 = arith.constant 2 : index
    %300 = arith.index_cast %c5_i32 : i32 to index
    %301 = memref.load %arg0[%c2_128, %300] : memref<8x8xi32, #tpu.memory_space<smem>>
    %302 = arith.index_cast %301 : i32 to index
    %c0_129 = arith.constant 0 : index
    %303 = vector.load %arg1[%302, %c0_129] : memref<1000x512xf32, #tpu.memory_space<vmem>>, vector<1x512xf32>
    %c3_130 = arith.constant 3 : index
    %304 = arith.index_cast %c5_i32 : i32 to index
    %305 = memref.load %arg0[%c3_130, %304] : memref<8x8xi32, #tpu.memory_space<smem>>
    %306 = arith.index_cast %305 : i32 to index
    %c0_131 = arith.constant 0 : index
    %307 = vector.load %arg1[%306, %c0_131] : memref<1000x512xf32, #tpu.memory_space<vmem>>, vector<1x512xf32>
    %c4_132 = arith.constant 4 : index
    %308 = arith.index_cast %c5_i32 : i32 to index
    %309 = memref.load %arg0[%c4_132, %308] : memref<8x8xi32, #tpu.memory_space<smem>>
    %310 = arith.index_cast %309 : i32 to index
    %c0_133 = arith.constant 0 : index
    %311 = vector.load %arg1[%310, %c0_133] : memref<1000x512xf32, #tpu.memory_space<vmem>>, vector<1x512xf32>
    %c5_134 = arith.constant 5 : index
    %312 = arith.index_cast %c5_i32 : i32 to index
    %313 = memref.load %arg0[%c5_134, %312] : memref<8x8xi32, #tpu.memory_space<smem>>
    %314 = arith.index_cast %313 : i32 to index
    %c0_135 = arith.constant 0 : index
    %315 = vector.load %arg1[%314, %c0_135] : memref<1000x512xf32, #tpu.memory_space<vmem>>, vector<1x512xf32>
    %c6_136 = arith.constant 6 : index
    %316 = arith.index_cast %c5_i32 : i32 to index
    %317 = memref.load %arg0[%c6_136, %316] : memref<8x8xi32, #tpu.memory_space<smem>>
    %318 = arith.index_cast %317 : i32 to index
    %c0_137 = arith.constant 0 : index
    %319 = vector.load %arg1[%318, %c0_137] : memref<1000x512xf32, #tpu.memory_space<vmem>>, vector<1x512xf32>
    %c7_138 = arith.constant 7 : index
    %320 = arith.index_cast %c5_i32 : i32 to index
    %321 = memref.load %arg0[%c7_138, %320] : memref<8x8xi32, #tpu.memory_space<smem>>
    %322 = arith.index_cast %321 : i32 to index
    %c0_139 = arith.constant 0 : index
    %323 = vector.load %arg1[%322, %c0_139] : memref<1000x512xf32, #tpu.memory_space<vmem>>, vector<1x512xf32>
    %324 = tpu.concatenate %295, %299, %303, %307, %311, %315, %319, %323 in 0 : vector<1x512xf32>, vector<1x512xf32>, vector<1x512xf32>, vector<1x512xf32>, vector<1x512xf32>, vector<1x512xf32>, vector<1x512xf32>, vector<1x512xf32> -> vector<8x512xf32>
    %325 = arith.addf %291, %324 : vector<8x512xf32>
    %326 = vector.extract_strided_slice %325 {offsets = [0, 0], sizes = [8, 256], strides = [1, 1]} : vector<8x512xf32> to vector<8x256xf32>
    %cst_140 = arith.constant 5.000000e-01 : f32
    %327 = vector.broadcast %cst_140 : f32 to vector<8x256xf32>
    %328 = arith.mulf %327, %326 : vector<8x256xf32>
    %329 = math.tanh %328 : vector<8x256xf32>
    %cst_141 = arith.constant 5.000000e-01 : f32
    %330 = vector.broadcast %cst_141 : f32 to vector<8x256xf32>
    %331 = arith.mulf %330, %329 : vector<8x256xf32>
    %cst_142 = arith.constant 5.000000e-01 : f32
    %332 = vector.broadcast %cst_142 : f32 to vector<8x256xf32>
    %333 = arith.addf %331, %332 : vector<8x256xf32>
    %334 = vector.extract_strided_slice %333 {offsets = [0, 0], sizes = [8, 128], strides = [1, 1]} : vector<8x256xf32> to vector<8x128xf32>
    %335 = vector.extract_strided_slice %333 {offsets = [0, 128], sizes = [8, 128], strides = [1, 1]} : vector<8x256xf32> to vector<8x128xf32>
    %336 = vector.extract_strided_slice %325 {offsets = [0, 256], sizes = [8, 128], strides = [1, 1]} : vector<8x512xf32> to vector<8x128xf32>
    %337 = math.tanh %336 : vector<8x128xf32>
    %338 = vector.extract_strided_slice %325 {offsets = [0, 384], sizes = [8, 128], strides = [1, 1]} : vector<8x512xf32> to vector<8x128xf32>
    %cst_143 = arith.constant 5.000000e-01 : f32
    %339 = vector.broadcast %cst_143 : f32 to vector<8x128xf32>
    %340 = arith.mulf %339, %338 : vector<8x128xf32>
    %341 = math.tanh %340 : vector<8x128xf32>
    %cst_144 = arith.constant 5.000000e-01 : f32
    %342 = vector.broadcast %cst_144 : f32 to vector<8x128xf32>
    %343 = arith.mulf %342, %341 : vector<8x128xf32>
    %cst_145 = arith.constant 5.000000e-01 : f32
    %344 = vector.broadcast %cst_145 : f32 to vector<8x128xf32>
    %345 = arith.addf %343, %344 : vector<8x128xf32>
    %346 = arith.mulf %335, %287 : vector<8x128xf32>
    %347 = arith.mulf %334, %337 : vector<8x128xf32>
    %348 = arith.addf %346, %347 : vector<8x128xf32>
    %349 = math.tanh %348 : vector<8x128xf32>
    %350 = arith.mulf %345, %349 : vector<8x128xf32>
    %c6_i32 = arith.constant 6 : i32
    %c0_146 = arith.constant 0 : index
    %c0_147 = arith.constant 0 : index
    %351 = vector.load %arg2[%c0_146, %c0_147] : memref<128x512xf32, #tpu.memory_space<vmem>>, vector<128x512xf32>
    %cst_148 = arith.constant dense<0.000000e+00> : vector<8x512xf32>
    %352 = tpu.matmul %350, %351, %cst_148 {dimension_numbers = #tpu.dot_dimension_numbers<[1], [0], [0], [1], [0, 0, 1, 1], [], []>} : vector<8x128xf32>, vector<128x512xf32>, vector<8x512xf32> -> vector<8x512xf32>
    %c0_149 = arith.constant 0 : index
    %353 = arith.index_cast %c6_i32 : i32 to index
    %354 = memref.load %arg0[%c0_149, %353] : memref<8x8xi32, #tpu.memory_space<smem>>
    %355 = arith.index_cast %354 : i32 to index
    %c0_150 = arith.constant 0 : index
    %356 = vector.load %arg1[%355, %c0_150] : memref<1000x512xf32, #tpu.memory_space<vmem>>, vector<1x512xf32>
    %c1_151 = arith.constant 1 : index
    %357 = arith.index_cast %c6_i32 : i32 to index
    %358 = memref.load %arg0[%c1_151, %357] : memref<8x8xi32, #tpu.memory_space<smem>>
    %359 = arith.index_cast %358 : i32 to index
    %c0_152 = arith.constant 0 : index
    %360 = vector.load %arg1[%359, %c0_152] : memref<1000x512xf32, #tpu.memory_space<vmem>>, vector<1x512xf32>
    %c2_153 = arith.constant 2 : index
    %361 = arith.index_cast %c6_i32 : i32 to index
    %362 = memref.load %arg0[%c2_153, %361] : memref<8x8xi32, #tpu.memory_space<smem>>
    %363 = arith.index_cast %362 : i32 to index
    %c0_154 = arith.constant 0 : index
    %364 = vector.load %arg1[%363, %c0_154] : memref<1000x512xf32, #tpu.memory_space<vmem>>, vector<1x512xf32>
    %c3_155 = arith.constant 3 : index
    %365 = arith.index_cast %c6_i32 : i32 to index
    %366 = memref.load %arg0[%c3_155, %365] : memref<8x8xi32, #tpu.memory_space<smem>>
    %367 = arith.index_cast %366 : i32 to index
    %c0_156 = arith.constant 0 : index
    %368 = vector.load %arg1[%367, %c0_156] : memref<1000x512xf32, #tpu.memory_space<vmem>>, vector<1x512xf32>
    %c4_157 = arith.constant 4 : index
    %369 = arith.index_cast %c6_i32 : i32 to index
    %370 = memref.load %arg0[%c4_157, %369] : memref<8x8xi32, #tpu.memory_space<smem>>
    %371 = arith.index_cast %370 : i32 to index
    %c0_158 = arith.constant 0 : index
    %372 = vector.load %arg1[%371, %c0_158] : memref<1000x512xf32, #tpu.memory_space<vmem>>, vector<1x512xf32>
    %c5_159 = arith.constant 5 : index
    %373 = arith.index_cast %c6_i32 : i32 to index
    %374 = memref.load %arg0[%c5_159, %373] : memref<8x8xi32, #tpu.memory_space<smem>>
    %375 = arith.index_cast %374 : i32 to index
    %c0_160 = arith.constant 0 : index
    %376 = vector.load %arg1[%375, %c0_160] : memref<1000x512xf32, #tpu.memory_space<vmem>>, vector<1x512xf32>
    %c6_161 = arith.constant 6 : index
    %377 = arith.index_cast %c6_i32 : i32 to index
    %378 = memref.load %arg0[%c6_161, %377] : memref<8x8xi32, #tpu.memory_space<smem>>
    %379 = arith.index_cast %378 : i32 to index
    %c0_162 = arith.constant 0 : index
    %380 = vector.load %arg1[%379, %c0_162] : memref<1000x512xf32, #tpu.memory_space<vmem>>, vector<1x512xf32>
    %c7_163 = arith.constant 7 : index
    %381 = arith.index_cast %c6_i32 : i32 to index
    %382 = memref.load %arg0[%c7_163, %381] : memref<8x8xi32, #tpu.memory_space<smem>>
    %383 = arith.index_cast %382 : i32 to index
    %c0_164 = arith.constant 0 : index
    %384 = vector.load %arg1[%383, %c0_164] : memref<1000x512xf32, #tpu.memory_space<vmem>>, vector<1x512xf32>
    %385 = tpu.concatenate %356, %360, %364, %368, %372, %376, %380, %384 in 0 : vector<1x512xf32>, vector<1x512xf32>, vector<1x512xf32>, vector<1x512xf32>, vector<1x512xf32>, vector<1x512xf32>, vector<1x512xf32>, vector<1x512xf32> -> vector<8x512xf32>
    %386 = arith.addf %352, %385 : vector<8x512xf32>
    %387 = vector.extract_strided_slice %386 {offsets = [0, 0], sizes = [8, 256], strides = [1, 1]} : vector<8x512xf32> to vector<8x256xf32>
    %cst_165 = arith.constant 5.000000e-01 : f32
    %388 = vector.broadcast %cst_165 : f32 to vector<8x256xf32>
    %389 = arith.mulf %388, %387 : vector<8x256xf32>
    %390 = math.tanh %389 : vector<8x256xf32>
    %cst_166 = arith.constant 5.000000e-01 : f32
    %391 = vector.broadcast %cst_166 : f32 to vector<8x256xf32>
    %392 = arith.mulf %391, %390 : vector<8x256xf32>
    %cst_167 = arith.constant 5.000000e-01 : f32
    %393 = vector.broadcast %cst_167 : f32 to vector<8x256xf32>
    %394 = arith.addf %392, %393 : vector<8x256xf32>
    %395 = vector.extract_strided_slice %394 {offsets = [0, 0], sizes = [8, 128], strides = [1, 1]} : vector<8x256xf32> to vector<8x128xf32>
    %396 = vector.extract_strided_slice %394 {offsets = [0, 128], sizes = [8, 128], strides = [1, 1]} : vector<8x256xf32> to vector<8x128xf32>
    %397 = vector.extract_strided_slice %386 {offsets = [0, 256], sizes = [8, 128], strides = [1, 1]} : vector<8x512xf32> to vector<8x128xf32>
    %398 = math.tanh %397 : vector<8x128xf32>
    %399 = vector.extract_strided_slice %386 {offsets = [0, 384], sizes = [8, 128], strides = [1, 1]} : vector<8x512xf32> to vector<8x128xf32>
    %cst_168 = arith.constant 5.000000e-01 : f32
    %400 = vector.broadcast %cst_168 : f32 to vector<8x128xf32>
    %401 = arith.mulf %400, %399 : vector<8x128xf32>
    %402 = math.tanh %401 : vector<8x128xf32>
    %cst_169 = arith.constant 5.000000e-01 : f32
    %403 = vector.broadcast %cst_169 : f32 to vector<8x128xf32>
    %404 = arith.mulf %403, %402 : vector<8x128xf32>
    %cst_170 = arith.constant 5.000000e-01 : f32
    %405 = vector.broadcast %cst_170 : f32 to vector<8x128xf32>
    %406 = arith.addf %404, %405 : vector<8x128xf32>
    %407 = arith.mulf %396, %348 : vector<8x128xf32>
    %408 = arith.mulf %395, %398 : vector<8x128xf32>
    %409 = arith.addf %407, %408 : vector<8x128xf32>
    %410 = math.tanh %409 : vector<8x128xf32>
    %411 = arith.mulf %406, %410 : vector<8x128xf32>
    %c7_i32 = arith.constant 7 : i32
    %c0_171 = arith.constant 0 : index
    %c0_172 = arith.constant 0 : index
    %412 = vector.load %arg2[%c0_171, %c0_172] : memref<128x512xf32, #tpu.memory_space<vmem>>, vector<128x512xf32>
    %cst_173 = arith.constant dense<0.000000e+00> : vector<8x512xf32>
    %413 = tpu.matmul %411, %412, %cst_173 {dimension_numbers = #tpu.dot_dimension_numbers<[1], [0], [0], [1], [0, 0, 1, 1], [], []>} : vector<8x128xf32>, vector<128x512xf32>, vector<8x512xf32> -> vector<8x512xf32>
    %c0_174 = arith.constant 0 : index
    %414 = arith.index_cast %c7_i32 : i32 to index
    %415 = memref.load %arg0[%c0_174, %414] : memref<8x8xi32, #tpu.memory_space<smem>>
    %416 = arith.index_cast %415 : i32 to index
    %c0_175 = arith.constant 0 : index
    %417 = vector.load %arg1[%416, %c0_175] : memref<1000x512xf32, #tpu.memory_space<vmem>>, vector<1x512xf32>
    %c1_176 = arith.constant 1 : index
    %418 = arith.index_cast %c7_i32 : i32 to index
    %419 = memref.load %arg0[%c1_176, %418] : memref<8x8xi32, #tpu.memory_space<smem>>
    %420 = arith.index_cast %419 : i32 to index
    %c0_177 = arith.constant 0 : index
    %421 = vector.load %arg1[%420, %c0_177] : memref<1000x512xf32, #tpu.memory_space<vmem>>, vector<1x512xf32>
    %c2_178 = arith.constant 2 : index
    %422 = arith.index_cast %c7_i32 : i32 to index
    %423 = memref.load %arg0[%c2_178, %422] : memref<8x8xi32, #tpu.memory_space<smem>>
    %424 = arith.index_cast %423 : i32 to index
    %c0_179 = arith.constant 0 : index
    %425 = vector.load %arg1[%424, %c0_179] : memref<1000x512xf32, #tpu.memory_space<vmem>>, vector<1x512xf32>
    %c3_180 = arith.constant 3 : index
    %426 = arith.index_cast %c7_i32 : i32 to index
    %427 = memref.load %arg0[%c3_180, %426] : memref<8x8xi32, #tpu.memory_space<smem>>
    %428 = arith.index_cast %427 : i32 to index
    %c0_181 = arith.constant 0 : index
    %429 = vector.load %arg1[%428, %c0_181] : memref<1000x512xf32, #tpu.memory_space<vmem>>, vector<1x512xf32>
    %c4_182 = arith.constant 4 : index
    %430 = arith.index_cast %c7_i32 : i32 to index
    %431 = memref.load %arg0[%c4_182, %430] : memref<8x8xi32, #tpu.memory_space<smem>>
    %432 = arith.index_cast %431 : i32 to index
    %c0_183 = arith.constant 0 : index
    %433 = vector.load %arg1[%432, %c0_183] : memref<1000x512xf32, #tpu.memory_space<vmem>>, vector<1x512xf32>
    %c5_184 = arith.constant 5 : index
    %434 = arith.index_cast %c7_i32 : i32 to index
    %435 = memref.load %arg0[%c5_184, %434] : memref<8x8xi32, #tpu.memory_space<smem>>
    %436 = arith.index_cast %435 : i32 to index
    %c0_185 = arith.constant 0 : index
    %437 = vector.load %arg1[%436, %c0_185] : memref<1000x512xf32, #tpu.memory_space<vmem>>, vector<1x512xf32>
    %c6_186 = arith.constant 6 : index
    %438 = arith.index_cast %c7_i32 : i32 to index
    %439 = memref.load %arg0[%c6_186, %438] : memref<8x8xi32, #tpu.memory_space<smem>>
    %440 = arith.index_cast %439 : i32 to index
    %c0_187 = arith.constant 0 : index
    %441 = vector.load %arg1[%440, %c0_187] : memref<1000x512xf32, #tpu.memory_space<vmem>>, vector<1x512xf32>
    %c7_188 = arith.constant 7 : index
    %442 = arith.index_cast %c7_i32 : i32 to index
    %443 = memref.load %arg0[%c7_188, %442] : memref<8x8xi32, #tpu.memory_space<smem>>
    %444 = arith.index_cast %443 : i32 to index
    %c0_189 = arith.constant 0 : index
    %445 = vector.load %arg1[%444, %c0_189] : memref<1000x512xf32, #tpu.memory_space<vmem>>, vector<1x512xf32>
    %446 = tpu.concatenate %417, %421, %425, %429, %433, %437, %441, %445 in 0 : vector<1x512xf32>, vector<1x512xf32>, vector<1x512xf32>, vector<1x512xf32>, vector<1x512xf32>, vector<1x512xf32>, vector<1x512xf32>, vector<1x512xf32> -> vector<8x512xf32>
    %447 = arith.addf %413, %446 : vector<8x512xf32>
    %448 = vector.extract_strided_slice %447 {offsets = [0, 0], sizes = [8, 256], strides = [1, 1]} : vector<8x512xf32> to vector<8x256xf32>
    %cst_190 = arith.constant 5.000000e-01 : f32
    %449 = vector.broadcast %cst_190 : f32 to vector<8x256xf32>
    %450 = arith.mulf %449, %448 : vector<8x256xf32>
    %451 = math.tanh %450 : vector<8x256xf32>
    %cst_191 = arith.constant 5.000000e-01 : f32
    %452 = vector.broadcast %cst_191 : f32 to vector<8x256xf32>
    %453 = arith.mulf %452, %451 : vector<8x256xf32>
    %cst_192 = arith.constant 5.000000e-01 : f32
    %454 = vector.broadcast %cst_192 : f32 to vector<8x256xf32>
    %455 = arith.addf %453, %454 : vector<8x256xf32>
    %456 = vector.extract_strided_slice %455 {offsets = [0, 0], sizes = [8, 128], strides = [1, 1]} : vector<8x256xf32> to vector<8x128xf32>
    %457 = vector.extract_strided_slice %455 {offsets = [0, 128], sizes = [8, 128], strides = [1, 1]} : vector<8x256xf32> to vector<8x128xf32>
    %458 = vector.extract_strided_slice %447 {offsets = [0, 256], sizes = [8, 128], strides = [1, 1]} : vector<8x512xf32> to vector<8x128xf32>
    %459 = math.tanh %458 : vector<8x128xf32>
    %460 = vector.extract_strided_slice %447 {offsets = [0, 384], sizes = [8, 128], strides = [1, 1]} : vector<8x512xf32> to vector<8x128xf32>
    %cst_193 = arith.constant 5.000000e-01 : f32
    %461 = vector.broadcast %cst_193 : f32 to vector<8x128xf32>
    %462 = arith.mulf %461, %460 : vector<8x128xf32>
    %463 = math.tanh %462 : vector<8x128xf32>
    %cst_194 = arith.constant 5.000000e-01 : f32
    %464 = vector.broadcast %cst_194 : f32 to vector<8x128xf32>
    %465 = arith.mulf %464, %463 : vector<8x128xf32>
    %cst_195 = arith.constant 5.000000e-01 : f32
    %466 = vector.broadcast %cst_195 : f32 to vector<8x128xf32>
    %467 = arith.addf %465, %466 : vector<8x128xf32>
    %468 = arith.mulf %457, %409 : vector<8x128xf32>
    %469 = arith.mulf %456, %459 : vector<8x128xf32>
    %470 = arith.addf %468, %469 : vector<8x128xf32>
    %471 = math.tanh %470 : vector<8x128xf32>
    %472 = arith.mulf %467, %471 : vector<8x128xf32>
    %c7_i32_196 = arith.constant 7 : i32
    %c0_197 = arith.constant 0 : index
    %c0_198 = arith.constant 0 : index
    %473 = vector.load %arg3[%c0_197, %c0_198] : memref<128x128xf32, #tpu.memory_space<vmem>>, vector<128x128xf32>
    %cst_199 = arith.constant dense<0.000000e+00> : vector<8x128xf32>
    %474 = tpu.matmul %472, %473, %cst_199 {dimension_numbers = #tpu.dot_dimension_numbers<[1], [0], [0], [1], [0, 0, 1, 1], [], []>} : vector<8x128xf32>, vector<128x128xf32>, vector<8x128xf32> -> vector<8x128xf32>
    %c0_200 = arith.constant 0 : index
    %c0_201 = arith.constant 0 : index
    %475 = vector.load %arg4[%c0_200, %c0_201] : memref<1x128xf32, #tpu.memory_space<vmem>>, vector<1x128xf32>
    %476 = vector.broadcast %475 : vector<1x128xf32> to vector<8x128xf32>
    %477 = arith.addf %474, %476 : vector<8x128xf32>
    %c0_202 = arith.constant 0 : index
    %c0_203 = arith.constant 0 : index
    %478 = vector.load %arg5[%c0_202, %c0_203] : memref<8x128xf32, #tpu.memory_space<vmem>>, vector<8x128xf32>
    tpu.vector_store %arg5[%c0_202, %c0_203], %477 {strides = array<i32>} : memref<8x128xf32, #tpu.memory_space<vmem>>, vector<8x128xf32>,
    return
  }
}

</mosaic_0001>

<bundles_post_ra>
// kernel: worst_case_ai_forward.1
= control target key start
LH: loop header
LB: loop body
LE: loop exit
PB: predicated region body
PF: predicated region fallthrough
CT: control target
= control target key end

     0   :  { %10 = vsyncpa [#allocation5], 0  ;;  %s5841_s0 = inlined_call_operand.hbm [shape: s32[8,8], index: 0, kind: input, shape index: {}]   ;;  %s5842_s1 = inlined_call_operand.hbm [shape: f32[1000,512], index: 1, kind: input, shape index: {}]   ;;  %s5843_s2 = inlined_call_operand.hbm [shape: f32[128,512], index: 2, kind: input, shape index: {}]   ;;  %s5844_s3 = inlined_call_operand.hbm [shape: f32[128,128], index: 3, kind: input, shape index: {}]   ;;  %s5845_s4 = inlined_call_operand.hbm [shape: f32[1,128], index: 4, kind: input, shape index: {}]   ;;  %s5846_s5 = inlined_call_operand.hbm [shape: f32[8,128], index: 5, kind: output, shape index: {}]  }
   0x1   :  { %11 = vsyncpa [#allocation3], 0 }
   0x2   :  { %12 = vsyncpa [#allocation8], 0 }
   0x3   :  { %13 = vsyncpa [#allocation11], 0 }
   0x4   :  { %14 = vsyncpa [#allocation4], 0  ;;  %s4754_s18 = smov [#allocation7]   ;;  %s4755_s20 = smov [#allocation6]  }
   0x5   :  { %s40_s19 = sshll.u32 %s4754_s18, 4  ;;  %s28_s21 = sshll.u32 %s4755_s20, 4  ;;  %s41_s19 = int_to_ptr.vmem [resolvable:$true] %s40_s19  ;;  %s29_s21 = int_to_ptr.vmem [resolvable:$true] %s28_s21 }
   0x6   :  { %s4624_s24 = scalar_lea.hbm %s5843_s2, 8192 }
   0x7   :  { %p4625_p0 = scmp.ne.s32.totalorder %s5843_s2, %s4624_s24  ;;  %p4628_p1 = scmp.lt.u32.totalorder %s4624_s24, %s5843_s2 }
   0x9   :  { %p4630_p2 = pnand %p4628_p1, %p4625_p0 }
   0xb   :  { %4633 = shalt.err (!%p4630_p2)
}
   0xc   :  { %s4634_s29 = scalar_lea.vmem %s41_s19, 8192  ;;  %p4639_p4 = scmp.lt.s32.totalorder %s41_s19, %s41_s19 }
   0xd   :  { %p4635_p3 = scmp.ne.s32.totalorder %s41_s19, %s4634_s29  ;;  %p4640_p5 = scmp.lt.s32.totalorder %s4634_s29, %s4634_s29 }
   0xf   :  { %p4641_p6 = por %p4640_p5, %p4639_p4 }
  0x11   :  { %p4642_p7 = pnand %p4641_p6, %p4635_p3 }
  0x13   :  { %4645 = shalt.err (!%p4642_p7)
}
  0x14   :  { %s4756_s30 = smov 512   ;;  %s4757_s6 = smov 32  }
  0x15   :  { %46 = dma.hbm_to_vmem [thread:$0]  %s5843_s2, 8192, %s41_s19, [#allocation8], %s4756_s30, %s4756_s30, %s4757_s6  }
  0x16   :  { %s4646_s11 = scalar_lea.hbm %s5841_s0, 128 }
  0x17   :  { %p4647_p8 = scmp.ne.s32.totalorder %s5841_s0, %s4646_s11  ;;  %p4650_p9 = scmp.lt.u32.totalorder %s4646_s11, %s5841_s0 }
  0x19   :  { %p4652_p10 = pnand %p4650_p9, %p4647_p8 }
  0x1b   :  { %4655 = shalt.err (!%p4652_p10)
}
  0x1c   :  { %s4758_s16 = smov [#allocation2]   ;;  %s4656_s20 = scalar_lea.hbm %s5842_s1, 64000 }
  0x1d   :  { %22 = dma.hbm_to_smem %s5841_s0, 128, %s4758_s16, [#allocation5]  }
  0x1e   :  { %p4657_p11 = scmp.ne.s32.totalorder %s5842_s1, %s4656_s20  ;;  %p4660_p12 = scmp.lt.u32.totalorder %s4656_s20, %s5842_s1 }
  0x20   :  { %p4662_p13 = pnand %p4660_p12, %p4657_p11 }
  0x22   :  { %4665 = shalt.err (!%p4662_p13)
}
  0x23   :  { %s4666_s26 = scalar_lea.vmem %s29_s21, 64000  ;;  %p4671_p1 = scmp.lt.s32.totalorder %s29_s21, %s29_s21 }
  0x24   :  { %p4667_p0 = scmp.ne.s32.totalorder %s29_s21, %s4666_s26  ;;  %p4672_p2 = scmp.lt.s32.totalorder %s4666_s26, %s4666_s26 }
  0x26   :  { %p4673_p3 = por %p4672_p2, %p4671_p1 }
  0x28   :  { %p4674_p4 = pnand %p4673_p3, %p4667_p0 }
  0x2a   :  { %4677 = shalt.err (!%p4674_p4)
}
  0x2b   :  { %34 = dma.hbm_to_vmem [thread:$0]  %s5842_s1, 64000, %s29_s21, [#allocation3], %s4756_s30, %s4756_s30, %s4757_s6  }
  0x2c   :  { %s4759_s28 = smov [#allocation9]   ;;  %s4678_s9 = scalar_lea.hbm %s5844_s3, 2048 }
  0x2d   :  { %s52_s29 = sshll.u32 %s4759_s28, 4  ;;  %p4679_p5 = scmp.ne.s32.totalorder %s5844_s3, %s4678_s9  ;;  %s53_s29 = int_to_ptr.vmem [resolvable:$true] %s52_s29 }
  0x2e   :  { %p4682_p6 = scmp.lt.u32.totalorder %s4678_s9, %s5844_s3 }
  0x30   :  { %p4684_p7 = pnand %p4682_p6, %p4679_p5 }
  0x32   :  { %4687 = shalt.err (!%p4684_p7)
}
  0x33   :  { %s4688_s14 = scalar_lea.vmem %s53_s29, 2048  ;;  %p4693_p9 = scmp.lt.s32.totalorder %s53_s29, %s53_s29 }
  0x34   :  { %p4689_p8 = scmp.ne.s32.totalorder %s53_s29, %s4688_s14  ;;  %p4694_p10 = scmp.lt.s32.totalorder %s4688_s14, %s4688_s14 }
  0x36   :  { %p4695_p11 = por %p4694_p10, %p4693_p9 }
  0x38   :  { %p4696_p12 = pnand %p4695_p11, %p4689_p8 }
  0x3a   :  { %4699 = shalt.err (!%p4696_p12)
}
  0x3b   :  { %s4760_s1 = smov 128   ;;  %s4761_s21 = smov 8  }
  0x3c   :  { %58 = dma.hbm_to_vmem [thread:$0]  %s5844_s3, 2048, %s53_s29, [#allocation8], %s4760_s1, %s4760_s1, %s4761_s21  }
  0x3d   :  { %s4762_s15 = smov [#allocation10]   ;;  %s4700_s2 = scalar_lea.hbm %s5845_s4, 16 }
  0x3e   :  { %s65_s16 = sshll.u32 %s4762_s15, 4  ;;  %p4701_p13 = scmp.ne.s32.totalorder %s5845_s4, %s4700_s2  ;;  %s66_s16 = int_to_ptr.vmem [resolvable:$true] %s65_s16 }
  0x3f   :  { %p4704_p0 = scmp.lt.u32.totalorder %s4700_s2, %s5845_s4 }
  0x41   :  { %p4706_p1 = pnand %p4704_p0, %p4701_p13 }
  0x43   :  { %4709 = shalt.err (!%p4706_p1)
}
  0x44   :  { %s4710_s24 = scalar_lea.vmem %s66_s16, 16  ;;  %s4714_s3 = scalar_lea.vmem %s66_s16, 32 }
  0x45   :  { %p4711_p2 = scmp.ne.s32.totalorder %s66_s16, %s4710_s24  ;;  %p4715_p3 = scmp.lt.s32.totalorder %s66_s16, %s66_s16 }
  0x46   :  { %p4716_p4 = scmp.lt.s32.totalorder %s4714_s3, %s4710_s24 }
  0x48   :  { %p4717_p5 = por %p4716_p4, %p4715_p3 }
  0x4a   :  { %p4718_p6 = pnand %p4717_p5, %p4711_p2 }
  0x4c   :  { %4721 = shalt.err (!%p4718_p6)
}
  0x4d   :  { %68 = dma.hbm_to_vmem [thread:$0]  %s5845_s4, 16, %s66_s16, [#allocation11]  }
  0x4e   :  { %4744 = dma.done.wait [#allocation5], 128  }
  0x4f   :  { %4745 = vsyncadd [#allocation5], 4294967168 }
  0x50   :  { %4746 = dma.done.wait [#allocation3], 64000  }
  0x51   :  { %4747 = vsyncadd [#allocation3], 4294903296 }
  0x52   :  { %4748 = dma.done.wait [#allocation8], 10240  }
  0x53   :  { %4749 = vsyncadd [#allocation8], 4294957056 }
  0x54   :  { %4750 = dma.done.wait [#allocation11], 16  }
  0x55   :  { %4751 = vsyncadd [#allocation11], 4294967280 }
  0x56   :  { %84 = sfence }
  0x57   :  { %v334_v0 = vld [vmem:[#allocation7 + $0x8] sm:$0xff]  ;;  %v333_v2 = vld [vmem:[#allocation7] sm:$0xff]  ;;  %s4857_s0 = sld [smem:[#allocation2]]  ;;  %v4763_v7 = vmov 0.0   ;;  %v336_v12 = vld [vmem:[#allocation7 + $0x18] sm:$0xff]  ;;  %v166_v36 = vlaneseq  ;;  %vm293_vm0 = vcmask 1040384  }
  0x58   :  { %v338_v1 = vld [vmem:[#allocation7 + $0x28] sm:$0xff]  ;;  %v337_v4 = vld [vmem:[#allocation7 + $0x20] sm:$0xff]  ;;  %737 = vmatprep.mubr.f32.mxu0 %v4763_v7  ;;  %s4862_s4 = sld [smem:[#allocation2 + $0x80]]  ;;  %808 = vmatprep.mubr.f32.mxu1 %v4763_v7  ;;  %v340_v13 = vld [vmem:[#allocation7 + $0x38] sm:$0xff]  ;;  %vm297_vm1 = vcmask 1041408   ;;  %vm301_vm2 = vcmask 1042432  }
  0x59   :  { %v4859_v3 = vpack.c.bf16 %v338_v1, %v334_v0  ;;  %v342_v5 = vld [vmem:[#allocation7 + $0x48] sm:$0xff]  ;;  %v4865_v8 = vpack.c.bf16 %v337_v4, %v333_v2  ;;  %v341_v10 = vld [vmem:[#allocation7 + $0x40] sm:$0xff]  ;;  %s4869_s27 = sld [smem:[#allocation2 + $0x100]]  ;;  %v335_v14 = vld [vmem:[#allocation7 + $0x10] sm:$0xff]  ;;  %v4877_v17 = vpack.c.bf16 %v340_v13, %v336_v12  ;;  %v4923_v54 = vshrl.u32 %v166_v36, 7 }
  0x5a   :  { %v346_v6 = vld [vmem:[#allocation7 + $0x68] sm:$0xff]  ;;  %v345_v11 = vld [vmem:[#allocation7 + $0x60] sm:$0xff]  ;;  %v339_v15 = vld [vmem:[#allocation7 + $0x30] sm:$0xff]  ;;  %s4872_s28 = sld [smem:[#allocation2 + $0x180]]  ;;  %vm305_vm3 = vcmask 1043456   ;;  %vm309_vm4 = vcmask 1044480  }
  0x5b   :  { %v4867_v9 = vpack.c.bf16 %v346_v6, %v342_v5  ;;  %4062 = vmatprep.subr.bf16.mxu0 %v4859_v3  ;;  %v4875_v16 = vpack.c.bf16 %v345_v11, %v341_v10  ;;  %v4879_v18 = vpack.c.bf16 %v339_v15, %v335_v14  ;;  %v350_v19 = vld [vmem:[#allocation7 + $0x88] sm:$0xff]  ;;  %v349_v21 = vld [vmem:[#allocation7 + $0x80] sm:$0xff]  ;;  %s4881_s29 = sld [smem:[#allocation2 + $0x200]]  ;;  %v344_v24 = vld [vmem:[#allocation7 + $0x58] sm:$0xff]  ;;  %4094 = vmatprep.subr.bf16.mxu1 %v4877_v17  ;;  %v4945_v11 = vsub.s32 0, %v4923_v54 }
  0x5c   :  { %4064 = vmatpush1.bf16.msra.mxu0 %v4865_v8  ;;  %v354_v20 = vld [vmem:[#allocation7 + $0xa8] sm:$0xff]  ;;  %v353_v23 = vld [vmem:[#allocation7 + $0xa0] sm:$0xff]  ;;  %v348_v25 = vld [vmem:[#allocation7 + $0x78] sm:$0xff]  ;;  %s4886_s7 = sld [smem:[#allocation2 + $0x280]]  ;;  %vm313_vm5 = vcmask 1045504   ;;  %vm317_vm6 = vcmask 1046528  }
  0x5d   :  { %4066 = vmatprep.subr.bf16.mxu0 %v4867_v9  ;;  %v4884_v22 = vpack.c.bf16 %v354_v20, %v350_v19  ;;  %v4889_v26 = vpack.c.bf16 %v348_v25, %v344_v24  ;;  %v343_v27 = vld [vmem:[#allocation7 + $0x50] sm:$0xff]  ;;  %v358_v29 = vld [vmem:[#allocation7 + $0xc8] sm:$0xff]  ;;  %s86_s8 = sshra.s32 %s4857_s0, 3  ;;  %s89_s9 = sand.u32 7, %s4857_s0  ;;  %4096 = vmatpush1.bf16.msra.mxu1 %v4879_v18  ;;  %v4898_v32 = vpack.c.bf16 %v353_v23, %v349_v21  ;;  %v352_v33 = vld [vmem:[#allocation7 + $0x98] sm:$0xff]  ;;  %v4952_v19 = vsub.s32 2, %v4923_v54 }
  0x5e   :  { %v347_v28 = vld [vmem:[#allocation7 + $0x70] sm:$0xff]  ;;  %v362_v31 = vld [vmem:[#allocation7 + $0xe8] sm:$0xff]  ;;  %s3945_s10 = sshll.u32 %s86_s8, 5  ;;  %s96_s11 = sshra.s32 %s4862_s4, 3  ;;  %v356_v34 = vld [vmem:[#allocation7 + $0xb8] sm:$0xff]  ;;  %v4958_v24 = vsub.s32 3, %v4923_v54 }
  0x5f   :  { %v4894_v30 = vpack.c.bf16 %v347_v28, %v343_v27  ;;  %4098 = vmatprep.subr.bf16.mxu1 %v4889_v26  ;;  %v351_v35 = vld [vmem:[#allocation7 + $0x90] sm:$0xff]  ;;  %s4901_s12 = sadd.s32 %s3945_s10, %s89_s9  ;;  %s99_s13 = sand.u32 7, %s4862_s4  ;;  %v4905_v37 = vpack.c.bf16 %v362_v31, %v358_v29  ;;  %v357_v38 = vld [vmem:[#allocation7 + $0xc0] sm:$0xff]  ;;  %v4907_v40 = vpack.c.bf16 %v356_v34, %v352_v33  ;;  %v366_v42 = vld [vmem:[#allocation7 + $0x108] sm:$0xff]  ;;  %vm4765_vm7 = vmmov 0  }
  0x60   :  { %4068 = vmatpush1.bf16.msra.mxu0 %v4875_v16  ;;  %v361_v39 = vld [vmem:[#allocation7 + $0xe0] sm:$0xff]  ;;  %v355_v41 = vld [vmem:[#allocation7 + $0xb0] sm:$0xff]  ;;  %s3946_s14 = sshll.u32 %s96_s11, 5  ;;  %v370_v43 = vld [vmem:[#allocation7 + $0x128] sm:$0xff]  ;;  %s106_s21 = sshra.s32 %s4869_s27, 3 }
  0x61   :  { %4070 = vmatprep.subr.bf16.mxu0 %v4884_v22  ;;  %v360_v44 = vld [vmem:[#allocation7 + $0xd8] sm:$0xff]  ;;  %s4909_s1 = sadd.s32 %s3946_s14, %s99_s13  ;;  %4100 = vmatpush1.bf16.msra.mxu1 %v4894_v30  ;;  %v4913_v45 = vpack.c.bf16 %v355_v41, %v351_v35  ;;  %v365_v46 = vld [vmem:[#allocation7 + $0x100] sm:$0xff]  ;;  %s109_s30 = sand.u32 7, %s4869_s27  ;;  %v4917_v49 = vpack.c.bf16 %v361_v39, %v357_v38  ;;  %v359_v51 = vld [vmem:[#allocation7 + $0xd0] sm:$0xff]  ;;  %v4926_v55 = vpack.c.bf16 %v370_v43, %v366_v42 }
  0x62   :  { %v369_v47 = vld [vmem:[#allocation7 + $0x120] sm:$0xff]  ;;  %v364_v48 = vld [vmem:[#allocation7 + $0xf8] sm:$0xff]  ;;  %4102 = vmatprep.subr.bf16.mxu1 %v4907_v40  ;;  %v363_v52 = vld [vmem:[#allocation7 + $0xf0] sm:$0xff]  ;;  %s3947_s6 = sshll.u32 %s106_s21, 5  ;;  %s116_s15 = sshra.s32 %s4872_s28, 3 }
  0x63   :  { %v4920_v50 = vpack.c.bf16 %v364_v48, %v360_v44  ;;  %v374_v53 = vld [vmem:[#allocation7 + $0x148] sm:$0xff]  ;;  %v368_v57 = vld [vmem:[#allocation7 + $0x118] sm:$0xff]  ;;  %s4928_s16 = sadd.s32 %s3947_s6, %s109_s30  ;;  %s119_s17 = sand.u32 7, %s4872_s28  ;;  %v373_v59 = vld [vmem:[#allocation7 + $0x140] sm:$0xff]  ;;  %v4932_v62 = vpack.c.bf16 %v363_v52, %v359_v51  ;;  %v4938_v2 = vpack.c.bf16 %v369_v47, %v365_v46 }
  0x64   :  { %4072 = vmatpush1.bf16.msra.mxu0 %v4898_v32  ;;  %v378_v56 = vld [vmem:[#allocation7 + $0x168] sm:$0xff]  ;;  %v372_v58 = vld [vmem:[#allocation7 + $0x138] sm:$0xff]  ;;  %v377_v60 = vld [vmem:[#allocation7 + $0x160] sm:$0xff]  ;;  %s3948_s18 = sshll.u32 %s116_s15, 5  ;;  %s126_s19 = sshra.s32 %s4881_s29, 3 }
  0x65   :  { %4074 = vmatprep.subr.bf16.mxu0 %v4905_v37  ;;  %v367_v61 = vld [vmem:[#allocation7 + $0x110] sm:$0xff]  ;;  %4104 = vmatpush1.bf16.msra.mxu1 %v4913_v45  ;;  %v382_v0 = vld [vmem:[#allocation7 + $0x188] sm:$0xff]  ;;  %s4934_s2 = sadd.s32 %s3948_s18, %s119_s17  ;;  %v4941_v4 = vpack.c.bf16 %v372_v58, %v368_v57  ;;  %v381_v5 = vld [vmem:[#allocation7 + $0x180] sm:$0xff]  ;;  %s129_s20 = sand.u32 7, %s4881_s29  ;;  %v4948_v12 = vpack.c.bf16 %v378_v56, %v374_v53  ;;  %v4961_v25 = vpack.c.bf16 %v377_v60, %v373_v59 }
  0x66   :  { %v371_v63 = vld [vmem:[#allocation7 + $0x130] sm:$0xff]  ;;  %v386_v1 = vld [vmem:[#allocation7 + $0x1a8] sm:$0xff]  ;;  %4106 = vmatprep.subr.bf16.mxu1 %v4920_v50  ;;  %v385_v6 = vld [vmem:[#allocation7 + $0x1a0] sm:$0xff]  ;;  %s3949_s22 = sshll.u32 %s126_s19, 5  ;;  %s136_s23 = sshra.s32 %s4886_s7, 3 }
  0x67   :  { %v376_v10 = vld [vmem:[#allocation7 + $0x158] sm:$0xff]  ;;  %v375_v14 = vld [vmem:[#allocation7 + $0x150] sm:$0xff]  ;;  %v390_v20 = vld [vmem:[#allocation7 + $0x1c8] sm:$0xff]  ;;  %s4954_s24 = sadd.s32 %s3949_s22, %s129_s20  ;;  %s139_s3 = sand.u32 7, %s4886_s7  ;;  %v4963_v27 = vpack.c.bf16 %v371_v63, %v367_v61  ;;  %v4965_v28 = vpack.c.bf16 %v386_v1, %v382_v0  ;;  %v4969_v34 = vpack.c.bf16 %v385_v6, %v381_v5 }
  0x68   :  { %4076 = vmatpush1.bf16.msra.mxu0 %v4917_v49  ;;  %v380_v13 = vld [vmem:[#allocation7 + $0x178] sm:$0xff]  ;;  %v379_v15 = vld [vmem:[#allocation7 + $0x170] sm:$0xff]  ;;  %v394_v21 = vld [vmem:[#allocation7 + $0x1e8] sm:$0xff]  ;;  %s3950_s25 = sshll.u32 %s136_s23, 5  ;;  %s93_s26 = scalar_lea.vmem [#allocation6], %s4901_s12 }
  0x69   :  { %4078 = vmatprep.subr.bf16.mxu0 %v4926_v55  ;;  %v389_v23 = vld [vmem:[#allocation7 + $0x1c0] sm:$0xff]  ;;  %4108 = vmatpush1.bf16.msra.mxu1 %v4932_v62  ;;  %v384_v31 = vld [vmem:[#allocation7 + $0x198] sm:$0xff]  ;;  %v4971_v35 = vpack.c.bf16 %v380_v13, %v376_v10  ;;  %v4973_v36 = vpack.c.bf16 %v379_v15, %v375_v14  ;;  %v383_v38 = vld [vmem:[#allocation7 + $0x190] sm:$0xff]  ;;  %s103_s0 = scalar_lea.vmem [#allocation6], %s4909_s1  ;;  %s142_s4 = sadd.s32 %s3950_s25, %s139_s3  ;;  %v4978_v43 = vpack.c.bf16 %v394_v21, %v390_v20 }
  0x6a   :  { %v393_v29 = vld [vmem:[#allocation7 + $0x1e0] sm:$0xff]  ;;  %v388_v33 = vld [vmem:[#allocation7 + $0x1b8] sm:$0xff]  ;;  %4110 = vmatprep.subr.bf16.mxu1 %v4941_v4  ;;  %v387_v39 = vld [vmem:[#allocation7 + $0x1b0] sm:$0xff]  ;;  %s113_s27 = scalar_lea.vmem [#allocation6], %s4928_s16  ;;  %s123_s28 = scalar_lea.vmem [#allocation6], %s4934_s2 }
  0x6b   :  { %v94_v41 = vld [vmem:[%s93_s26] ss:$8 sm:$0xf]  ;;  %s133_s29 = scalar_lea.vmem [#allocation6], %s4954_s24  ;;  %s4986_s7 = sld [smem:[#allocation2 + $0x300]]  ;;  %v4993_v59 = vpack.c.bf16 %v393_v29, %v389_v23  ;;  %v5002_v0 = vpack.c.bf16 %v388_v33, %v384_v31  ;;  %v5007_v10 = vpack.c.bf16 %v387_v39, %v383_v38 }
  0x6c   :  { %4080 = vmatpush1.bf16.msra.mxu0 %v4938_v2  ;;  %v104_v42 = vld [vmem:[%s103_s0] ss:$8 sm:$0xf]  ;;  %v169_v47 = vrot.slane %v94_v41, %v4945_v11  ;;  %v173_v48 = vrot.slane %v94_v41, %v4952_v19  ;;  %v177_v53 = vrot.slane %v94_v41, %v4958_v24  ;;  %s4995_s8 = sld [smem:[#allocation2 + $0x380]]  ;;  %s143_s9 = scalar_lea.vmem [#allocation6], %s142_s4 }
  0x6d   :  { %4082 = vmatprep.subr.bf16.mxu0 %v4948_v12  ;;  %v114_v44 = vld [vmem:[%s113_s27] ss:$8 sm:$0xf]  ;;  %v185_v51 = vrot.slane %v104_v42, %v4945_v11  ;;  %v189_v56 = vrot.slane %v104_v42, %v4952_v19  ;;  %v193_v57 = vrot.slane %v104_v42, %v4958_v24  ;;  %4112 = vmatpush1.bf16.msra.mxu1 %v4963_v27  ;;  %s3776_s16 = sld [smem:[#allocation2 + $0x1]] }
  0x6e   :  { %v124_v46 = vld [vmem:[%s123_s28] ss:$8 sm:$0xf]  ;;  %v201_v58 = vrot.slane %v114_v44, %v4945_v11  ;;  %v205_v60 = vrot.slane %v114_v44, %v4952_v19  ;;  %v209_v61 = vrot.slane %v114_v44, %v4958_v24  ;;  %4114 = vmatprep.subr.bf16.mxu1 %v4971_v35  ;;  %s3779_s17 = sld [smem:[#allocation2 + $0x81]] }
  0x6f   :  { %v134_v52 = vld [vmem:[%s133_s29] ss:$8 sm:$0xf]  ;;  %v217_v63 = vrot.slane %v124_v46, %v4945_v11  ;;  %v221_v5 = vrot.slane %v124_v46, %v4952_v19  ;;  %v225_v6 = vrot.slane %v124_v46, %v4958_v24  ;;  %v294_v15 = vsel %vm293_vm0, %v169_v47, %v185_v51  ;;  %s3782_s18 = sld [smem:[#allocation2 + $0x101]] }
  0x70   :  { %4084 = vmatpush1.bf16.msra.mxu0 %v4961_v25  ;;  %v144_v1 = vld [vmem:[%s143_s9] ss:$8 sm:$0xf]  ;;  %v233_v13 = vrot.slane %v134_v52, %v4945_v11  ;;  %v237_v14 = vrot.slane %v134_v52, %v4952_v19  ;;  %v241_v23 = vrot.slane %v134_v52, %v4958_v24  ;;  %v295_v29 = vsel %vm293_vm0, %v173_v48, %v189_v56  ;;  %s3785_s19 = sld [smem:[#allocation2 + $0x181]] }
  0x71   :  { %4086 = vmatprep.subr.bf16.mxu0 %v4965_v28  ;;  %v392_v20 = vld [vmem:[#allocation7 + $0x1d8] sm:$0xff]  ;;  %v296_v31 = vsel %vm293_vm0, %v177_v53, %v193_v57  ;;  %v298_v33 = vsel %vm297_vm1, %v294_v15, %v201_v58  ;;  %4116 = vmatpush1.bf16.msra.mxu1 %v4973_v36  ;;  %v249_v38 = vrot.slane %v144_v1, %v4945_v11  ;;  %s146_s10 = sshra.s32 %s4986_s7, 3  ;;  %s149_s11 = sand.u32 7, %s4986_s7  ;;  %v391_v48 = vld [vmem:[#allocation7 + $0x1d0] sm:$0xff] }
  0x72   :  { %v396_v21 = vld [vmem:[#allocation7 + $0x1f8] sm:$0xff]  ;;  %v299_v39 = vsel %vm297_vm1, %v295_v29, %v205_v60  ;;  %v300_v41 = vsel %vm297_vm1, %v296_v31, %v209_v61  ;;  %v302_v42 = vsel %vm301_vm2, %v298_v33, %v217_v63  ;;  %4118 = vmatprep.subr.bf16.mxu1 %v5002_v0  ;;  %v395_v51 = vld [vmem:[#allocation7 + $0x1f0] sm:$0xff]  ;;  %s3951_s12 = sshll.u32 %s146_s10, 5  ;;  %s156_s13 = sshra.s32 %s4995_s8, 3  ;;  %v253_v52 = vrot.slane %v144_v1, %v4952_v19 }
  0x73   :  { %v303_v44 = vsel %vm301_vm2, %v299_v39, %v221_v5  ;;  %v304_v46 = vsel %vm301_vm2, %v300_v41, %v225_v6  ;;  %v5027_v47 = vpack.c.bf16 %v396_v21, %v392_v20  ;;  %v306_v53 = vsel %vm305_vm3, %v302_v42, %v233_v13  ;;  %s152_s14 = sadd.s32 %s3951_s12, %s149_s11  ;;  %s159_s1 = sand.u32 7, %s4995_s8 }
  0x74   :  { %4088 = vmatpush1.bf16.msra.mxu0 %v4969_v34  ;;  %v257_v56 = vrot.slane %v144_v1, %v4958_v24  ;;  %v307_v57 = vsel %vm305_vm3, %v303_v44, %v237_v14  ;;  %s3952_s21 = sshll.u32 %s156_s13, 5  ;;  %v308_v58 = vsel %vm305_vm3, %v304_v46, %v241_v23  ;;  %v5038_v60 = vpack.c.bf16 %v395_v51, %v391_v48  ;;  %s153_s30 = scalar_lea.vmem [#allocation6], %s152_s14 }
  0x75   :  { %4090 = vmatprep.subr.bf16.mxu0 %v4978_v43  ;;  %4120 = vmatpush1.bf16.msra.mxu1 %v5007_v10  ;;  %v154_v61 = vld [vmem:[%s153_s30] ss:$8 sm:$0xf]  ;;  %s162_s6 = sadd.s32 %s3952_s21, %s159_s1  ;;  %v310_v63 = vsel %vm309_vm4, %v306_v53, %v249_v38  ;;  %v311_v13 = vsel %vm309_vm4, %v307_v57, %v253_v52  ;;  %s398_s2 = sshra.s32 %s3776_s16, 3 }
  0x76   :  { %4122 = vmatprep.subr.bf16.mxu1 %v5027_v47  ;;  %v265_v1 = vrot.slane %v154_v61, %v4945_v11  ;;  %v269_v5 = vrot.slane %v154_v61, %v4952_v19  ;;  %v273_v6 = vrot.slane %v154_v61, %v4958_v24  ;;  %s163_s15 = scalar_lea.vmem [#allocation6], %s162_s6  ;;  %v312_v15 = vsel %vm309_vm4, %v308_v58, %v257_v56  ;;  %s401_s20 = sand.u32 7, %s3776_s16 }
  0x77   :  { %v164_v14 = vld [vmem:[%s163_s15] ss:$8 sm:$0xf]  ;;  %s3953_s22 = sshll.u32 %s398_s2, 5  ;;  %s408_s23 = sshra.s32 %s3779_s17, 3 }
  0x78   :  { %4092 = vmatpush1.bf16.msra.mxu0 %v4993_v59  ;;  %v281_v20 = vrot.slane %v164_v14, %v4945_v11  ;;  %v285_v21 = vrot.slane %v164_v14, %v4952_v19  ;;  %v314_v23 = vsel %vm313_vm5, %v310_v63, %v265_v1  ;;  %v289_v29 = vrot.slane %v164_v14, %v4958_v24  ;;  %s418_s24 = sshra.s32 %s3782_s18, 3  ;;  %s5097_s3 = sld [smem:[#allocation2 + $0x201]] }
  0x79   :  { %4126 = vmatprep.subr.bf16.mxu0 %v4859_v3  ;;  %4124 = vmatpush1.bf16.msra.mxu1 %v5038_v60  ;;  %v315_v31 = vsel %vm313_vm5, %v311_v13, %v269_v5  ;;  %v316_v33 = vsel %vm313_vm5, %v312_v15, %v273_v6  ;;  %s404_s25 = sadd.s32 %s3953_s22, %s401_s20  ;;  %s5099_s26 = sld [smem:[#allocation2 + $0x281]]  ;;  %v5109_v6 = vsub.s32 1, %v4923_v54 }
  0x7a   :  { %4158 = vmatprep.subr.bf16.mxu1 %v4877_v17  ;;  %v318_v38 = vsel %vm317_vm6, %v314_v23, %v281_v20  ;;  %v319_v41 = vsel %vm317_vm6, %v315_v31, %v285_v21  ;;  %v320_v42 = vsel %vm317_vm6, %v316_v33, %v289_v29  ;;  %s411_s0 = sand.u32 7, %s3779_s17  ;;  %s3954_s4 = sshll.u32 %s408_s23, 5 }
  0x7b   :  { %v321_v39 = vmul.f32 0.5, %v318_v38  ;;  %v326_v44 = vmul.f32 0.5, %v320_v42  ;;  %s421_s27 = sand.u32 7, %s3782_s18  ;;  %s3955_s28 = sshll.u32 %s418_s24, 5 }
  0x7c   :  { %s428_s29 = sshra.s32 %s3785_s19, 3  ;;  %s414_s7 = sadd.s32 %s3954_s4, %s411_s0 }
  0x7d   :  { %4546 = vtanh.f32 %v321_v39  ;;  %s5101_s8 = sld [smem:[#allocation2 + $0x301]]  ;;  %s424_s9 = sadd.s32 %s3955_s28, %s421_s27 }
  0x7e   :  { %4548 = vtanh.f32 %v319_v41  ;;  %s431_s10 = sand.u32 7, %s3785_s19  ;;  %s3956_s11 = sshll.u32 %s428_s29, 5 }
  0x7f   :  { %4550 = vtanh.f32 %v326_v44  ;;  %s438_s12 = sshra.s32 %s5097_s3, 3  ;;  %s448_s13 = sshra.s32 %s5099_s26, 3 }
  0x80   :  { %s5105_s14 = sld [smem:[#allocation2 + $0x381]]  ;;  %s405_s1 = scalar_lea.vmem [#allocation6], %s404_s25 }
  0x81   :  { %v406_v1 = vld [vmem:[%s405_s1] ss:$8 sm:$0xf]  ;;  %s434_s21 = sadd.s32 %s3956_s11, %s431_s10  ;;  %s415_s30 = scalar_lea.vmem [#allocation6], %s414_s7 }
  0x82   :  { %v416_v5 = vld [vmem:[%s415_s30] ss:$8 sm:$0xf]  ;;  %s441_s6 = sand.u32 7, %s5097_s3  ;;  %s3957_s15 = sshll.u32 %s438_s12, 5  ;;  %v481_v14 = vrot.slane %v406_v1, %v4945_v11  ;;  %v485_v20 = vrot.slane %v406_v1, %v5109_v6  ;;  %v489_v54 = vrot.slane %v406_v1, %v4952_v19 }
  0x83   :  { %s451_s16 = sand.u32 7, %s5099_s26  ;;  %s3958_s17 = sshll.u32 %s448_s13, 5  ;;  %v502_v15 = vrot.slane %v416_v5, %v4945_v11  ;;  %v506_v21 = vrot.slane %v416_v5, %v5109_v6  ;;  %v510_v23 = vrot.slane %v416_v5, %v4952_v19 }
  0x84   :  { %s458_s18 = sshra.s32 %s5101_s8, 3  ;;  %s425_s2 = scalar_lea.vmem [#allocation6], %s424_s9 }
  0x85   :  { %v426_v13 = vld [vmem:[%s425_s2] ss:$8 sm:$0xf]  ;;  %s444_s19 = sadd.s32 %s3957_s15, %s441_s6  ;;  %s5115_s20 = sadd.s32 %s3958_s17, %s451_s16  ;;  %v645_v33 = vsel %vm293_vm0, %v481_v14, %v502_v15  ;;  %v646_v39 = vsel %vm293_vm0, %v485_v20, %v506_v21 }
  0x86   :  { %s461_s22 = sand.u32 7, %s5101_s8  ;;  %s3959_s23 = sshll.u32 %s458_s18, 5  ;;  %v523_v31 = vrot.slane %v426_v13, %v4945_v11  ;;  %v527_v38 = vrot.slane %v426_v13, %v5109_v6  ;;  %v531_v41 = vrot.slane %v426_v13, %v4952_v19 }
  0x87   :  { %v4547_v46 = vpop.eup %4546  ;;  %s435_s24 = scalar_lea.vmem [#allocation6], %s434_s21  ;;  %s468_s3 = sshra.s32 %s5105_s14, 3 }
  0x88   :  { %v323_v48 = vmul.f32 0.5, %v4547_v46  ;;  %v4549_v51 = vpop.eup %4548  ;;  %v436_v29 = vld [vmem:[%s435_s24] ss:$8 sm:$0xf]  ;;  %s464_s25 = sadd.s32 %s3959_s23, %s461_s22  ;;  %s445_s26 = scalar_lea.vmem [#allocation6], %s444_s19  ;;  %v647_v46 = vsel %vm293_vm0, %v489_v54, %v510_v23  ;;  %v535_v23 = vrot.slane %v426_v13, %v4958_v24 }
  0x89   :  { %v4551_v56 = vpop.eup %4550  ;;  %v446_v42 = vld [vmem:[%s445_s26] ss:$8 sm:$0xf]  ;;  %s471_s0 = sand.u32 7, %s5105_s14  ;;  %s3960_s4 = sshll.u32 %s468_s3, 5  ;;  %v544_v44 = vrot.slane %v436_v29, %v4945_v11  ;;  %v651_v14 = vsel %vm297_vm1, %v647_v46, %v531_v41  ;;  %v556_v46 = vrot.slane %v436_v29, %v4958_v24 }
  0x8a   :  { %v324_v52 = vadd.f32 0.5, %v323_v48  ;;  %v328_v57 = vmul.f32 0.5, %v4551_v56  ;;  %v649_v48 = vsel %vm297_vm1, %v645_v33, %v523_v31  ;;  %v552_v56 = vrot.slane %v436_v29, %v4952_v19  ;;  %s455_s27 = scalar_lea.vmem [#allocation6], %s5115_s20  ;;  %s474_s28 = sadd.s32 %s3960_s4, %s471_s0 }
  0x8b   :  { %v653_v15 = vsel %vm301_vm2, %v649_v48, %v544_v44  ;;  %v569_v20 = vrot.slane %v446_v42, %v5109_v6  ;;  %v573_v54 = vrot.slane %v446_v42, %v4952_v19  ;;  %s465_s29 = scalar_lea.vmem [#allocation6], %s464_s25  ;;  %s475_s7 = scalar_lea.vmem [#allocation6], %s474_s28 }
  0x8c   :  { %v5060_v53 = vmul.f32 %v4549_v51, %v324_v52  ;;  %v329_v58 = vadd.f32 0.5, %v328_v57  ;;  %v548_v51 = vrot.slane %v436_v29, %v5109_v6  ;;  %v650_v52 = vsel %vm297_vm1, %v646_v39, %v527_v38  ;;  %v476_v13 = vld [vmem:[%s475_s7] ss:$8 sm:$0xf]  ;;  %s3800_s8 = sld [smem:[#allocation2 + $0x2]] }
  0x8d   :  { %v493_v57 = vrot.slane %v406_v1, %v4958_v24  ;;  %v466_v1 = vld [vmem:[%s465_s29] ss:$8 sm:$0xf]  ;;  %v655_v31 = vsel %vm301_vm2, %v651_v14, %v552_v56  ;;  %v577_v14 = vrot.slane %v446_v42, %v4958_v24  ;;  %v628_v29 = vrot.slane %v476_v13, %v4945_v11  ;;  %s3803_s9 = sld [smem:[#allocation2 + $0x82]] }
  0x8e   :  { %4552 = vtanh.f32 %v5060_v53  ;;  %v654_v21 = vsel %vm301_vm2, %v650_v52, %v548_v51  ;;  %v607_v48 = vrot.slane %v466_v1, %v4945_v11  ;;  %v659_v51 = vsel %vm305_vm3, %v655_v31, %v573_v54  ;;  %s3806_s10 = sld [smem:[#allocation2 + $0x102]] }
  0x8f   :  { %v658_v41 = vsel %vm305_vm3, %v654_v21, %v569_v20  ;;  %v632_v54 = vrot.slane %v476_v13, %v5109_v6  ;;  %s3809_s12 = sld [smem:[#allocation2 + $0x182]] }
  0x90   :  { %s5217_s30 = sld [smem:[#allocation2 + $0x202]] }
  0x91   :  { %s5219_s15 = sld [smem:[#allocation2 + $0x282]] }
  0x92   :  { %s834_s11 = sshra.s32 %s3800_s8, 3  ;;  %s837_s13 = sand.u32 7, %s3800_s8 }
  0x93   :  { %s3961_s14 = sshll.u32 %s834_s11, 5  ;;  %s844_s1 = sshra.s32 %s3803_s9, 3 }
  0x94   :  { %s854_s21 = sshra.s32 %s3806_s10, 3  ;;  %s840_s6 = sadd.s32 %s3961_s14, %s837_s13 }
  0x95   :  { %s847_s16 = sand.u32 7, %s3803_s9  ;;  %s3962_s17 = sshll.u32 %s844_s1, 5 }
  0x96   :  { %s857_s18 = sand.u32 7, %s3806_s10  ;;  %s3963_s2 = sshll.u32 %s854_s21, 5 }
  0x97   :  { %s864_s19 = sshra.s32 %s3809_s12, 3  ;;  %s850_s20 = sadd.s32 %s3962_s17, %s847_s16 }
  0x98   :  { %v4553_v61 = vpop.eup %4552  ;;  %s5221_s22 = sld [smem:[#allocation2 + $0x302]]  ;;  %s860_s23 = sadd.s32 %s3963_s2, %s857_s18 }
  0x99   :  { %v332_v63 = vmul.f32 %v4553_v61, %v329_v58  ;;  %v514_v58 = vrot.slane %v416_v5, %v4958_v24  ;;  %v456_v61 = vld [vmem:[%s455_s27] ss:$8 sm:$0xf]  ;;  %s867_s24 = sand.u32 7, %s3809_s12  ;;  %s3964_s3 = sshll.u32 %s864_s19, 5 }
  0x9a   :  { %v586_v5 = vrot.slane %v456_v61, %v4945_v11  ;;  %v590_v39 = vrot.slane %v456_v61, %v5109_v6  ;;  %v594_v44 = vrot.slane %v456_v61, %v4952_v19  ;;  %v598_v31 = vrot.slane %v456_v61, %v4958_v24  ;;  %s874_s25 = sshra.s32 %s5217_s30, 3  ;;  %s884_s26 = sshra.s32 %s5219_s15, 3 }
  0x9b   :  { %738 = vmatmul.mubr.f32.vlgmr.msra.gmra.mrb[0].mxu0 %v332_v63  ;;  %809 = vmatmul.mubr.f32.vlgmr.msra.gmra.mrb[0].mxu1 %v332_v63  ;;  %v565_v63 = vrot.slane %v446_v42, %v4945_v11  ;;  %v648_v33 = vsel %vm293_vm0, %v493_v57, %v514_v58  ;;  %v611_v57 = vrot.slane %v466_v1, %v5109_v6  ;;  %s5225_s0 = sld [smem:[#allocation2 + $0x382]]  ;;  %s841_s4 = scalar_lea.vmem [#allocation6], %s840_s6 }
  0x9c   :  { %4128 = vmatpush1.bf16.msra.mxu0 %v4865_v8  ;;  %4160 = vmatpush1.bf16.msra.mxu1 %v4879_v18  ;;  %v652_v52 = vsel %vm297_vm1, %v648_v33, %v535_v23  ;;  %v662_v58 = vsel %vm309_vm4, %v658_v41, %v590_v39  ;;  %v619_v41 = vrot.slane %v466_v1, %v4958_v24  ;;  %s870_s27 = sadd.s32 %s3964_s3, %s867_s24  ;;  %s851_s28 = scalar_lea.vmem [#allocation6], %s850_s20 }
  0x9d   :  { %4130 = vmatprep.subr.bf16.mxu0 %v4867_v9  ;;  %4162 = vmatprep.subr.bf16.mxu1 %v4889_v26  ;;  %v657_v38 = vsel %vm305_vm3, %v653_v15, %v565_v63  ;;  %v615_v63 = vrot.slane %v466_v1, %v4952_v19  ;;  %v663_v15 = vsel %vm309_vm4, %v659_v51, %v594_v44  ;;  %s877_s29 = sand.u32 7, %s5217_s30  ;;  %s3965_s7 = sshll.u32 %s874_s25, 5 }
  0x9e   :  { %1173 = vmatprep.mubr.f32.mxu0 %v4763_v7  ;;  %1244 = vmatprep.mubr.f32.mxu1 %v4763_v7  ;;  %v661_v56 = vsel %vm309_vm4, %v657_v38, %v586_v5  ;;  %v656_v20 = vsel %vm301_vm2, %v652_v52, %v556_v46  ;;  %v666_v23 = vsel %vm313_vm5, %v662_v58, %v611_v57  ;;  %s887_s8 = sand.u32 7, %s5219_s15  ;;  %s3966_s9 = sshll.u32 %s884_s26, 5 }
  0x9f   :  { %v665_v21 = vsel %vm313_vm5, %v661_v56, %v607_v48  ;;  %v636_v5 = vrot.slane %v476_v13, %v4952_v19  ;;  %v667_v33 = vsel %vm313_vm5, %v663_v15, %v615_v63  ;;  %v660_v42 = vsel %vm305_vm3, %v656_v20, %v577_v14  ;;  %s894_s10 = sshra.s32 %s5221_s22, 3  ;;  %s861_s11 = scalar_lea.vmem [#allocation6], %s860_s23 }
  0xa0   :  { %4132 = vmatpush1.bf16.msra.mxu0 %v4875_v16  ;;  %4164 = vmatpush1.bf16.msra.mxu1 %v4894_v30  ;;  %v669_v38 = vsel %vm317_vm6, %v665_v21, %v628_v29  ;;  %v670_v39 = vsel %vm317_vm6, %v666_v23, %v632_v54  ;;  %v664_v51 = vsel %vm309_vm4, %v660_v42, %v598_v31  ;;  %s880_s12 = sadd.s32 %s3965_s7, %s877_s29  ;;  %s890_s13 = sadd.s32 %s3966_s9, %s887_s8 }
  0xa1   :  { %4134 = vmatprep.subr.bf16.mxu0 %v4884_v22  ;;  %4166 = vmatprep.subr.bf16.mxu1 %v4907_v40  ;;  %v671_v46 = vsel %vm317_vm6, %v667_v33, %v636_v5  ;;  %v640_v58 = vrot.slane %v476_v13, %v4958_v24  ;;  %v668_v29 = vsel %vm313_vm5, %v664_v51, %v619_v41  ;;  %s897_s14 = sand.u32 7, %s5221_s22  ;;  %s3967_s1 = sshll.u32 %s894_s10, 5 }
  0xa2   :  { %s871_s21 = scalar_lea.vmem [#allocation6], %s870_s27  ;;  %s904_s30 = sshra.s32 %s5225_s0, 3 }
  0xa3   :  { %v672_v1 = vsel %vm317_vm6, %v668_v29, %v640_v58  ;;  %v872_v29 = vld [vmem:[%s871_s21] ss:$8 sm:$0xf]  ;;  %s900_s6 = sadd.s32 %s3967_s1, %s897_s14  ;;  %s881_s15 = scalar_lea.vmem [#allocation6], %s880_s12 }
  0xa4   :  { %4136 = vmatpush1.bf16.msra.mxu0 %v4898_v32  ;;  %4168 = vmatpush1.bf16.msra.mxu1 %v4913_v45  ;;  %s907_s16 = sand.u32 7, %s5225_s0  ;;  %s3968_s17 = sshll.u32 %s904_s30, 5 }
  0xa5   :  { %4138 = vmatprep.subr.bf16.mxu0 %v4905_v37  ;;  %4170 = vmatprep.subr.bf16.mxu1 %v4920_v50  ;;  %s891_s18 = scalar_lea.vmem [#allocation6], %s890_s13  ;;  %s910_s2 = sadd.s32 %s3968_s17, %s907_s16 }
  0xa6   :  { %s901_s19 = scalar_lea.vmem [#allocation6], %s900_s6  ;;  %s911_s20 = scalar_lea.vmem [#allocation6], %s910_s2 }
  0xa7   :  { %s3824_s22 = sld [smem:[#allocation2 + $0x3]] }
  0xa8   :  { %4140 = vmatpush1.bf16.msra.mxu0 %v4917_v49  ;;  %4172 = vmatpush1.bf16.msra.mxu1 %v4932_v62  ;;  %s3827_s23 = sld [smem:[#allocation2 + $0x83]] }
  0xa9   :  { %4142 = vmatprep.subr.bf16.mxu0 %v4926_v55  ;;  %4174 = vmatprep.subr.bf16.mxu1 %v4941_v4  ;;  %s3830_s24 = sld [smem:[#allocation2 + $0x103]] }
  0xaa   :  { %s3833_s25 = sld [smem:[#allocation2 + $0x183]] }
  0xab   :  { %s5333_s7 = sld [smem:[#allocation2 + $0x283]] }
  0xac   :  { %4144 = vmatpush1.bf16.msra.mxu0 %v4938_v2  ;;  %4176 = vmatpush1.bf16.msra.mxu1 %v4963_v27  ;;  %s5335_s14 = sld [smem:[#allocation2 + $0x303]] }
  0xad   :  { %4146 = vmatprep.subr.bf16.mxu0 %v4948_v12  ;;  %4178 = vmatprep.subr.bf16.mxu1 %v4971_v35  ;;  %s1270_s3 = sshra.s32 %s3824_s22, 3  ;;  %s1273_s26 = sand.u32 7, %s3824_s22 }
  0xae   :  { %s3969_s0 = sshll.u32 %s1270_s3, 5  ;;  %s1283_s8 = sand.u32 7, %s3827_s23 }
  0xaf   :  { %s1290_s27 = sshra.s32 %s3830_s24, 3  ;;  %s1276_s29 = sadd.s32 %s3969_s0, %s1273_s26 }
  0xb0   :  { %4148 = vmatpush1.bf16.msra.mxu0 %v4961_v25  ;;  %4180 = vmatpush1.bf16.msra.mxu1 %v4973_v36  ;;  %s1293_s10 = sand.u32 7, %s3830_s24  ;;  %s1300_s12 = sshra.s32 %s3833_s25, 3 }
  0xb1   :  { %4150 = vmatprep.subr.bf16.mxu0 %v4965_v28  ;;  %4182 = vmatprep.subr.bf16.mxu1 %v5002_v0  ;;  %s1303_s21 = sand.u32 7, %s3833_s25  ;;  %s3972_s30 = sshll.u32 %s1300_s12, 5 }
  0xb2   :  { %s5339_s16 = sld [smem:[#allocation2 + $0x383]]  ;;  %s1277_s17 = scalar_lea.vmem [#allocation6], %s1276_s29 }
  0xb3   :  { %s1323_s22 = sand.u32 7, %s5333_s7  ;;  %s1330_s24 = sshra.s32 %s5335_s14, 3 }
  0xb4   :  { %4152 = vmatpush1.bf16.msra.mxu0 %v4969_v34  ;;  %4184 = vmatpush1.bf16.msra.mxu1 %v5007_v10  ;;  %s1333_s0 = sand.u32 7, %s5335_s14  ;;  %s3848_s14 = sld [smem:[#allocation2 + $0x4]] }
  0xb5   :  { %4154 = vmatprep.subr.bf16.mxu0 %v4978_v43  ;;  %4186 = vmatprep.subr.bf16.mxu1 %v5027_v47 }
  0xb8   :  { %4156 = vmatpush1.bf16.msra.mxu0 %v4993_v59  ;;  %4188 = vmatpush1.bf16.msra.mxu1 %v5038_v60 }
  0xb9   :  { %4190 = vmatprep.subr.bf16.mxu0 %v4859_v3  ;;  %4222 = vmatprep.subr.bf16.mxu1 %v4877_v17 }
 0x16e   :  { %v739_v44 = vpop.f32.mrb[0].mxu0  ;;  %v810_v48 = vpop.f32.mrb[0].mxu1 }
 0x16f   :  { %v740_v52 = vadd.f32 %v739_v44, %v669_v38  ;;  %v741_v56 = vpop.f32.mrb[1].mxu0  ;;  %v812_v57 = vpop.f32.mrb[1].mxu1  ;;  %v811_v14 = vadd.f32 %v810_v48, %v671_v46 }
 0x170   :  { %v742_v61 = vadd.f32 %v741_v56, %v670_v39  ;;  %v813_v20 = vadd.f32 %v812_v57, %v672_v1  ;;  %v852_v56 = vld [vmem:[%s851_s28] ss:$8 sm:$0xf]  ;;  %s5331_s28 = sld [smem:[#allocation2 + $0x203]] }
 0x171   :  { %v815_v63 = vmul.f32 0.5, %v740_v52  ;;  %v862_v57 = vld [vmem:[%s861_s11] ss:$8 sm:$0xf]  ;;  %v938_v58 = vrot.slane %v852_v56, %v4945_v11  ;;  %s3971_s11 = sshll.u32 %s1290_s27, 5 }
 0x172   :  { %v816_v15 = vmul.f32 0.5, %v742_v61  ;;  %v824_v21 = vmul.f32 0.5, %v813_v20  ;;  %s1296_s1 = sadd.s32 %s3971_s11, %s1293_s10 }
 0x173   :  { %4554 = vtanh.f32 %v815_v63  ;;  %s1297_s3 = scalar_lea.vmem [#allocation6], %s1296_s1  ;;  %s3851_s1 = sld [smem:[#allocation2 + $0x84]] }
 0x174   :  { %4556 = vtanh.f32 %v816_v15  ;;  %v959_v15 = vrot.slane %v862_v57, %v4945_v11 }
 0x175   :  { %4558 = vtanh.f32 %v811_v14  ;;  %v942_v14 = vrot.slane %v852_v56, %v5109_v6 }
 0x176   :  { %4560 = vtanh.f32 %v824_v21  ;;  %v946_v21 = vrot.slane %v852_v56, %v4952_v19  ;;  %s1310_s6 = sshra.s32 %s5331_s28, 3 }
 0x17d   :  { %v4555_v54 = vpop.eup %4554 }
 0x17e   :  { %v4557_v23 = vpop.eup %4556  ;;  %v819_v5 = vmul.f32 0.5, %v4555_v54  ;;  %v963_v54 = vrot.slane %v862_v57, %v5109_v6 }
 0x17f   :  { %v4559_v31 = vpop.eup %4558  ;;  %v820_v33 = vmul.f32 0.5, %v4557_v23 }
 0x180   :  { %v821_v42 = vadd.f32 0.5, %v819_v5  ;;  %v4561_v44 = vpop.eup %4560  ;;  %v882_v5 = vld [vmem:[%s881_s15] ss:$8 sm:$0xf]  ;;  %s1320_s15 = sshra.s32 %s5333_s7, 3 }
 0x181   :  { %v822_v13 = vadd.f32 0.5, %v820_v33  ;;  %v826_v46 = vmul.f32 0.5, %v4561_v44 }
 0x182   :  { %v829_v38 = vmul.f32 %v4559_v31, %v821_v42  ;;  %v980_v31 = vrot.slane %v872_v29, %v4945_v11  ;;  %v967_v42 = vrot.slane %v862_v57, %v4952_v19 }
 0x183   :  { %v828_v39 = vmul.f32 %v822_v13, %v5060_v53  ;;  %v827_v48 = vadd.f32 0.5, %v826_v46  ;;  %v842_v53 = vld [vmem:[%s841_s4] ss:$8 sm:$0xf]  ;;  %v984_v13 = vrot.slane %v872_v29, %v5109_v6  ;;  %v950_v46 = vrot.slane %v852_v56, %v4958_v24  ;;  %s1280_s4 = sshra.s32 %s3827_s23, 3  ;;  %s3974_s23 = sshll.u32 %s1320_s15, 5 }
 0x184   :  { %v917_v61 = vrot.slane %v842_v53, %v4945_v11  ;;  %v921_v63 = vrot.slane %v842_v53, %v5109_v6  ;;  %v925_v20 = vrot.slane %v842_v53, %v4952_v19  ;;  %v929_v44 = vrot.slane %v842_v53, %v4958_v24  ;;  %v902_v53 = vld [vmem:[%s901_s19] ss:$8 sm:$0xf]  ;;  %s3970_s9 = sshll.u32 %s1280_s4, 5  ;;  %s1313_s19 = sand.u32 7, %s5331_s28 }
 0x185   :  { %v5180_v41 = vadd.f32 %v829_v38, %v828_v39  ;;  %s1286_s13 = sadd.s32 %s3970_s9, %s1283_s8  ;;  %s1326_s26 = sadd.s32 %s3974_s23, %s1323_s22 }
 0x186   :  { %v1081_v1 = vsel %vm293_vm0, %v917_v61, %v938_v58  ;;  %v1082_v23 = vsel %vm293_vm0, %v921_v63, %v942_v14  ;;  %v1083_v38 = vsel %vm293_vm0, %v925_v20, %v946_v21  ;;  %v988_v61 = vrot.slane %v872_v29, %v4952_v19  ;;  %s1287_s2 = scalar_lea.vmem [#allocation6], %s1286_s13  ;;  %s3975_s4 = sshll.u32 %s1330_s24, 5 }
 0x187   :  { %4562 = vtanh.f32 %v5180_v41  ;;  %v1085_v33 = vsel %vm297_vm1, %v1081_v1, %v959_v15  ;;  %v1086_v39 = vsel %vm297_vm1, %v1082_v23, %v963_v54  ;;  %v1005_v58 = vrot.slane %v882_v5, %v5109_v6  ;;  %s1340_s28 = sshra.s32 %s5339_s16, 3  ;;  %s1336_s29 = sadd.s32 %s3975_s4, %s1333_s0 }
 0x188   :  { %v1087_v63 = vsel %vm297_vm1, %v1083_v38, %v967_v42  ;;  %v1090_v14 = vsel %vm301_vm2, %v1086_v39, %v984_v13  ;;  %v971_v15 = vrot.slane %v862_v57, %v4958_v24  ;;  %v1084_v1 = vsel %vm293_vm0, %v929_v44, %v950_v46  ;;  %v912_v57 = vld [vmem:[%s911_s20] ss:$8 sm:$0xf]  ;;  %s3973_s20 = sshll.u32 %s1310_s6, 5  ;;  %s1343_s8 = sand.u32 7, %s5339_s16 }
 0x189   :  { %v1009_v21 = vrot.slane %v882_v5, %v4952_v19  ;;  %v1091_v23 = vsel %vm301_vm2, %v1087_v63, %v988_v61  ;;  %v1043_v42 = vrot.slane %v902_v53, %v4945_v11  ;;  %v1047_v44 = vrot.slane %v902_v53, %v5109_v6  ;;  %s1316_s25 = sadd.s32 %s3973_s20, %s1313_s19  ;;  %s3976_s9 = sshll.u32 %s1340_s28, 5 }
 0x18a   :  { %v1088_v13 = vsel %vm297_vm1, %v1084_v1, %v971_v15  ;;  %v1051_v63 = vrot.slane %v902_v53, %v4952_v19  ;;  %s1317_s7 = scalar_lea.vmem [#allocation6], %s1316_s25  ;;  %s1327_s10 = scalar_lea.vmem [#allocation6], %s1326_s26 }
 0x18b   :  { %v1095_v46 = vsel %vm305_vm3, %v1091_v23, %v1009_v21  ;;  %v1072_v21 = vrot.slane %v912_v57, %v4952_v19  ;;  %s1346_s11 = sadd.s32 %s3976_s9, %s1343_s8  ;;  %s1337_s12 = scalar_lea.vmem [#allocation6], %s1336_s29 }
 0x18c   :  { %s1347_s13 = scalar_lea.vmem [#allocation6], %s1346_s11  ;;  %s3857_s6 = sld [smem:[#allocation2 + $0x184]] }
 0x18d   :  { %s1709_s15 = sand.u32 7, %s3848_s14  ;;  %s5447_s20 = sld [smem:[#allocation2 + $0x284]] }
 0x18e   :  { %s1719_s22 = sand.u32 7, %s3851_s1  ;;  %s5449_s0 = sld [smem:[#allocation2 + $0x304]] }
 0x18f   :  { %s5453_s8 = sld [smem:[#allocation2 + $0x384]] }
 0x191   :  { %v4563_v51 = vpop.eup %4562 }
 0x192   :  { %v832_v52 = vmul.f32 %v4563_v51, %v827_v48  ;;  %v892_v48 = vld [vmem:[%s891_s18] ss:$8 sm:$0xf]  ;;  %v1001_v51 = vrot.slane %v882_v5, %v4945_v11  ;;  %s1306_s18 = sadd.s32 %s3972_s30, %s1303_s21  ;;  %s3854_s21 = sld [smem:[#allocation2 + $0x104]] }
 0x193   :  { %v1022_v56 = vrot.slane %v892_v48, %v4945_v11  ;;  %v1026_v54 = vrot.slane %v892_v48, %v5109_v6  ;;  %v1030_v39 = vrot.slane %v892_v48, %v4952_v19  ;;  %v1034_v1 = vrot.slane %v892_v48, %v4958_v24  ;;  %s1307_s27 = scalar_lea.vmem [#allocation6], %s1306_s18  ;;  %s1706_s30 = sshra.s32 %s3848_s14, 3 }
 0x194   :  { %1174 = vmatmul.mubr.f32.vlgmr.msra.gmra.mrb[2].mxu0 %v832_v52  ;;  %1245 = vmatmul.mubr.f32.vlgmr.msra.gmra.mrb[2].mxu1 %v832_v52  ;;  %v1089_v52 = vsel %vm301_vm2, %v1085_v33, %v980_v31  ;;  %v1094_v31 = vsel %vm305_vm3, %v1090_v14, %v1005_v58  ;;  %v992_v33 = vrot.slane %v872_v29, %v4958_v24  ;;  %s3977_s16 = sshll.u32 %s1706_s30, 5  ;;  %s1736_s25 = sshra.s32 %s3857_s6, 3 }
 0x195   :  { %4192 = vmatpush1.bf16.msra.mxu0 %v4865_v8  ;;  %4224 = vmatpush1.bf16.msra.mxu1 %v4879_v18  ;;  %v1093_v20 = vsel %vm305_vm3, %v1089_v52, %v1001_v51  ;;  %v1098_v51 = vsel %vm309_vm4, %v1094_v31, %v1026_v54  ;;  %v1013_v52 = vrot.slane %v882_v5, %v4958_v24  ;;  %s1712_s19 = sadd.s32 %s3977_s16, %s1709_s15  ;;  %s3980_s28 = sshll.u32 %s1736_s25, 5 }
 0x196   :  { %4194 = vmatprep.subr.bf16.mxu0 %v4867_v9  ;;  %4226 = vmatprep.subr.bf16.mxu1 %v4889_v26  ;;  %v1097_v38 = vsel %vm309_vm4, %v1093_v20, %v1022_v56  ;;  %v1064_v29 = vrot.slane %v912_v57, %v4945_v11  ;;  %v1092_v61 = vsel %vm301_vm2, %v1088_v13, %v992_v33  ;;  %s1713_s9 = scalar_lea.vmem [#allocation6], %s1712_s19  ;;  %s1759_s14 = sand.u32 7, %s5447_s20 }
 0x197   :  { %1609 = vmatprep.mubr.f32.mxu0 %v4763_v7  ;;  %1680 = vmatprep.mubr.f32.mxu1 %v4763_v7  ;;  %v1101_v58 = vsel %vm313_vm5, %v1097_v38, %v1043_v42  ;;  %v1068_v14 = vrot.slane %v912_v57, %v5109_v6  ;;  %v1099_v15 = vsel %vm309_vm4, %v1095_v46, %v1030_v39  ;;  %s1769_s16 = sand.u32 7, %s5449_s0 }
 0x198   :  { %v1102_v56 = vsel %vm313_vm5, %v1098_v51, %v1047_v44  ;;  %v1096_v20 = vsel %vm305_vm3, %v1092_v61, %v1013_v52  ;;  %v1105_v5 = vsel %vm317_vm6, %v1101_v58, %v1064_v29  ;;  %v1103_v54 = vsel %vm313_vm5, %v1099_v15, %v1051_v63  ;;  %s1726_s18 = sshra.s32 %s3854_s21, 3  ;;  %s1729_s24 = sand.u32 7, %s3854_s21 }
 0x199   :  { %4196 = vmatpush1.bf16.msra.mxu0 %v4875_v16  ;;  %4228 = vmatpush1.bf16.msra.mxu1 %v4894_v30  ;;  %v1106_v23 = vsel %vm317_vm6, %v1102_v56, %v1068_v14  ;;  %v1055_v31 = vrot.slane %v902_v53, %v4958_v24  ;;  %v1100_v13 = vsel %vm309_vm4, %v1096_v20, %v1034_v1  ;;  %s1766_s21 = sshra.s32 %s5449_s0, 3  ;;  %s3872_s0 = sld [smem:[#allocation2 + $0x5]] }
 0x19a   :  { %4198 = vmatprep.subr.bf16.mxu0 %v4884_v22  ;;  %4230 = vmatprep.subr.bf16.mxu1 %v4907_v40  ;;  %v1107_v48 = vsel %vm317_vm6, %v1103_v54, %v1072_v21  ;;  %v1076_v51 = vrot.slane %v912_v57, %v4958_v24 }
 0x19b   :  { %v1104_v29 = vsel %vm313_vm5, %v1100_v13, %v1055_v31 }
 0x19c   :  { %v1108_v53 = vsel %vm317_vm6, %v1104_v29, %v1076_v51 }
 0x19d   :  { %4200 = vmatpush1.bf16.msra.mxu0 %v4898_v32  ;;  %4232 = vmatpush1.bf16.msra.mxu1 %v4913_v45 }
 0x19e   :  { %4202 = vmatprep.subr.bf16.mxu0 %v4905_v37  ;;  %4234 = vmatprep.subr.bf16.mxu1 %v4920_v50 }
 0x1a1   :  { %4204 = vmatpush1.bf16.msra.mxu0 %v4917_v49  ;;  %4236 = vmatpush1.bf16.msra.mxu1 %v4932_v62 }
 0x1a2   :  { %4206 = vmatprep.subr.bf16.mxu0 %v4926_v55  ;;  %4238 = vmatprep.subr.bf16.mxu1 %v4941_v4 }
 0x1a5   :  { %4208 = vmatpush1.bf16.msra.mxu0 %v4938_v2  ;;  %4240 = vmatpush1.bf16.msra.mxu1 %v4963_v27 }
 0x1a6   :  { %4210 = vmatprep.subr.bf16.mxu0 %v4948_v12  ;;  %4242 = vmatprep.subr.bf16.mxu1 %v4971_v35 }
 0x1a9   :  { %4212 = vmatpush1.bf16.msra.mxu0 %v4961_v25  ;;  %4244 = vmatpush1.bf16.msra.mxu1 %v4973_v36 }
 0x1aa   :  { %4214 = vmatprep.subr.bf16.mxu0 %v4965_v28  ;;  %4246 = vmatprep.subr.bf16.mxu1 %v5002_v0 }
 0x1ad   :  { %4216 = vmatpush1.bf16.msra.mxu0 %v4969_v34  ;;  %4248 = vmatpush1.bf16.msra.mxu1 %v5007_v10 }
 0x1ae   :  { %4218 = vmatprep.subr.bf16.mxu0 %v4978_v43  ;;  %4250 = vmatprep.subr.bf16.mxu1 %v5027_v47 }
 0x1b1   :  { %4220 = vmatpush1.bf16.msra.mxu0 %v4993_v59  ;;  %4252 = vmatpush1.bf16.msra.mxu1 %v5038_v60 }
 0x1b2   :  { %4254 = vmatprep.subr.bf16.mxu0 %v4859_v3  ;;  %4286 = vmatprep.subr.bf16.mxu1 %v4877_v17 }
 0x267   :  { %v1175_v33 = vpop.f32.mrb[2].mxu0  ;;  %v1246_v42 = vpop.f32.mrb[2].mxu1 }
 0x268   :  { %v1176_v38 = vadd.f32 %v1175_v33, %v1105_v5  ;;  %v1177_v39 = vpop.f32.mrb[3].mxu0  ;;  %v1248_v44 = vpop.f32.mrb[3].mxu1  ;;  %v1247_v58 = vadd.f32 %v1246_v42, %v1107_v48  ;;  %v1298_v48 = vld [vmem:[%s1297_s3] ss:$8 sm:$0xf]  ;;  %s3979_s3 = sshll.u32 %s1726_s18, 5 }
 0x269   :  { %v1178_v46 = vadd.f32 %v1177_v39, %v1106_v23  ;;  %v1249_v63 = vadd.f32 %v1248_v44, %v1108_v53  ;;  %v1288_v44 = vld [vmem:[%s1287_s2] ss:$8 sm:$0xf]  ;;  %s5445_s2 = sld [smem:[#allocation2 + $0x204]]  ;;  %s1732_s4 = sadd.s32 %s3979_s3, %s1729_s24 }
 0x26a   :  { %v1251_v52 = vmul.f32 0.5, %v1176_v38  ;;  %v1374_v51 = vrot.slane %v1288_v44, %v4945_v11  ;;  %v1378_v29 = vrot.slane %v1288_v44, %v5109_v6  ;;  %s1733_s30 = scalar_lea.vmem [#allocation6], %s1732_s4  ;;  %s3875_s4 = sld [smem:[#allocation2 + $0x85]] }
 0x26b   :  { %v1252_v61 = vmul.f32 0.5, %v1178_v46  ;;  %v1260_v14 = vmul.f32 0.5, %v1249_v63 }
 0x26c   :  { %4564 = vtanh.f32 %v1251_v52 }
 0x26d   :  { %4566 = vtanh.f32 %v1252_v61  ;;  %v1308_v61 = vld [vmem:[%s1307_s27] ss:$8 sm:$0xf]  ;;  %s1739_s27 = sand.u32 7, %s3857_s6 }
 0x26e   :  { %4568 = vtanh.f32 %v1247_v58  ;;  %v1395_v58 = vrot.slane %v1298_v48, %v4945_v11 }
 0x26f   :  { %4570 = vtanh.f32 %v1260_v14  ;;  %v1382_v14 = vrot.slane %v1288_v44, %v4952_v19  ;;  %s1746_s29 = sshra.s32 %s5445_s2, 3 }
 0x276   :  { %v4565_v15 = vpop.eup %4564 }
 0x277   :  { %v4567_v56 = vpop.eup %4566  ;;  %v1255_v1 = vmul.f32 0.5, %v4565_v15  ;;  %v1399_v15 = vrot.slane %v1298_v48, %v5109_v6 }
 0x278   :  { %v1256_v20 = vmul.f32 0.5, %v4567_v56  ;;  %v4569_v21 = vpop.eup %4568 }
 0x279   :  { %v1257_v5 = vadd.f32 0.5, %v1255_v1  ;;  %v4571_v33 = vpop.eup %4570  ;;  %v1318_v1 = vld [vmem:[%s1317_s7] ss:$8 sm:$0xf]  ;;  %s1756_s7 = sshra.s32 %s5447_s20, 3 }
 0x27a   :  { %v1258_v57 = vadd.f32 0.5, %v1256_v20  ;;  %v1262_v42 = vmul.f32 0.5, %v4571_v33  ;;  %v1416_v20 = vrot.slane %v1308_v61, %v4945_v11 }
 0x27b   :  { %v1265_v54 = vmul.f32 %v4569_v21, %v1257_v5  ;;  %v1403_v21 = vrot.slane %v1298_v48, %v4952_v19 }
 0x27c   :  { %v1264_v23 = vmul.f32 %v1258_v57, %v5180_v41  ;;  %v1263_v13 = vadd.f32 0.5, %v1262_v42  ;;  %v1278_v41 = vld [vmem:[%s1277_s17] ss:$8 sm:$0xf]  ;;  %v1420_v57 = vrot.slane %v1308_v61, %v5109_v6  ;;  %v1386_v42 = vrot.slane %v1288_v44, %v4958_v24  ;;  %s1716_s17 = sshra.s32 %s3851_s1, 3  ;;  %s3982_s1 = sshll.u32 %s1756_s7, 5 }
 0x27d   :  { %v1353_v46 = vrot.slane %v1278_v41, %v4945_v11  ;;  %v1357_v52 = vrot.slane %v1278_v41, %v5109_v6  ;;  %v1361_v63 = vrot.slane %v1278_v41, %v4952_v19  ;;  %v1365_v33 = vrot.slane %v1278_v41, %v4958_v24  ;;  %v1338_v41 = vld [vmem:[%s1337_s12] ss:$8 sm:$0xf]  ;;  %s3978_s23 = sshll.u32 %s1716_s17, 5  ;;  %s1749_s12 = sand.u32 7, %s5445_s2 }
 0x27e   :  { %v5294_v31 = vadd.f32 %v1265_v54, %v1264_v23  ;;  %s1722_s26 = sadd.s32 %s3978_s23, %s1719_s22  ;;  %s1762_s15 = sadd.s32 %s3982_s1, %s1759_s14 }
 0x27f   :  { %v1517_v53 = vsel %vm293_vm0, %v1353_v46, %v1374_v51  ;;  %v1518_v56 = vsel %vm293_vm0, %v1357_v52, %v1378_v29  ;;  %v1519_v54 = vsel %vm293_vm0, %v1361_v63, %v1382_v14  ;;  %v1424_v46 = vrot.slane %v1308_v61, %v4952_v19  ;;  %s1723_s11 = scalar_lea.vmem [#allocation6], %s1722_s26  ;;  %s3983_s17 = sshll.u32 %s1766_s21, 5 }
 0x280   :  { %4572 = vtanh.f32 %v5294_v31  ;;  %v1521_v5 = vsel %vm297_vm1, %v1517_v53, %v1395_v58  ;;  %v1522_v23 = vsel %vm297_vm1, %v1518_v56, %v1399_v15  ;;  %v1441_v51 = vrot.slane %v1318_v1, %v5109_v6  ;;  %s1776_s2 = sshra.s32 %s5453_s8, 3  ;;  %s1772_s19 = sadd.s32 %s3983_s17, %s1769_s16 }
 0x281   :  { %v1523_v52 = vsel %vm297_vm1, %v1519_v54, %v1403_v21  ;;  %v1526_v29 = vsel %vm301_vm2, %v1522_v23, %v1420_v57  ;;  %v1407_v58 = vrot.slane %v1298_v48, %v4958_v24  ;;  %v1520_v53 = vsel %vm293_vm0, %v1365_v33, %v1386_v42  ;;  %v1348_v48 = vld [vmem:[%s1347_s13] ss:$8 sm:$0xf]  ;;  %s3981_s13 = sshll.u32 %s1746_s29, 5  ;;  %s1779_s22 = sand.u32 7, %s5453_s8 }
 0x282   :  { %v1445_v14 = vrot.slane %v1318_v1, %v4952_v19  ;;  %v1527_v56 = vsel %vm301_vm2, %v1523_v52, %v1424_v46  ;;  %v1479_v21 = vrot.slane %v1338_v41, %v4945_v11  ;;  %v1483_v33 = vrot.slane %v1338_v41, %v5109_v6  ;;  %s1752_s6 = sadd.s32 %s3981_s13, %s1749_s12  ;;  %s3984_s23 = sshll.u32 %s1776_s2, 5 }
 0x283   :  { %v1524_v57 = vsel %vm297_vm1, %v1520_v53, %v1407_v58  ;;  %v1487_v52 = vrot.slane %v1338_v41, %v4952_v19  ;;  %s1753_s20 = scalar_lea.vmem [#allocation6], %s1752_s6  ;;  %s1763_s24 = scalar_lea.vmem [#allocation6], %s1762_s15 }
 0x284   :  { %v1531_v42 = vsel %vm305_vm3, %v1527_v56, %v1445_v14  ;;  %v1508_v14 = vrot.slane %v1348_v48, %v4952_v19  ;;  %s1782_s3 = sadd.s32 %s3984_s23, %s1779_s22  ;;  %s1773_s25 = scalar_lea.vmem [#allocation6], %s1772_s19 }
 0x285   :  { %s1783_s26 = scalar_lea.vmem [#allocation6], %s1782_s3  ;;  %s3881_s29 = sld [smem:[#allocation2 + $0x185]] }
 0x286   :  { %s2145_s7 = sand.u32 7, %s3872_s0  ;;  %s5561_s13 = sld [smem:[#allocation2 + $0x285]] }
 0x287   :  { %s2155_s14 = sand.u32 7, %s3875_s4  ;;  %s5563_s16 = sld [smem:[#allocation2 + $0x305]] }
 0x288   :  { %s5567_s22 = sld [smem:[#allocation2 + $0x385]] }
 0x28a   :  { %v4573_v38 = vpop.eup %4572 }
 0x28b   :  { %v1268_v39 = vmul.f32 %v4573_v38, %v1263_v13  ;;  %v1328_v13 = vld [vmem:[%s1327_s10] ss:$8 sm:$0xf]  ;;  %v1437_v38 = vrot.slane %v1318_v1, %v4945_v11  ;;  %s1742_s10 = sadd.s32 %s3980_s28, %s1739_s27  ;;  %s3878_s27 = sld [smem:[#allocation2 + $0x105]] }
 0x28c   :  { %v1458_v44 = vrot.slane %v1328_v13, %v4945_v11  ;;  %v1462_v15 = vrot.slane %v1328_v13, %v5109_v6  ;;  %v1466_v23 = vrot.slane %v1328_v13, %v4952_v19  ;;  %v1470_v53 = vrot.slane %v1328_v13, %v4958_v24  ;;  %s1743_s18 = scalar_lea.vmem [#allocation6], %s1742_s10  ;;  %s2142_s28 = sshra.s32 %s3872_s0, 3 }
 0x28d   :  { %1610 = vmatmul.mubr.f32.vlgmr.msra.gmra.mrb[4].mxu0 %v1268_v39  ;;  %1681 = vmatmul.mubr.f32.vlgmr.msra.gmra.mrb[4].mxu1 %v1268_v39  ;;  %v1525_v39 = vsel %vm301_vm2, %v1521_v5, %v1416_v20  ;;  %v1530_v20 = vsel %vm305_vm3, %v1526_v29, %v1441_v51  ;;  %v1428_v5 = vrot.slane %v1308_v61, %v4958_v24  ;;  %s3985_s8 = sshll.u32 %s2142_s28, 5  ;;  %s2172_s6 = sshra.s32 %s3881_s29, 3 }
 0x28e   :  { %4256 = vmatpush1.bf16.msra.mxu0 %v4865_v8  ;;  %4288 = vmatpush1.bf16.msra.mxu1 %v4879_v18  ;;  %v1529_v63 = vsel %vm305_vm3, %v1525_v39, %v1437_v38  ;;  %v1534_v38 = vsel %vm309_vm4, %v1530_v20, %v1462_v15  ;;  %v1449_v39 = vrot.slane %v1318_v1, %v4958_v24  ;;  %s2148_s12 = sadd.s32 %s3985_s8, %s2145_s7  ;;  %s3988_s2 = sshll.u32 %s2172_s6, 5 }
 0x28f   :  { %4258 = vmatprep.subr.bf16.mxu0 %v4867_v9  ;;  %4290 = vmatprep.subr.bf16.mxu1 %v4889_v26  ;;  %v1533_v54 = vsel %vm309_vm4, %v1529_v63, %v1458_v44  ;;  %v1500_v61 = vrot.slane %v1348_v48, %v4945_v11  ;;  %v1528_v46 = vsel %vm301_vm2, %v1524_v57, %v1428_v5  ;;  %s2149_s23 = scalar_lea.vmem [#allocation6], %s2148_s12  ;;  %s2195_s0 = sand.u32 7, %s5561_s13 }
 0x290   :  { %2045 = vmatprep.mubr.f32.mxu0 %v4763_v7  ;;  %2116 = vmatprep.mubr.f32.mxu1 %v4763_v7  ;;  %v1537_v51 = vsel %vm313_vm5, %v1533_v54, %v1479_v21  ;;  %v1504_v29 = vrot.slane %v1348_v48, %v5109_v6  ;;  %v1535_v58 = vsel %vm309_vm4, %v1531_v42, %v1466_v23  ;;  %s2205_s8 = sand.u32 7, %s5563_s16 }
 0x291   :  { %v1538_v44 = vsel %vm313_vm5, %v1534_v38, %v1483_v33  ;;  %v1532_v63 = vsel %vm305_vm3, %v1528_v46, %v1449_v39  ;;  %v1541_v1 = vsel %vm317_vm6, %v1537_v51, %v1500_v61  ;;  %v1539_v15 = vsel %vm313_vm5, %v1535_v58, %v1487_v52  ;;  %s2162_s10 = sshra.s32 %s3878_s27, 3  ;;  %s2165_s21 = sand.u32 7, %s3878_s27 }
 0x292   :  { %4260 = vmatpush1.bf16.msra.mxu0 %v4875_v16  ;;  %4292 = vmatpush1.bf16.msra.mxu1 %v4894_v30  ;;  %v1542_v56 = vsel %vm317_vm6, %v1538_v44, %v1504_v29  ;;  %v1491_v20 = vrot.slane %v1338_v41, %v4958_v24  ;;  %v1536_v57 = vsel %vm309_vm4, %v1532_v63, %v1470_v53  ;;  %s2202_s27 = sshra.s32 %s5563_s16, 3  ;;  %s3896_s16 = sld [smem:[#allocation2 + $0x6]] }
 0x293   :  { %4262 = vmatprep.subr.bf16.mxu0 %v4884_v22  ;;  %4294 = vmatprep.subr.bf16.mxu1 %v4907_v40  ;;  %v1543_v13 = vsel %vm317_vm6, %v1539_v15, %v1508_v14  ;;  %v1512_v38 = vrot.slane %v1348_v48, %v4958_v24 }
 0x294   :  { %v1540_v61 = vsel %vm313_vm5, %v1536_v57, %v1491_v20 }
 0x295   :  { %v1544_v41 = vsel %vm317_vm6, %v1540_v61, %v1512_v38 }
 0x296   :  { %4264 = vmatpush1.bf16.msra.mxu0 %v4898_v32  ;;  %4296 = vmatpush1.bf16.msra.mxu1 %v4913_v45 }
 0x297   :  { %4266 = vmatprep.subr.bf16.mxu0 %v4905_v37  ;;  %4298 = vmatprep.subr.bf16.mxu1 %v4920_v50 }
 0x29a   :  { %4268 = vmatpush1.bf16.msra.mxu0 %v4917_v49  ;;  %4300 = vmatpush1.bf16.msra.mxu1 %v4932_v62 }
 0x29b   :  { %4270 = vmatprep.subr.bf16.mxu0 %v4926_v55  ;;  %4302 = vmatprep.subr.bf16.mxu1 %v4941_v4 }
 0x29e   :  { %4272 = vmatpush1.bf16.msra.mxu0 %v4938_v2  ;;  %4304 = vmatpush1.bf16.msra.mxu1 %v4963_v27 }
 0x29f   :  { %4274 = vmatprep.subr.bf16.mxu0 %v4948_v12  ;;  %4306 = vmatprep.subr.bf16.mxu1 %v4971_v35 }
 0x2a2   :  { %4276 = vmatpush1.bf16.msra.mxu0 %v4961_v25  ;;  %4308 = vmatpush1.bf16.msra.mxu1 %v4973_v36 }
 0x2a3   :  { %4278 = vmatprep.subr.bf16.mxu0 %v4965_v28  ;;  %4310 = vmatprep.subr.bf16.mxu1 %v5002_v0 }
 0x2a6   :  { %4280 = vmatpush1.bf16.msra.mxu0 %v4969_v34  ;;  %4312 = vmatpush1.bf16.msra.mxu1 %v5007_v10 }
 0x2a7   :  { %4282 = vmatprep.subr.bf16.mxu0 %v4978_v43  ;;  %4314 = vmatprep.subr.bf16.mxu1 %v5027_v47 }
 0x2aa   :  { %4284 = vmatpush1.bf16.msra.mxu0 %v4993_v59  ;;  %4316 = vmatpush1.bf16.msra.mxu1 %v5038_v60 }
 0x2ab   :  { %4318 = vmatprep.subr.bf16.mxu0 %v4859_v3  ;;  %4350 = vmatprep.subr.bf16.mxu1 %v4877_v17 }
 0x360   :  { %v1611_v5 = vpop.f32.mrb[4].mxu0  ;;  %v1682_v21 = vpop.f32.mrb[4].mxu1 }
 0x361   :  { %v1612_v54 = vadd.f32 %v1611_v5, %v1541_v1  ;;  %v1613_v23 = vpop.f32.mrb[5].mxu0  ;;  %v1684_v33 = vpop.f32.mrb[5].mxu1  ;;  %v1683_v51 = vadd.f32 %v1682_v21, %v1543_v13  ;;  %v1734_v13 = vld [vmem:[%s1733_s30] ss:$8 sm:$0xf]  ;;  %s3987_s30 = sshll.u32 %s2162_s10, 5 }
 0x362   :  { %v1614_v42 = vadd.f32 %v1613_v23, %v1542_v56  ;;  %v1685_v52 = vadd.f32 %v1684_v33, %v1544_v41  ;;  %v1724_v33 = vld [vmem:[%s1723_s11] ss:$8 sm:$0xf]  ;;  %s5559_s11 = sld [smem:[#allocation2 + $0x205]]  ;;  %s2168_s17 = sadd.s32 %s3987_s30, %s2165_s21 }
 0x363   :  { %v1687_v39 = vmul.f32 0.5, %v1612_v54  ;;  %v1810_v38 = vrot.slane %v1724_v33, %v4945_v11  ;;  %v1814_v61 = vrot.slane %v1724_v33, %v5109_v6  ;;  %s2169_s28 = scalar_lea.vmem [#allocation6], %s2168_s17  ;;  %s3899_s17 = sld [smem:[#allocation2 + $0x86]] }
 0x364   :  { %v1688_v46 = vmul.f32 0.5, %v1614_v42  ;;  %v1696_v29 = vmul.f32 0.5, %v1685_v52 }
 0x365   :  { %4574 = vtanh.f32 %v1687_v39 }
 0x366   :  { %4576 = vtanh.f32 %v1688_v46  ;;  %v1744_v46 = vld [vmem:[%s1743_s18] ss:$8 sm:$0xf]  ;;  %s2175_s18 = sand.u32 7, %s3881_s29 }
 0x367   :  { %4578 = vtanh.f32 %v1683_v51  ;;  %v1831_v51 = vrot.slane %v1734_v13, %v4945_v11 }
 0x368   :  { %4580 = vtanh.f32 %v1696_v29  ;;  %v1818_v29 = vrot.slane %v1724_v33, %v4952_v19  ;;  %s2182_s19 = sshra.s32 %s5559_s11, 3 }
 0x36f   :  { %v4575_v58 = vpop.eup %4574 }
 0x370   :  { %v4577_v44 = vpop.eup %4576  ;;  %v1691_v53 = vmul.f32 0.5, %v4575_v58  ;;  %v1835_v58 = vrot.slane %v1734_v13, %v5109_v6 }
 0x371   :  { %v1692_v63 = vmul.f32 0.5, %v4577_v44  ;;  %v4579_v14 = vpop.eup %4578 }
 0x372   :  { %v1693_v1 = vadd.f32 0.5, %v1691_v53  ;;  %v4581_v5 = vpop.eup %4580  ;;  %v1754_v53 = vld [vmem:[%s1753_s20] ss:$8 sm:$0xf]  ;;  %s2192_s20 = sshra.s32 %s5561_s13, 3 }
 0x373   :  { %v1694_v48 = vadd.f32 0.5, %v1692_v63  ;;  %v1698_v21 = vmul.f32 0.5, %v4581_v5  ;;  %v1852_v63 = vrot.slane %v1744_v46, %v4945_v11 }
 0x374   :  { %v1701_v15 = vmul.f32 %v4579_v14, %v1693_v1  ;;  %v1839_v14 = vrot.slane %v1734_v13, %v4952_v19 }
 0x375   :  { %v1700_v56 = vmul.f32 %v1694_v48, %v5294_v31  ;;  %v1699_v57 = vadd.f32 0.5, %v1698_v21  ;;  %v1714_v31 = vld [vmem:[%s1713_s9] ss:$8 sm:$0xf]  ;;  %v1856_v48 = vrot.slane %v1744_v46, %v5109_v6  ;;  %v1822_v21 = vrot.slane %v1724_v33, %v4958_v24  ;;  %s2152_s9 = sshra.s32 %s3875_s4, 3  ;;  %s3990_s4 = sshll.u32 %s2192_s20, 5 }
 0x376   :  { %v1789_v42 = vrot.slane %v1714_v31, %v4945_v11  ;;  %v1793_v39 = vrot.slane %v1714_v31, %v5109_v6  ;;  %v1797_v52 = vrot.slane %v1714_v31, %v4952_v19  ;;  %v1801_v5 = vrot.slane %v1714_v31, %v4958_v24  ;;  %v1774_v31 = vld [vmem:[%s1773_s25] ss:$8 sm:$0xf]  ;;  %s3986_s1 = sshll.u32 %s2152_s9, 5  ;;  %s2185_s25 = sand.u32 7, %s5559_s11 }
 0x377   :  { %v5408_v20 = vadd.f32 %v1701_v15, %v1700_v56  ;;  %s2158_s15 = sadd.s32 %s3986_s1, %s2155_s14  ;;  %s2198_s7 = sadd.s32 %s3990_s4, %s2195_s0 }
 0x378   :  { %v1953_v41 = vsel %vm293_vm0, %v1789_v42, %v1810_v38  ;;  %v1954_v44 = vsel %vm293_vm0, %v1793_v39, %v1814_v61  ;;  %v1955_v15 = vsel %vm293_vm0, %v1797_v52, %v1818_v29  ;;  %v1860_v42 = vrot.slane %v1744_v46, %v4952_v19  ;;  %s2159_s3 = scalar_lea.vmem [#allocation6], %s2158_s15  ;;  %s3991_s9 = sshll.u32 %s2202_s27, 5 }
 0x379   :  { %4582 = vtanh.f32 %v5408_v20  ;;  %v1957_v1 = vsel %vm297_vm1, %v1953_v41, %v1831_v51  ;;  %v1958_v56 = vsel %vm297_vm1, %v1954_v44, %v1835_v58  ;;  %v1877_v38 = vrot.slane %v1754_v53, %v5109_v6  ;;  %s2212_s11 = sshra.s32 %s5567_s22, 3  ;;  %s2208_s12 = sadd.s32 %s3991_s9, %s2205_s8 }
 0x37a   :  { %v1959_v39 = vsel %vm297_vm1, %v1955_v15, %v1839_v14  ;;  %v1962_v61 = vsel %vm301_vm2, %v1958_v56, %v1856_v48  ;;  %v1843_v51 = vrot.slane %v1734_v13, %v4958_v24  ;;  %v1956_v41 = vsel %vm293_vm0, %v1801_v5, %v1822_v21  ;;  %v1784_v13 = vld [vmem:[%s1783_s26] ss:$8 sm:$0xf]  ;;  %s3989_s26 = sshll.u32 %s2182_s19, 5  ;;  %s2215_s14 = sand.u32 7, %s5567_s22 }
 0x37b   :  { %v1881_v29 = vrot.slane %v1754_v53, %v4952_v19  ;;  %v1963_v44 = vsel %vm301_vm2, %v1959_v39, %v1860_v42  ;;  %v1915_v14 = vrot.slane %v1774_v31, %v4945_v11  ;;  %v1919_v5 = vrot.slane %v1774_v31, %v5109_v6  ;;  %s2188_s29 = sadd.s32 %s3989_s26, %s2185_s25  ;;  %s3992_s1 = sshll.u32 %s2212_s11, 5 }
 0x37c   :  { %v1960_v48 = vsel %vm297_vm1, %v1956_v41, %v1843_v51  ;;  %v1923_v39 = vrot.slane %v1774_v31, %v4952_v19  ;;  %s2189_s13 = scalar_lea.vmem [#allocation6], %s2188_s29  ;;  %s2199_s21 = scalar_lea.vmem [#allocation6], %s2198_s7 }
 0x37d   :  { %v1967_v21 = vsel %vm305_vm3, %v1963_v44, %v1881_v29  ;;  %v1944_v29 = vrot.slane %v1784_v13, %v4952_v19  ;;  %s2218_s30 = sadd.s32 %s3992_s1, %s2215_s14  ;;  %s2209_s6 = scalar_lea.vmem [#allocation6], %s2208_s12 }
 0x37e   :  { %s2219_s15 = scalar_lea.vmem [#allocation6], %s2218_s30  ;;  %s3905_s19 = sld [smem:[#allocation2 + $0x186]] }
 0x37f   :  { %s2581_s20 = sand.u32 7, %s3896_s16  ;;  %s5673_s26 = sld [smem:[#allocation2 + $0x286]] }
 0x380   :  { %s2591_s0 = sand.u32 7, %s3899_s17  ;;  %s5675_s8 = sld [smem:[#allocation2 + $0x306]] }
 0x381   :  { %s5679_s14 = sld [smem:[#allocation2 + $0x386]] }
 0x383   :  { %v4583_v54 = vpop.eup %4582 }
 0x384   :  { %v1704_v23 = vmul.f32 %v4583_v54, %v1699_v57  ;;  %v1764_v57 = vld [vmem:[%s1763_s24] ss:$8 sm:$0xf]  ;;  %v1873_v54 = vrot.slane %v1754_v53, %v4945_v11  ;;  %s2178_s24 = sadd.s32 %s3988_s2, %s2175_s18  ;;  %s3902_s18 = sld [smem:[#allocation2 + $0x106]] }
 0x385   :  { %v1894_v33 = vrot.slane %v1764_v57, %v4945_v11  ;;  %v1898_v58 = vrot.slane %v1764_v57, %v5109_v6  ;;  %v1902_v56 = vrot.slane %v1764_v57, %v4952_v19  ;;  %v1906_v41 = vrot.slane %v1764_v57, %v4958_v24  ;;  %s2179_s10 = scalar_lea.vmem [#allocation6], %s2178_s24  ;;  %s2578_s2 = sshra.s32 %s3896_s16, 3 }
 0x386   :  { %2046 = vmatmul.mubr.f32.vlgmr.msra.gmra.mrb[6].mxu0 %v1704_v23  ;;  %2117 = vmatmul.mubr.f32.vlgmr.msra.gmra.mrb[6].mxu1 %v1704_v23  ;;  %v1961_v23 = vsel %vm301_vm2, %v1957_v1, %v1852_v63  ;;  %v1966_v63 = vsel %vm305_vm3, %v1962_v61, %v1877_v38  ;;  %v1864_v1 = vrot.slane %v1744_v46, %v4958_v24  ;;  %s3993_s22 = sshll.u32 %s2578_s2, 5  ;;  %s2608_s29 = sshra.s32 %s3905_s19, 3 }
 0x387   :  { %4320 = vmatpush1.bf16.msra.mxu0 %v4865_v8  ;;  %4352 = vmatpush1.bf16.msra.mxu1 %v4879_v18  ;;  %v1965_v52 = vsel %vm305_vm3, %v1961_v23, %v1873_v54  ;;  %v1970_v54 = vsel %vm309_vm4, %v1966_v63, %v1898_v58  ;;  %v1885_v23 = vrot.slane %v1754_v53, %v4958_v24  ;;  %s2584_s25 = sadd.s32 %s3993_s22, %s2581_s20  ;;  %s3996_s11 = sshll.u32 %s2608_s29, 5 }
 0x388   :  { %4322 = vmatprep.subr.bf16.mxu0 %v4867_v9  ;;  %4354 = vmatprep.subr.bf16.mxu1 %v4889_v26  ;;  %v1969_v15 = vsel %vm309_vm4, %v1965_v52, %v1894_v33  ;;  %v1936_v46 = vrot.slane %v1784_v13, %v4945_v11  ;;  %v1964_v42 = vsel %vm301_vm2, %v1960_v48, %v1864_v1  ;;  %s2585_s1 = scalar_lea.vmem [#allocation6], %s2584_s25  ;;  %s2631_s16 = sand.u32 7, %s5673_s26 }
 0x389   :  { %2481 = vmatprep.mubr.f32.mxu0 %v4763_v7  ;;  %2552 = vmatprep.mubr.f32.mxu1 %v4763_v7  ;;  %v1973_v38 = vsel %vm313_vm5, %v1969_v15, %v1915_v14  ;;  %v1940_v61 = vrot.slane %v1784_v13, %v5109_v6  ;;  %v1971_v51 = vsel %vm309_vm4, %v1967_v21, %v1902_v56  ;;  %s2641_s22 = sand.u32 7, %s5675_s8 }
 0x38a   :  { %v1974_v33 = vsel %vm313_vm5, %v1970_v54, %v1919_v5  ;;  %v1968_v52 = vsel %vm305_vm3, %v1964_v42, %v1885_v23  ;;  %v1977_v53 = vsel %vm317_vm6, %v1973_v38, %v1936_v46  ;;  %v1975_v58 = vsel %vm313_vm5, %v1971_v51, %v1923_v39  ;;  %s2598_s24 = sshra.s32 %s3902_s18, 3  ;;  %s2601_s27 = sand.u32 7, %s3902_s18 }
 0x38b   :  { %4324 = vmatpush1.bf16.msra.mxu0 %v4875_v16  ;;  %4356 = vmatpush1.bf16.msra.mxu1 %v4894_v30  ;;  %v1978_v44 = vsel %vm317_vm6, %v1974_v33, %v1940_v61  ;;  %v1927_v63 = vrot.slane %v1774_v31, %v4958_v24  ;;  %v1972_v48 = vsel %vm309_vm4, %v1968_v52, %v1906_v41  ;;  %s2638_s18 = sshra.s32 %s5675_s8, 3  ;;  %s3920_s8 = sld [smem:[#allocation2 + $0x7]] }
 0x38c   :  { %4326 = vmatprep.subr.bf16.mxu0 %v4884_v22  ;;  %4358 = vmatprep.subr.bf16.mxu1 %v4907_v40  ;;  %v1979_v57 = vsel %vm317_vm6, %v1975_v58, %v1944_v29  ;;  %v1948_v54 = vrot.slane %v1784_v13, %v4958_v24 }
 0x38d   :  { %v1976_v46 = vsel %vm313_vm5, %v1972_v48, %v1927_v63 }
 0x38e   :  { %v1980_v31 = vsel %vm317_vm6, %v1976_v46, %v1948_v54 }
 0x38f   :  { %4328 = vmatpush1.bf16.msra.mxu0 %v4898_v32  ;;  %4360 = vmatpush1.bf16.msra.mxu1 %v4913_v45 }
 0x390   :  { %4330 = vmatprep.subr.bf16.mxu0 %v4905_v37  ;;  %4362 = vmatprep.subr.bf16.mxu1 %v4920_v50 }
 0x393   :  { %4332 = vmatpush1.bf16.msra.mxu0 %v4917_v49  ;;  %4364 = vmatpush1.bf16.msra.mxu1 %v4932_v62 }
 0x394   :  { %4334 = vmatprep.subr.bf16.mxu0 %v4926_v55  ;;  %4366 = vmatprep.subr.bf16.mxu1 %v4941_v4 }
 0x397   :  { %4336 = vmatpush1.bf16.msra.mxu0 %v4938_v2  ;;  %4368 = vmatpush1.bf16.msra.mxu1 %v4963_v27 }
 0x398   :  { %4338 = vmatprep.subr.bf16.mxu0 %v4948_v12  ;;  %4370 = vmatprep.subr.bf16.mxu1 %v4971_v35 }
 0x39b   :  { %4340 = vmatpush1.bf16.msra.mxu0 %v4961_v25  ;;  %4372 = vmatpush1.bf16.msra.mxu1 %v4973_v36 }
 0x39c   :  { %4342 = vmatprep.subr.bf16.mxu0 %v4965_v28  ;;  %4374 = vmatprep.subr.bf16.mxu1 %v5002_v0 }
 0x39f   :  { %4344 = vmatpush1.bf16.msra.mxu0 %v4969_v34  ;;  %4376 = vmatpush1.bf16.msra.mxu1 %v5007_v10 }
 0x3a0   :  { %4346 = vmatprep.subr.bf16.mxu0 %v4978_v43  ;;  %4378 = vmatprep.subr.bf16.mxu1 %v5027_v47 }
 0x3a3   :  { %4348 = vmatpush1.bf16.msra.mxu0 %v4993_v59  ;;  %4380 = vmatpush1.bf16.msra.mxu1 %v5038_v60 }
 0x3a4   :  { %4382 = vmatprep.subr.bf16.mxu0 %v4859_v3  ;;  %4414 = vmatprep.subr.bf16.mxu1 %v4877_v17 }
 0x459   :  { %v2047_v1 = vpop.f32.mrb[6].mxu0  ;;  %v2118_v14 = vpop.f32.mrb[6].mxu1 }
 0x45a   :  { %v2048_v15 = vadd.f32 %v2047_v1, %v1977_v53  ;;  %v2049_v56 = vpop.f32.mrb[7].mxu0  ;;  %v2120_v5 = vpop.f32.mrb[7].mxu1  ;;  %v2119_v38 = vadd.f32 %v2118_v14, %v1979_v57 }
 0x45b   :  { %v2050_v21 = vadd.f32 %v2049_v56, %v1978_v44  ;;  %v2121_v39 = vadd.f32 %v2120_v5, %v1980_v31 }
 0x45c   :  { %v2123_v23 = vmul.f32 0.5, %v2048_v15 }
 0x45d   :  { %v2124_v42 = vmul.f32 0.5, %v2050_v21  ;;  %v2132_v61 = vmul.f32 0.5, %v2121_v39 }
 0x45e   :  { %4584 = vtanh.f32 %v2123_v23  ;;  %v2180_v23 = vld [vmem:[%s2179_s10] ss:$8 sm:$0xf]  ;;  %s2611_s10 = sand.u32 7, %s3905_s19 }
 0x45f   :  { %4586 = vtanh.f32 %v2124_v42 }
 0x460   :  { %4588 = vtanh.f32 %v2119_v38 }
 0x461   :  { %4590 = vtanh.f32 %v2132_v61 }
 0x468   :  { %v4585_v51 = vpop.eup %4584 }
 0x469   :  { %v4587_v33 = vpop.eup %4586  ;;  %v2127_v41 = vmul.f32 0.5, %v4585_v51  ;;  %v2190_v51 = vld [vmem:[%s2189_s13] ss:$8 sm:$0xf]  ;;  %s2628_s13 = sshra.s32 %s5673_s26, 3 }
 0x46a   :  { %v2128_v52 = vmul.f32 0.5, %v4587_v33  ;;  %v4589_v29 = vpop.eup %4588  ;;  %v2288_v33 = vrot.slane %v2180_v23, %v4945_v11 }
 0x46b   :  { %v2129_v53 = vadd.f32 0.5, %v2127_v41  ;;  %v4591_v1 = vpop.eup %4590 }
 0x46c   :  { %v2130_v13 = vadd.f32 0.5, %v2128_v52  ;;  %v2134_v14 = vmul.f32 0.5, %v4591_v1  ;;  %v2200_v1 = vld [vmem:[%s2199_s21] ss:$8 sm:$0xf]  ;;  %s2614_s21 = sadd.s32 %s3996_s11, %s2611_s10  ;;  %s3926_s10 = sld [smem:[#allocation2 + $0x107]] }
 0x46d   :  { %v2137_v58 = vmul.f32 %v4589_v29, %v2129_v53  ;;  %v2292_v53 = vrot.slane %v2180_v23, %v5109_v6  ;;  %s3014_s11 = sshra.s32 %s3920_s8, 3 }
 0x46e   :  { %v2136_v44 = vmul.f32 %v2130_v13, %v5408_v20  ;;  %v2135_v48 = vadd.f32 0.5, %v2134_v14  ;;  %v2170_v20 = vld [vmem:[%s2169_s28] ss:$8 sm:$0xf]  ;;  %v2309_v14 = vrot.slane %v2190_v51, %v4945_v11  ;;  %s3995_s28 = sshll.u32 %s2598_s24, 5  ;;  %s2615_s24 = scalar_lea.vmem [#allocation6], %s2614_s21 }
 0x46f   :  { %v2267_v46 = vrot.slane %v2170_v20, %v4945_v11  ;;  %v2271_v39 = vrot.slane %v2170_v20, %v5109_v6  ;;  %v2275_v52 = vrot.slane %v2170_v20, %v4952_v19  ;;  %s2604_s9 = sadd.s32 %s3995_s28, %s2601_s27 }
 0x470   :  { %v5522_v63 = vadd.f32 %v2137_v58, %v2136_v44  ;;  %s2605_s2 = scalar_lea.vmem [#allocation6], %s2604_s9  ;;  %s3923_s9 = sld [smem:[#allocation2 + $0x87]] }
 0x472   :  { %4592 = vtanh.f32 %v5522_v63  ;;  %s3034_s21 = sshra.s32 %s3926_s10, 3 }
 0x47c   :  { %v4593_v15 = vpop.eup %4592 }
 0x47d   :  { %v2140_v56 = vmul.f32 %v4593_v15, %v2135_v48  ;;  %v2296_v15 = vrot.slane %v2180_v23, %v4952_v19 }
 0x47f   :  { %2482 = vmatmul.mubr.f32.vlgmr.msra.gmra.mrb[8].mxu0 %v2140_v56  ;;  %2553 = vmatmul.mubr.f32.vlgmr.msra.gmra.mrb[8].mxu1 %v2140_v56  ;;  %v2313_v56 = vrot.slane %v2190_v51, %v5109_v6 }
 0x480   :  { %4384 = vmatpush1.bf16.msra.mxu0 %v4865_v8  ;;  %4416 = vmatpush1.bf16.msra.mxu1 %v4879_v18 }
 0x481   :  { %4386 = vmatprep.subr.bf16.mxu0 %v4867_v9  ;;  %4418 = vmatprep.subr.bf16.mxu1 %v4889_v26 }
 0x482   :  { %2917 = vmatprep.mubr.f32.mxu0 %v4763_v7  ;;  %2988 = vmatprep.mubr.f32.mxu1 %v4763_v7 }
 0x484   :  { %4388 = vmatpush1.bf16.msra.mxu0 %v4875_v16  ;;  %4420 = vmatpush1.bf16.msra.mxu1 %v4894_v30 }
 0x485   :  { %4390 = vmatprep.subr.bf16.mxu0 %v4884_v22  ;;  %4422 = vmatprep.subr.bf16.mxu1 %v4907_v40 }
 0x488   :  { %4392 = vmatpush1.bf16.msra.mxu0 %v4898_v32  ;;  %4424 = vmatpush1.bf16.msra.mxu1 %v4913_v45 }
 0x489   :  { %4394 = vmatprep.subr.bf16.mxu0 %v4905_v37  ;;  %4426 = vmatprep.subr.bf16.mxu1 %v4920_v50 }
 0x48c   :  { %4396 = vmatpush1.bf16.msra.mxu0 %v4917_v49  ;;  %4428 = vmatpush1.bf16.msra.mxu1 %v4932_v62 }
 0x48d   :  { %4398 = vmatprep.subr.bf16.mxu0 %v4926_v55  ;;  %4430 = vmatprep.subr.bf16.mxu1 %v4941_v4 }
 0x490   :  { %4400 = vmatpush1.bf16.msra.mxu0 %v4938_v2  ;;  %4432 = vmatpush1.bf16.msra.mxu1 %v4963_v27 }
 0x491   :  { %4402 = vmatprep.subr.bf16.mxu0 %v4948_v12  ;;  %4434 = vmatprep.subr.bf16.mxu1 %v4971_v35 }
 0x494   :  { %4404 = vmatpush1.bf16.msra.mxu0 %v4961_v25  ;;  %4436 = vmatpush1.bf16.msra.mxu1 %v4973_v36 }
 0x495   :  { %4406 = vmatprep.subr.bf16.mxu0 %v4965_v28  ;;  %4438 = vmatprep.subr.bf16.mxu1 %v5002_v0 }
 0x498   :  { %4408 = vmatpush1.bf16.msra.mxu0 %v4969_v34  ;;  %4440 = vmatpush1.bf16.msra.mxu1 %v5007_v10 }
 0x499   :  { %4410 = vmatprep.subr.bf16.mxu0 %v4978_v43  ;;  %4442 = vmatprep.subr.bf16.mxu1 %v5027_v47 }
 0x49c   :  { %4412 = vmatpush1.bf16.msra.mxu0 %v4993_v59  ;;  %4444 = vmatpush1.bf16.msra.mxu1 %v5038_v60 }
 0x49d   :  { %4446 = vmatprep.subr.bf16.mxu0 %v4859_v3  ;;  %4478 = vmatprep.subr.bf16.mxu1 %v4877_v17  ;;  %v2150_v3 = vld [vmem:[%s2149_s23] ss:$8 sm:$0xf]  ;;  %s2588_s23 = sshra.s32 %s3899_s17, 3  ;;  %s3998_s17 = sshll.u32 %s2628_s13, 5 }
 0x49e   :  { %v2160_v17 = vld [vmem:[%s2159_s3] ss:$8 sm:$0xf]  ;;  %v2225_v5 = vrot.slane %v2150_v3, %v4945_v11  ;;  %v2229_v21 = vrot.slane %v2150_v3, %v5109_v6  ;;  %v2233_v38 = vrot.slane %v2150_v3, %v4952_v19  ;;  %v2237_v58 = vrot.slane %v2150_v3, %v4958_v24  ;;  %s5671_s3 = sld [smem:[#allocation2 + $0x206]]  ;;  %s3994_s4 = sshll.u32 %s2588_s23, 5 }
 0x49f   :  { %v2246_v57 = vrot.slane %v2160_v17, %v4945_v11  ;;  %v2250_v54 = vrot.slane %v2160_v17, %v5109_v6  ;;  %v2254_v31 = vrot.slane %v2160_v17, %v4952_v19  ;;  %v2258_v44 = vrot.slane %v2160_v17, %v4958_v24  ;;  %v2210_v3 = vld [vmem:[%s2209_s6] ss:$8 sm:$0xf]  ;;  %s2594_s7 = sadd.s32 %s3994_s4, %s2591_s0  ;;  %s2634_s20 = sadd.s32 %s3998_s17, %s2631_s16 }
 0x4a0   :  { %v2330_v17 = vrot.slane %v2200_v1, %v4945_v11  ;;  %s2595_s30 = scalar_lea.vmem [#allocation6], %s2594_s7  ;;  %s3999_s23 = sshll.u32 %s2638_s18, 5 }
 0x4a1   :  { %v2389_v42 = vsel %vm293_vm0, %v2225_v5, %v2246_v57  ;;  %v2390_v61 = vsel %vm293_vm0, %v2229_v21, %v2250_v54  ;;  %v2391_v29 = vsel %vm293_vm0, %v2233_v38, %v2254_v31  ;;  %v2279_v21 = vrot.slane %v2170_v20, %v4958_v24  ;;  %v2220_v20 = vld [vmem:[%s2219_s15] ss:$8 sm:$0xf]  ;;  %s2644_s25 = sadd.s32 %s3999_s23, %s2641_s22  ;;  %s2651_s0 = sand.u32 7, %s5679_s14 }
 0x4a2   :  { %v2393_v41 = vsel %vm297_vm1, %v2389_v42, %v2267_v46  ;;  %v2394_v13 = vsel %vm297_vm1, %v2390_v61, %v2271_v39  ;;  %v2395_v5 = vsel %vm297_vm1, %v2391_v29, %v2275_v52  ;;  %v2392_v54 = vsel %vm293_vm0, %v2237_v58, %v2258_v44  ;;  %s2635_s27 = scalar_lea.vmem [#allocation6], %s2634_s20  ;;  %s2645_s29 = scalar_lea.vmem [#allocation6], %s2644_s25 }
 0x4a3   :  { %v2397_v48 = vsel %vm301_vm2, %v2393_v41, %v2288_v33  ;;  %v2398_v57 = vsel %vm301_vm2, %v2394_v13, %v2292_v53  ;;  %v2317_v42 = vrot.slane %v2190_v51, %v4952_v19  ;;  %v2334_v38 = vrot.slane %v2200_v1, %v5109_v6  ;;  %s3017_s13 = sand.u32 7, %s3920_s8  ;;  %s3027_s16 = sand.u32 7, %s3923_s9 }
 0x4a4   :  { %v2401_v46 = vsel %vm305_vm3, %v2397_v48, %v2309_v14  ;;  %v2399_v31 = vsel %vm301_vm2, %v2395_v5, %v2296_v15  ;;  %v2402_v39 = vsel %vm305_vm3, %v2398_v57, %v2313_v56  ;;  %v2300_v61 = vrot.slane %v2180_v23, %v4958_v24  ;;  %s2618_s12 = sshra.s32 %s5671_s3, 3  ;;  %s2621_s6 = sand.u32 7, %s5671_s3 }
 0x4a5   :  { %v2351_v33 = vrot.slane %v2210_v3, %v4945_v11  ;;  %v2396_v41 = vsel %vm297_vm1, %v2392_v54, %v2279_v21  ;;  %v2405_v52 = vsel %vm309_vm4, %v2401_v46, %v2330_v17  ;;  %v2338_v53 = vrot.slane %v2200_v1, %v4952_v19  ;;  %s3997_s15 = sshll.u32 %s2618_s12, 5  ;;  %s2648_s3 = sshra.s32 %s5679_s14, 3 }
 0x4a6   :  { %v2355_v29 = vrot.slane %v2210_v3, %v5109_v6  ;;  %v2403_v13 = vsel %vm305_vm3, %v2399_v31, %v2317_v42  ;;  %v2406_v58 = vsel %vm309_vm4, %v2402_v39, %v2334_v38  ;;  %v2321_v44 = vrot.slane %v2190_v51, %v4958_v24  ;;  %s2624_s19 = sadd.s32 %s3997_s15, %s2621_s6  ;;  %s4000_s4 = sshll.u32 %s2648_s3, 5 }
 0x4a7   :  { %v2372_v23 = vrot.slane %v2220_v20, %v4945_v11  ;;  %v2400_v14 = vsel %vm301_vm2, %v2396_v41, %v2300_v61  ;;  %v2409_v48 = vsel %vm313_vm5, %v2405_v52, %v2351_v33  ;;  %v2359_v15 = vrot.slane %v2210_v3, %v4952_v19  ;;  %s2625_s26 = scalar_lea.vmem [#allocation6], %s2624_s19  ;;  %s2654_s28 = sadd.s32 %s4000_s4, %s2651_s0 }
 0x4a8   :  { %v2376_v56 = vrot.slane %v2220_v20, %v5109_v6  ;;  %v2407_v5 = vsel %vm309_vm4, %v2403_v13, %v2338_v53  ;;  %v2410_v57 = vsel %vm313_vm5, %v2406_v58, %v2355_v29  ;;  %v2342_v21 = vrot.slane %v2200_v1, %v4958_v24  ;;  %s2655_s7 = scalar_lea.vmem [#allocation6], %s2654_s28  ;;  %s3929_s12 = sld [smem:[#allocation2 + $0x187]] }
 0x4a9   :  { %v2404_v17 = vsel %vm305_vm3, %v2400_v14, %v2321_v44  ;;  %v2413_v51 = vsel %vm317_vm6, %v2409_v48, %v2372_v23  ;;  %v2380_v54 = vrot.slane %v2220_v20, %v4952_v19  ;;  %v2411_v46 = vsel %vm313_vm5, %v2407_v5, %v2359_v15  ;;  %s4001_s14 = sshll.u32 %s3014_s11, 5  ;;  %s5754_s15 = sld [smem:[#allocation2 + $0x287]] }
 0x4aa   :  { %v2414_v42 = vsel %vm317_vm6, %v2410_v57, %v2376_v56  ;;  %v2363_v38 = vrot.slane %v2210_v3, %v4958_v24  ;;  %v2408_v61 = vsel %vm309_vm4, %v2404_v17, %v2342_v21  ;;  %v2384_v29 = vrot.slane %v2220_v20, %v4958_v24  ;;  %s3020_s6 = sadd.s32 %s4001_s14, %s3017_s13  ;;  %s3037_s18 = sand.u32 7, %s3926_s10 }
 0x4ab   :  { %v2415_v1 = vsel %vm317_vm6, %v2411_v46, %v2380_v54  ;;  %s5756_s22 = sld [smem:[#allocation2 + $0x307]]  ;;  %s3021_s4 = scalar_lea.vmem [#allocation6], %s3020_s6 }
 0x4ac   :  { %v2412_v58 = vsel %vm313_vm5, %v2408_v61, %v2363_v38  ;;  %s5760_s0 = sld [smem:[#allocation2 + $0x387]] }
 0x4ad   :  { %v2416_v3 = vsel %vm317_vm6, %v2412_v58, %v2384_v29 }
 0x4ae   :  { %s3044_s19 = sshra.s32 %s3929_s12, 3 }
 0x4af   :  { %s4004_s3 = sshll.u32 %s3044_s19, 5  ;;  %s3067_s8 = sand.u32 7, %s5754_s15 }
 0x4b1   :  { %s3074_s10 = sshra.s32 %s5756_s22, 3  ;;  %s3077_s14 = sand.u32 7, %s5756_s22 }
 0x4b2   :  { %s4766_s22 = smov [#allocation12]  }
 0x552   :  { %v2483_v31 = vpop.f32.mrb[8].mxu0  ;;  %v2554_v39 = vpop.f32.mrb[8].mxu1 }
 0x553   :  { %v2484_v33 = vadd.f32 %v2483_v31, %v2413_v51  ;;  %v2485_v41 = vpop.f32.mrb[9].mxu0  ;;  %v2556_v52 = vpop.f32.mrb[9].mxu1  ;;  %v2555_v23 = vadd.f32 %v2554_v39, %v2415_v1 }
 0x554   :  { %v2486_v53 = vadd.f32 %v2485_v41, %v2414_v42  ;;  %v2557_v14 = vadd.f32 %v2556_v52, %v2416_v3 }
 0x555   :  { %v2559_v13 = vmul.f32 0.5, %v2484_v33  ;;  %v2646_v33 = vld [vmem:[%s2645_s29] ss:$8 sm:$0xf] }
 0x556   :  { %v2560_v44 = vmul.f32 0.5, %v2486_v53  ;;  %v2568_v48 = vmul.f32 0.5, %v2557_v14  ;;  %v2787_v3 = vrot.slane %v2646_v33, %v4945_v11 }
 0x557   :  { %4594 = vtanh.f32 %v2559_v13 }
 0x558   :  { %4596 = vtanh.f32 %v2560_v44 }
 0x559   :  { %4598 = vtanh.f32 %v2555_v23  ;;  %v2656_v23 = vld [vmem:[%s2655_s7] ss:$8 sm:$0xf] }
 0x55a   :  { %4600 = vtanh.f32 %v2568_v48 }
 0x561   :  { %v4595_v15 = vpop.eup %4594 }
 0x562   :  { %v4597_v56 = vpop.eup %4596  ;;  %v2563_v5 = vmul.f32 0.5, %v4595_v15 }
 0x563   :  { %v2564_v57 = vmul.f32 0.5, %v4597_v56  ;;  %v4599_v17 = vpop.eup %4598  ;;  %v2791_v56 = vrot.slane %v2646_v33, %v5109_v6 }
 0x564   :  { %v2565_v21 = vadd.f32 0.5, %v2563_v5  ;;  %v4601_v42 = vpop.eup %4600 }
 0x565   :  { %v2566_v20 = vadd.f32 0.5, %v2564_v57  ;;  %v2570_v38 = vmul.f32 0.5, %v4601_v42  ;;  %v2812_v42 = vrot.slane %v2656_v23, %v5109_v6 }
 0x566   :  { %v2573_v51 = vmul.f32 %v4599_v17, %v2565_v21  ;;  %v2808_v17 = vrot.slane %v2656_v23, %v4945_v11 }
 0x567   :  { %v2572_v54 = vmul.f32 %v2566_v20, %v5522_v63  ;;  %v2571_v31 = vadd.f32 0.5, %v2570_v38 }
 0x569   :  { %v5636_v46 = vadd.f32 %v2573_v51, %v2572_v54  ;;  %v2795_v54 = vrot.slane %v2646_v33, %v4952_v19 }
 0x56b   :  { %4602 = vtanh.f32 %v5636_v46 }
 0x575   :  { %v4603_v39 = vpop.eup %4602 }
 0x576   :  { %v2576_v61 = vmul.f32 %v4603_v39, %v2571_v31 }
 0x578   :  { %2918 = vmatmul.mubr.f32.vlgmr.msra.gmra.mrb[10].mxu0 %v2576_v61  ;;  %2989 = vmatmul.mubr.f32.vlgmr.msra.gmra.mrb[10].mxu1 %v2576_v61 }
 0x579   :  { %4448 = vmatpush1.bf16.msra.mxu0 %v4865_v8  ;;  %4480 = vmatpush1.bf16.msra.mxu1 %v4879_v18  ;;  %v2586_v8 = vld [vmem:[%s2585_s1] ss:$8 sm:$0xf]  ;;  %s3024_s1 = sshra.s32 %s3923_s9, 3 }
 0x57a   :  { %4450 = vmatprep.subr.bf16.mxu0 %v4867_v9  ;;  %4482 = vmatprep.subr.bf16.mxu1 %v4889_v26  ;;  %v2596_v9 = vld [vmem:[%s2595_s30] ss:$8 sm:$0xf]  ;;  %v2661_v18 = vrot.slane %v2586_v8, %v4945_v11  ;;  %v2665_v26 = vrot.slane %v2586_v8, %v5109_v6  ;;  %s5752_s30 = sld [smem:[#allocation2 + $0x207]]  ;;  %s4002_s17 = sshll.u32 %s3024_s1, 5 }
 0x57b   :  { %3353 = vmatprep.mubr.f32.mxu0 %v4763_v7  ;;  %3424 = vmatprep.mubr.f32.mxu1 %v4763_v7  ;;  %s3030_s20 = sadd.s32 %s4002_s17, %s3027_s16  ;;  %s4007_s1 = sshll.u32 %s3074_s10, 5 }
 0x57c   :  { %s3031_s28 = scalar_lea.vmem [#allocation6], %s3030_s20  ;;  %s3080_s6 = sadd.s32 %s4007_s1, %s3077_s14 }
 0x57d   :  { %4452 = vmatpush1.bf16.msra.mxu0 %v4875_v16  ;;  %4484 = vmatpush1.bf16.msra.mxu1 %v4894_v30  ;;  %v2606_v16 = vld [vmem:[%s2605_s2] ss:$8 sm:$0xf]  ;;  %v2686_v30 = vrot.slane %v2596_v9, %v5109_v6  ;;  %s4003_s2 = sshll.u32 %s3034_s21, 5  ;;  %s3087_s16 = sand.u32 7, %s5760_s0 }
 0x57e   :  { %4454 = vmatprep.subr.bf16.mxu0 %v4884_v22  ;;  %4486 = vmatprep.subr.bf16.mxu1 %v4907_v40  ;;  %v2682_v22 = vrot.slane %v2596_v9, %v4945_v11  ;;  %v2715_v63 = vrot.slane %v2606_v16, %v4958_v24  ;;  %s3040_s23 = sadd.s32 %s4003_s2, %s3037_s18  ;;  %s3081_s19 = scalar_lea.vmem [#allocation6], %s3080_s6 }
 0x57f   :  { %s3041_s11 = scalar_lea.vmem [#allocation6], %s3040_s23  ;;  %s3549_s23 = sshll.u32 %s4766_s22, 4  ;;  %s3550_s23 = int_to_ptr.vmem [resolvable:$true] %s3549_s23 }
 0x580   :  { %v2825_v40 = vsel %vm293_vm0, %v2661_v18, %v2682_v22  ;;  %v2799_v22 = vrot.slane %v2646_v33, %v4958_v24  ;;  %s3054_s25 = sshra.s32 %s5752_s30, 3  ;;  %s3057_s29 = sand.u32 7, %s5752_s30 }
 0x581   :  { %4456 = vmatpush1.bf16.msra.mxu0 %v4898_v32  ;;  %4488 = vmatpush1.bf16.msra.mxu1 %v4913_v45  ;;  %v2616_v32 = vld [vmem:[%s2615_s24] ss:$8 sm:$0xf]  ;;  %v2669_v45 = vrot.slane %v2586_v8, %v4952_v19  ;;  %s3047_s24 = sand.u32 7, %s3929_s12  ;;  %s4005_s7 = sshll.u32 %s3054_s25, 5 }
 0x582   :  { %4458 = vmatprep.subr.bf16.mxu0 %v4905_v37  ;;  %4490 = vmatprep.subr.bf16.mxu1 %v4920_v50  ;;  %v2703_v37 = vrot.slane %v2606_v16, %v4945_v11  ;;  %v2707_v50 = vrot.slane %v2606_v16, %v5109_v6  ;;  %v2736_v44 = vrot.slane %v2616_v32, %v4958_v24  ;;  %s3060_s12 = sadd.s32 %s4005_s7, %s3057_s29  ;;  %s3084_s30 = sshra.s32 %s5760_s0, 3 }
 0x583   :  { %s4008_s17 = sshll.u32 %s3084_s30, 5  ;;  %p4727_p8 = scmp.lt.s32.totalorder %s3550_s23, %s3550_s23 }
 0x584   :  { %s3090_s2 = sadd.s32 %s4008_s17, %s3087_s16 }
 0x585   :  { %4460 = vmatpush1.bf16.msra.mxu0 %v4917_v49  ;;  %4492 = vmatpush1.bf16.msra.mxu1 %v4932_v62  ;;  %v2690_v49 = vrot.slane %v2596_v9, %v4952_v19  ;;  %v2626_v62 = vld [vmem:[%s2625_s26] ss:$8 sm:$0xf]  ;;  %s3064_s26 = sshra.s32 %s5754_s15, 3  ;;  %s3061_s15 = scalar_lea.vmem [#allocation6], %s3060_s12 }
 0x586   :  { %4462 = vmatprep.subr.bf16.mxu0 %v4926_v55  ;;  %4494 = vmatprep.subr.bf16.mxu1 %v4941_v4  ;;  %v2826_v55 = vsel %vm293_vm0, %v2665_v26, %v2686_v30  ;;  %v2829_v4 = vsel %vm297_vm1, %v2825_v40, %v2703_v37  ;;  %v2753_v53 = vrot.slane %v2626_v62, %v4952_v19  ;;  %s4006_s9 = sshll.u32 %s3064_s26, 5  ;;  %s3091_s20 = scalar_lea.vmem [#allocation6], %s3090_s2 }
 0x587   :  { %v2757_v21 = vrot.slane %v2626_v62, %v4958_v24  ;;  %s3070_s13 = sadd.s32 %s4006_s9, %s3067_s8 }
 0x588   :  { %s3071_s18 = scalar_lea.vmem [#allocation6], %s3070_s13 }
 0x589   :  { %4464 = vmatpush1.bf16.msra.mxu0 %v4938_v2  ;;  %4496 = vmatpush1.bf16.msra.mxu1 %v4963_v27  ;;  %v2724_v2 = vrot.slane %v2616_v32, %v4945_v11  ;;  %v2827_v27 = vsel %vm293_vm0, %v2669_v45, %v2690_v49 }
 0x58a   :  { %4466 = vmatprep.subr.bf16.mxu0 %v4948_v12  ;;  %4498 = vmatprep.subr.bf16.mxu1 %v4971_v35  ;;  %v2711_v12 = vrot.slane %v2606_v16, %v4952_v19  ;;  %v2694_v35 = vrot.slane %v2596_v9, %v4958_v24  ;;  %v2816_v9 = vrot.slane %v2656_v23, %v4952_v19 }
 0x58d   :  { %4468 = vmatpush1.bf16.msra.mxu0 %v4961_v25  ;;  %4500 = vmatpush1.bf16.msra.mxu1 %v4973_v36  ;;  %v2728_v25 = vrot.slane %v2616_v32, %v5109_v6  ;;  %v2636_v36 = vld [vmem:[%s2635_s27] ss:$8 sm:$0xf]  ;;  %s3050_s27 = sadd.s32 %s4004_s3, %s3047_s24  ;;  %s4722_s24 = scalar_lea.vmem %s3550_s23, 128 }
 0x58e   :  { %4470 = vmatprep.subr.bf16.mxu0 %v4965_v28  ;;  %4502 = vmatprep.subr.bf16.mxu1 %v5002_v0  ;;  %v2830_v28 = vsel %vm297_vm1, %v2826_v55, %v2707_v50  ;;  %v2732_v0 = vrot.slane %v2616_v32, %v4952_v19  ;;  %v2766_v41 = vrot.slane %v2636_v36, %v4945_v11  ;;  %s3051_s21 = scalar_lea.vmem [#allocation6], %s3050_s27  ;;  %p4723_p7 = scmp.ne.s32.totalorder %s3550_s23, %s4722_s24 }
 0x58f   :  { %v2770_v29 = vrot.slane %v2636_v36, %v5109_v6  ;;  %v2774_v15 = vrot.slane %v2636_v36, %v4952_v19  ;;  %v2778_v39 = vrot.slane %v2636_v36, %v4958_v24  ;;  %v2820_v55 = vrot.slane %v2656_v23, %v4958_v24  ;;  %v3451_v23 = vld [vmem:[#allocation9 + $0x10] sm:$0xff]  ;;  %p4728_p9 = scmp.lt.s32.totalorder %s4722_s24, %s4722_s24 }
 0x591   :  { %4472 = vmatpush1.bf16.msra.mxu0 %v4969_v34  ;;  %4504 = vmatpush1.bf16.msra.mxu1 %v5007_v10  ;;  %v2673_v34 = vrot.slane %v2586_v8, %v4958_v24  ;;  %v2749_v10 = vrot.slane %v2626_v62, %v5109_v6  ;;  %p4729_p10 = por %p4728_p9, %p4727_p8 }
 0x592   :  { %4474 = vmatprep.subr.bf16.mxu0 %v4978_v43  ;;  %4506 = vmatprep.subr.bf16.mxu1 %v5027_v47  ;;  %v2745_v43 = vrot.slane %v2626_v62, %v4945_v11  ;;  %v2831_v47 = vsel %vm297_vm1, %v2827_v27, %v2711_v12 }
 0x593   :  { %v2828_v52 = vsel %vm293_vm0, %v2673_v34, %v2694_v35  ;;  %v2835_v13 = vsel %vm301_vm2, %v2831_v47, %v2732_v0  ;;  %p4730_p11 = pnand %p4729_p10, %p4723_p7 }
 0x594   :  { %v2832_v14 = vsel %vm297_vm1, %v2828_v52, %v2715_v63  ;;  %v2839_v5 = vsel %vm305_vm3, %v2835_v13, %v2753_v53  ;;  %v3450_v13 = vld [vmem:[#allocation9 + $0x8] sm:$0xff] }
 0x595   :  { %4476 = vmatpush1.bf16.msra.mxu0 %v4993_v59  ;;  %4508 = vmatpush1.bf16.msra.mxu1 %v5038_v60  ;;  %v2833_v59 = vsel %vm301_vm2, %v2829_v4, %v2724_v2  ;;  %v2834_v60 = vsel %vm301_vm2, %v2830_v28, %v2728_v25  ;;  %v2836_v20 = vsel %vm301_vm2, %v2832_v14, %v2736_v44  ;;  %v4764_v44 = vmov 0.0|0.0   ;;  %v3453_v14 = vld [vmem:[#allocation9 + $0x20] sm:$0xff] }
 0x596   :  { %v2837_v1 = vsel %vm305_vm3, %v2833_v59, %v2745_v43  ;;  %v2838_v58 = vsel %vm305_vm3, %v2834_v60, %v2749_v10  ;;  %v2843_v38 = vsel %vm309_vm4, %v2839_v5, %v2774_v15  ;;  %v2840_v61 = vsel %vm305_vm3, %v2836_v20, %v2757_v21  ;;  %4509 = vmatprep.subr.bf16.mxu0 %v4764_v44  ;;  %v3456_v5 = vld [vmem:[#allocation9 + $0x38] sm:$0xff]  ;;  %v3457_v21 = vld [vmem:[#allocation9 + $0x40] sm:$0xff] }
 0x597   :  { %v2841_v48 = vsel %vm309_vm4, %v2837_v1, %v2766_v41  ;;  %v2842_v57 = vsel %vm309_vm4, %v2838_v58, %v2770_v29  ;;  %v2847_v16 = vsel %vm313_vm5, %v2843_v38, %v2795_v54  ;;  %v2844_v32 = vsel %vm309_vm4, %v2840_v61, %v2778_v39  ;;  %v3449_v29 = vld [vmem:[#allocation9] sm:$0xff]  ;;  %v3460_v54 = vld [vmem:[#allocation9 + $0x58] sm:$0xff]  ;;  %v3463_v61 = vld [vmem:[#allocation9 + $0x70] sm:$0xff] }
 0x598   :  { %v2845_v51 = vsel %vm313_vm5, %v2841_v48, %v2787_v3  ;;  %v2846_v31 = vsel %vm313_vm5, %v2842_v57, %v2791_v56  ;;  %v2851_v49 = vsel %vm317_vm6, %v2847_v16, %v2816_v9  ;;  %v2848_v2 = vsel %vm313_vm5, %v2844_v32, %v2799_v22  ;;  %v3454_v48 = vld [vmem:[#allocation9 + $0x28] sm:$0xff]  ;;  %v3455_v56 = vld [vmem:[#allocation9 + $0x30] sm:$0xff]  ;;  %v3461_v38 = vld [vmem:[#allocation9 + $0x60] sm:$0xff] }
 0x599   :  { %v2849_v8 = vsel %vm317_vm6, %v2845_v51, %v2808_v17  ;;  %v2850_v18 = vsel %vm317_vm6, %v2846_v31, %v2812_v42  ;;  %v2852_v25 = vsel %vm317_vm6, %v2848_v2, %v2820_v55  ;;  %v4510_v58 = vpack.c.bf16 %v3450_v13, %v3449_v29  ;;  %v3458_v17 = vld [vmem:[#allocation9 + $0x48] sm:$0xff]  ;;  %v3459_v51 = vld [vmem:[#allocation9 + $0x50] sm:$0xff] }
 0x59a   :  { %v4516_v15 = vpack.c.bf16 %v3454_v48, %v3453_v14  ;;  %v4519_v57 = vpack.c.bf16 %v3456_v5, %v3455_v56  ;;  %v4522_v20 = vpack.c.bf16 %v3458_v17, %v3457_v21  ;;  %v4525_v42 = vpack.c.bf16 %v3460_v54, %v3459_v51  ;;  %v3462_v31 = vld [vmem:[#allocation9 + $0x68] sm:$0xff] }
 0x59b   :  { %v4528_v39 = vpack.c.bf16 %v3462_v31, %v3461_v38  ;;  %v3032_v16 = vld [vmem:[%s3031_s28] ss:$8 sm:$0xf] }
 0x59c   :  { %v3122_v32 = vrot.slane %v3032_v16, %v5109_v6  ;;  %v3062_v2 = vld [vmem:[%s3061_s15] ss:$8 sm:$0xf] }
 0x59d   :  { %v3189_v13 = vrot.slane %v3062_v2, %v4952_v19  ;;  %v3193_v17 = vrot.slane %v3062_v2, %v4958_v24 }
 0x64b   :  { %v2919_v26 = vpop.f32.mrb[10].mxu0  ;;  %v2990_v30 = vpop.f32.mrb[10].mxu1 }
 0x64c   :  { %v2920_v37 = vadd.f32 %v2919_v26, %v2849_v8  ;;  %v2921_v40 = vpop.f32.mrb[11].mxu0  ;;  %v2992_v45 = vpop.f32.mrb[11].mxu1  ;;  %v2991_v12 = vadd.f32 %v2990_v30, %v2851_v49  ;;  %v3464_v8 = vld [vmem:[#allocation9 + $0x78] sm:$0xff]  ;;  %v3118_v26 = vrot.slane %v3032_v16, %v4945_v11 }
 0x64d   :  { %v2922_v50 = vadd.f32 %v2921_v40, %v2850_v18  ;;  %v2993_v27 = vadd.f32 %v2992_v45, %v2852_v25  ;;  %v4531_v9 = vpack.c.bf16 %v3464_v8, %v3463_v61  ;;  %v3042_v18 = vld [vmem:[%s3041_s11] ss:$8 sm:$0xf] }
 0x64e   :  { %v2995_v62 = vmul.f32 0.5, %v2920_v37  ;;  %v3052_v37 = vld [vmem:[%s3051_s21] ss:$8 sm:$0xf]  ;;  %v3139_v40 = vrot.slane %v3042_v18, %v4945_v11  ;;  %v3143_v55 = vrot.slane %v3042_v18, %v5109_v6  ;;  %v3147_v25 = vrot.slane %v3042_v18, %v4952_v19 }
 0x64f   :  { %v2996_v4 = vmul.f32 0.5, %v2922_v50  ;;  %v3004_v28 = vmul.f32 0.5, %v2993_v27  ;;  %v3126_v50 = vrot.slane %v3032_v16, %v4952_v19  ;;  %v3164_v27 = vrot.slane %v3052_v37, %v5109_v6 }
 0x650   :  { %4604 = vtanh.f32 %v2995_v62 }
 0x651   :  { %4606 = vtanh.f32 %v2996_v4  ;;  %v3160_v4 = vrot.slane %v3052_v37, %v4945_v11 }
 0x652   :  { %4608 = vtanh.f32 %v2991_v12 }
 0x653   :  { %4610 = vtanh.f32 %v3004_v28 }
 0x65a   :  { %v4605_v34 = vpop.eup %4604 }
 0x65b   :  { %v4607_v35 = vpop.eup %4606  ;;  %v2999_v36 = vmul.f32 0.5, %v4605_v34 }
 0x65c   :  { %v3000_v43 = vmul.f32 0.5, %v4607_v35  ;;  %v4609_v0 = vpop.eup %4608 }
 0x65d   :  { %v3001_v59 = vadd.f32 0.5, %v2999_v36  ;;  %v4611_v33 = vpop.eup %4610  ;;  %v3130_v36 = vrot.slane %v3032_v16, %v4958_v24 }
 0x65e   :  { %v3002_v10 = vadd.f32 0.5, %v3000_v43  ;;  %v3006_v41 = vmul.f32 0.5, %v4611_v33  ;;  %v3072_v43 = vld [vmem:[%s3071_s18] ss:$8 sm:$0xf] }
 0x65f   :  { %v3009_v47 = vmul.f32 %v4609_v0, %v3001_v59  ;;  %v3181_v59 = vrot.slane %v3062_v2, %v4945_v11  ;;  %v3210_v56 = vrot.slane %v3072_v43, %v4952_v19  ;;  %v3214_v61 = vrot.slane %v3072_v43, %v4958_v24 }
 0x660   :  { %v3008_v60 = vmul.f32 %v3002_v10, %v5636_v46  ;;  %v3007_v52 = vadd.f32 0.5, %v3006_v41  ;;  %v3452_v46 = vld [vmem:[#allocation9 + $0x18] sm:$0xff]  ;;  %v3168_v10 = vrot.slane %v3052_v37, %v4952_v19  ;;  %v3151_v41 = vrot.slane %v3042_v18, %v4958_v24 }
 0x661   :  { %v4513_v3 = vpack.c.bf16 %v3452_v46, %v3451_v23  ;;  %v3172_v46 = vrot.slane %v3052_v37, %v4958_v24 }
 0x662   :  { %v5748_v63 = vadd.f32 %v3009_v47, %v3008_v60  ;;  %v3185_v47 = vrot.slane %v3062_v2, %v5109_v6 }
 0x664   :  { %4612 = vtanh.f32 %v5748_v63 }
 0x66e   :  { %v4613_v1 = vpop.eup %4612 }
 0x66f   :  { %v3012_v53 = vmul.f32 %v4613_v1, %v3007_v52  ;;  %v3082_v52 = vld [vmem:[%s3081_s19] ss:$8 sm:$0xf]  ;;  %v3202_v1 = vrot.slane %v3072_v43, %v4945_v11 }
 0x670   :  { %v3223_v14 = vrot.slane %v3082_v52, %v4945_v11  ;;  %v3227_v5 = vrot.slane %v3082_v52, %v5109_v6  ;;  %v3235_v18 = vrot.slane %v3082_v52, %v4958_v24 }
 0x671   :  { %3354 = vmatmul.mubr.f32.vlgmr.msra.gmra.mrb[12].mxu0 %v3012_v53  ;;  %3425 = vmatmul.mubr.f32.vlgmr.msra.gmra.mrb[12].mxu1 %v3012_v53 }
 0x672   :  { %4511 = vmatpush3.bf16.msra.mxu0 %v4510_v58  ;;  %4058 = vmatprep.mubr.msk.f32.mxu0 %vm4765_vm7, %v4763_v7  ;;  %v3022_v7 = vld [vmem:[%s3021_s4] ss:$8 sm:$0xf]  ;;  %v3206_v58 = vrot.slane %v3072_v43, %v5109_v6 }
 0x673   :  { %4512 = vmatprep.subr.bf16.mxu0 %v4764_v44  ;;  %v3097_v22 = vrot.slane %v3022_v7, %v4945_v11  ;;  %v3101_v30 = vrot.slane %v3022_v7, %v5109_v6  ;;  %v3105_v49 = vrot.slane %v3022_v7, %v4952_v19  ;;  %v3109_v35 = vrot.slane %v3022_v7, %v4958_v24 }
 0x675   :  { %v3261_v45 = vsel %vm293_vm0, %v3097_v22, %v3118_v26  ;;  %v3262_v62 = vsel %vm293_vm0, %v3101_v30, %v3122_v32  ;;  %v3263_v28 = vsel %vm293_vm0, %v3105_v49, %v3126_v50  ;;  %v3264_v53 = vsel %vm293_vm0, %v3109_v35, %v3130_v36 }
 0x676   :  { %4514 = vmatpush3.bf16.msra.mxu0 %v4513_v3  ;;  %v3265_v12 = vsel %vm297_vm1, %v3261_v45, %v3139_v40  ;;  %v3266_v34 = vsel %vm297_vm1, %v3262_v62, %v3143_v55  ;;  %v3267_v60 = vsel %vm297_vm1, %v3263_v28, %v3147_v25  ;;  %v3092_v3 = vld [vmem:[%s3091_s20] ss:$8 sm:$0xf]  ;;  %v3268_v48 = vsel %vm297_vm1, %v3264_v53, %v3151_v41 }
 0x677   :  { %4515 = vmatprep.subr.bf16.mxu0 %v4764_v44  ;;  %v3269_v0 = vsel %vm301_vm2, %v3265_v12, %v3160_v4  ;;  %v3270_v33 = vsel %vm301_vm2, %v3266_v34, %v3164_v27  ;;  %v3272_v51 = vsel %vm301_vm2, %v3268_v48, %v3172_v46  ;;  %v3248_v38 = vrot.slane %v3092_v3, %v5109_v6 }
 0x678   :  { %v3273_v29 = vsel %vm305_vm3, %v3269_v0, %v3181_v59  ;;  %v3274_v23 = vsel %vm305_vm3, %v3270_v33, %v3185_v47  ;;  %v3276_v8 = vsel %vm305_vm3, %v3272_v51, %v3193_v17  ;;  %v3256_v49 = vrot.slane %v3092_v3, %v4958_v24 }
 0x679   :  { %v3278_v21 = vsel %vm309_vm4, %v3274_v23, %v3206_v58  ;;  %v3280_v26 = vsel %vm309_vm4, %v3276_v8, %v3214_v61 }
 0x67a   :  { %4517 = vmatpush3.bf16.msra.mxu0 %v4516_v15  ;;  %v3277_v15 = vsel %vm309_vm4, %v3273_v29, %v3202_v1 }
 0x67b   :  { %4518 = vmatprep.subr.bf16.mxu0 %v4764_v44  ;;  %v3281_v54 = vsel %vm313_vm5, %v3277_v15, %v3223_v14 }
 0x67e   :  { %4520 = vmatpush3.bf16.msra.mxu0 %v4519_v57 }
 0x67f   :  { %4521 = vmatprep.subr.bf16.mxu0 %v4764_v44 }
 0x682   :  { %4523 = vmatpush3.bf16.msra.mxu0 %v4522_v20  ;;  %v3244_v20 = vrot.slane %v3092_v3, %v4945_v11  ;;  %v3252_v11 = vrot.slane %v3092_v3, %v4952_v19 }
 0x683   :  { %4524 = vmatprep.subr.bf16.mxu0 %v4764_v44 }
 0x686   :  { %4526 = vmatpush3.bf16.msra.mxu0 %v4525_v42  ;;  %v3231_v42 = vrot.slane %v3082_v52, %v4952_v19  ;;  %v3284_v19 = vsel %vm313_vm5, %v3280_v26, %v3235_v18  ;;  %v3944_v52 = vld [vmem:[#allocation10] ss:$0 sm:$0xff] }
 0x687   :  { %4527 = vmatprep.subr.bf16.mxu0 %v4764_v44  ;;  %v3288_v2 = vsel %vm317_vm6, %v3284_v19, %v3256_v49 }
 0x68a   :  { %4529 = vmatpush3.bf16.msra.mxu0 %v4528_v39  ;;  %v3282_v39 = vsel %vm313_vm5, %v3278_v21, %v3227_v5 }
 0x68b   :  { %4530 = vmatprep.subr.bf16.mxu0 %v4764_v44  ;;  %v3271_v44 = vsel %vm301_vm2, %v3267_v60, %v3168_v10  ;;  %v3286_v16 = vsel %vm317_vm6, %v3282_v39, %v3248_v38 }
 0x68c   :  { %v3275_v57 = vsel %vm305_vm3, %v3271_v44, %v3189_v13 }
 0x68d   :  { %v3279_v31 = vsel %vm309_vm4, %v3275_v57, %v3210_v56 }
 0x68e   :  { %4532 = vmatpush3.bf16.msra.mxu0 %v4531_v9  ;;  %v3285_v9 = vsel %vm317_vm6, %v3281_v54, %v3244_v20  ;;  %v3283_v7 = vsel %vm313_vm5, %v3279_v31, %v3231_v42 }
 0x68f   :  { %v3287_v40 = vsel %vm317_vm6, %v3283_v7, %v3252_v11 }
 0x744   :  { %v3355_v22 = vpop.f32.mrb[12].mxu0  ;;  %v3426_v6 = vpop.f32.mrb[12].mxu1 }
 0x745   :  { %v3356_v30 = vadd.f32 %v3355_v22, %v3285_v9  ;;  %v3357_v32 = vpop.f32.mrb[13].mxu0  ;;  %v3428_v37 = vpop.f32.mrb[13].mxu1  ;;  %v3427_v62 = vadd.f32 %v3426_v6, %v3287_v40 }
 0x746   :  { %v3358_v45 = vadd.f32 %v3357_v32, %v3286_v16  ;;  %v3429_v4 = vadd.f32 %v3428_v37, %v3288_v2 }
 0x747   :  { %v3431_v50 = vmul.f32 0.5, %v3356_v30 }
 0x748   :  { %v3432_v55 = vmul.f32 0.5, %v3358_v45  ;;  %v3440_v12 = vmul.f32 0.5, %v3429_v4 }
 0x749   :  { %4614 = vtanh.f32 %v3431_v50 }
 0x74a   :  { %4616 = vtanh.f32 %v3432_v55 }
 0x74b   :  { %4618 = vtanh.f32 %v3427_v62 }
 0x74c   :  { %4620 = vtanh.f32 %v3440_v12 }
 0x753   :  { %v4615_v25 = vpop.eup %4614 }
 0x754   :  { %v4617_v27 = vpop.eup %4616  ;;  %v3435_v28 = vmul.f32 0.5, %v4615_v25 }
 0x755   :  { %v3436_v34 = vmul.f32 0.5, %v4617_v27  ;;  %v4619_v36 = vpop.eup %4618 }
 0x756   :  { %v3437_v35 = vadd.f32 0.5, %v3435_v28  ;;  %v4621_v10 = vpop.eup %4620 }
 0x757   :  { %v3438_v24 = vadd.f32 0.5, %v3436_v34  ;;  %v3442_v47 = vmul.f32 0.5, %v4621_v10 }
 0x758   :  { %v3445_v43 = vmul.f32 %v4619_v36, %v3437_v35 }
 0x759   :  { %v3444_v59 = vmul.f32 %v3438_v24, %v5748_v63  ;;  %v3443_v60 = vadd.f32 0.5, %v3442_v47 }
 0x75b   :  { %v3446_v0 = vadd.f32 %v3445_v43, %v3444_v59 }
 0x75d   :  { %4622 = vtanh.f32 %v3446_v0 }
 0x767   :  { %v4623_v33 = vpop.eup %4622 }
 0x768   :  { %v3448_v41 = vmul.f32 %v4623_v33, %v3443_v60 }
 0x76a   :  { %4059 = vmatmul.mubr.f32.vlgmr.msra.gmra.mrb[14].mxu0 %v3448_v41 }
 0x83d   :  { %v3538_v1 = vpop.f32.mrb[14].mxu0 }
 0x83e   :  { %v3539_v53 = vadd.f32 %v3944_v52, %v3538_v1  ;;  %v4060_v29 = vpop.f32.mrb[15].mxu0 }
 0x840   :  { %3542 = vst [vmem:[#allocation12] sm:$0xff] %v3539_v53 }
 0x841   :  { %4733 = shalt.err (!%p4730_p11)
}
 0x842   :  { %s4734_s26 = scalar_lea.hbm %s5846_s5, 128 }
 0x843   :  { %p4735_p12 = scmp.ne.s32.totalorder %s5846_s5, %s4734_s26  ;;  %p4738_p13 = scmp.lt.u32.totalorder %s4734_s26, %s5846_s5 }
 0x845   :  { %p4740_p0 = pnand %p4738_p13, %p4735_p12 }
 0x847   :  { %4743 = shalt.err (!%p4740_p0)
}
 0x848   :  { %3552 = dma.vmem_to_hbm [thread:$0]  %s3550_s23, 128, %s5846_s5, [#allocation4]  }
 0x849   :  { %4752 = dma.done.wait [#allocation4], 128  }
 0x84a   :  { %4753 = vsyncadd [#allocation4], 4294967168 }
 0x84b   :  { %3556 = vsyncpa [#allocation3], 1 }
 0x84c   :  { %3557 = vsyncpa [#allocation8], 1 }
 0x84d   :  { %3558 = vsyncpa [#allocation11], 1 }
 0x84e   :  { %3559 = vsyncpa [#allocation4], 1 }
 0x84f   :  { %3560 = vsyncpa [#allocation5], 1 }

</bundles_post_ra>
